<compile_context>
chip_gen: v6e
topology: v6e:2x2x1
jax: 0.10.0
libtpu: 0.0.40
codegen_flags: <defaults>
</compile_context>

<pallas_src>
import functools

import jax
import jax.numpy as jnp
from jax.experimental import pallas as pl
from jax.experimental.pallas import tpu as pltpu

LANE = 128  # TPU lane width / channel padding target


def _round_up(x, m):
    return ((x + m - 1) // m) * m


# ---------------------------------------------------------------------------
# Kernel 1: stride-2 3x3 conv (+bias+ReLU) on a parity-folded, flattened slab.
# ---------------------------------------------------------------------------
def _conv3x3_s2_kernel(x_ref, w_ref, b_ref, o_ref, *, ho, ws):
    """Per-image stride-2 pad-1 3x3 conv as 4 contiguous-slice matmuls.

      x_ref : [1, R, 4*cin_p]  bf16  2x2-parity-folded, halo-padded, (h,w)-flattened
      w_ref : [4, 4*cin_p, C]  bf16  parity-combined tap weights
      b_ref : [1, C]           f32
      o_ref : [1, ho*ws, C]    bf16  rows are (o_h, o_w) over a (ho, ws) grid;
                                     column ws-1 is wrap-around garbage, dropped
                                     by the wrapper.
    """
    m = ho * ws
    x = x_ref[0]                                    # single load, slices below are views
    acc = jnp.zeros((m, w_ref.shape[-1]), jnp.float32)
    for s in range(4):                              # (row, col) parity offsets
        off = (s // 2) * ws + (s % 2)
        acc = acc + jnp.dot(x[off:off + m, :], w_ref[s],
                            preferred_element_type=jnp.float32)
    o_ref[0] = jnp.maximum(acc + b_ref[...], 0.0).astype(o_ref.dtype)


def _conv_s2d_weights(w, cin_p, cout_p=LANE):
    """Torch conv weight [cout, cin, 3, 3] -> [4, 4*cin_p, cout_p] parity-combined."""
    cout, cin = w.shape[:2]
    wt = jnp.transpose(w, (2, 3, 1, 0))                          # [dy, dx, cin, cout]
    wt = jnp.pad(wt, ((0, 1), (0, 1), (0, cin_p - cin), (0, cout_p - cout)))
    wt = wt.reshape(2, 2, 2, 2, cin_p, cout_p).transpose(0, 2, 1, 3, 4, 5)
    return wt.reshape(4, 4 * cin_p, cout_p).astype(jnp.bfloat16)  # [ry*2+rx, sy*2cp+sx*cp+c, co]


def conv3x3_s2(x_nhwc, w, b):
    """NHWC stride-2 pad-1 3x3 conv + bias + ReLU; one pallas_call, grid (N,)."""
    N, H, W, C = x_nhwc.shape
    ho, wo = (H + 1) // 2, (W + 1) // 2
    hs, ws = ho + 2, wo + 1                 # +2 rows of slack so all tap slices stay in bounds
    cin_p = _round_up(C, 32)                # folded lane dim 4*cin_p is a multiple of 128
    # cast + channel-pad + halo-pad + 2x2 parity fold (one small XLA pass; replaces the
    # old 9x-duplicating im2col HBM round-trip).
    xp = jnp.pad(x_nhwc.astype(jnp.bfloat16),
                 ((0, 0), (1, 2 * hs - H - 1), (1, 2 * ws - W - 1), (0, cin_p - C)))
    xs = xp.reshape(N, hs, 2, ws, 2, cin_p).transpose(0, 1, 3, 2, 4, 5)
    xs = xs.reshape(N, hs * ws, 4 * cin_p)
    wc = _conv_s2d_weights(w, cin_p)
    bp = jnp.pad(b, (0, LANE - b.shape[0])).reshape(1, LANE).astype(jnp.float32)
    # TODO(synk): for real FCN feature sizes, add spatial (row-block) tiling + an explicit
    # vmem_limit so the per-image block fits v7x's 64 MiB VMEM; at these toy sizes the
    # whole image is a few 10s of KB.
    out = pl.pallas_call(
        functools.partial(_conv3x3_s2_kernel, ho=ho, ws=ws),
        out_shape=jax.ShapeDtypeStruct((N, ho * ws, LANE), jnp.bfloat16),
        grid=(N,),
        in_specs=[
            pl.BlockSpec((1, hs * ws, 4 * cin_p), lambda n: (n, 0, 0)),
            pl.BlockSpec((4, 4 * cin_p, LANE), lambda n: (0, 0, 0)),
            pl.BlockSpec((1, LANE), lambda n: (0, 0)),
        ],
        out_specs=pl.BlockSpec((1, ho * ws, LANE), lambda n: (n, 0, 0)),
        compiler_params=pltpu.CompilerParams(dimension_semantics=("parallel",)),
    )(xs, wc, bp)
    # drop the wrap-around column -> standard NHWC feature map
    return out.reshape(N, ho, ws, LANE)[:, :, :wo, :]


# ---------------------------------------------------------------------------
# Kernel 2: fused FCNHead (3x3 conv -> BN(eval) -> ReLU -> 1x1 conv) + bilinear
#           upsample (align_corners=True), one pallas_call per head.
# ---------------------------------------------------------------------------
def _fcn_head_upsample_kernel(x_ref, w1_ref, shift_ref, w2_ref, b2_ref,
                              interp_ref, o_ref, *, ho, wp2):
    """Per-image fused head + upsample; nothing intermediate leaves VMEM.

      x_ref     : [1, R, cin_p]      bf16  zero-halo-padded feature, (h,w)-flattened
      w1_ref    : [9, cin_p, cmid_p] bf16  3x3 conv weights, BN scale folded
      shift_ref : [1, cmid_p]        f32   beta - mean*scale
      w2_ref    : [cmid_p, ncls_p]   bf16  1x1 conv weights
      b2_ref    : [1, ncls_p]        f32
      interp_ref: [H*W, ho*wp2]      bf16  combined bilinear matrix (invalid cols zero)
      o_ref     : [1, H*W, ncls_p]   f32
    """
    m = ho * wp2
    x = x_ref[0]
    acc = jnp.zeros((m, w1_ref.shape[-1]), jnp.float32)
    for dy in range(3):                           # 9 taps, each ONE contiguous-slice matmul
        for dx in range(3):
            off = dy * wp2 + dx
            acc = acc + jnp.dot(x[off:off + m, :], w1_ref[dy * 3 + dx],
                                preferred_element_type=jnp.float32)
    hidden = jnp.maximum(acc + shift_ref[...], 0.0).astype(jnp.bfloat16)     # BN + ReLU
    logits = jnp.dot(hidden, w2_ref[...], preferred_element_type=jnp.float32)
    # bilinear weights sum to 1 over valid columns, so the bias commutes with the
    # interpolation and is added once after the (MXU) upsample matmul.
    out = jnp.dot(interp_ref[...], logits.astype(jnp.bfloat16),
                  preferred_element_type=jnp.float32) + b2_ref[...]
    o_ref[0] = out


def _interp_matrix(out_size, in_size):
    """Row-stochastic 1-D linear interpolation matrix, align_corners=True."""
    scale = (in_size - 1) / (out_size - 1) if out_size > 1 else 0.0
    src = jnp.arange(out_size, dtype=jnp.float32) * scale
    i0 = jnp.clip(jnp.floor(src).astype(jnp.int32), 0, in_size - 1)
    i1 = jnp.clip(i0 + 1, 0, in_size - 1)
    w1 = src - i0.astype(jnp.float32)
    return (jax.nn.one_hot(i0, in_size, dtype=jnp.float32) * (1.0 - w1)[:, None]
            + jax.nn.one_hot(i1, in_size, dtype=jnp.float32) * w1[:, None])


def _head_weights(p, cin_p):
    cmid, cin = p['w1'].shape[0], p['w1'].shape[1]
    ncls = p['w2'].shape[0]
    eps = 1e-5
    scale = p['gamma'] * jax.lax.rsqrt(p['var'] + eps)
    shift = p['beta'] - p['mean'] * scale
    w1 = p['w1'] * scale[:, None, None, None]                    # fold BN scale into conv
    w1 = jnp.transpose(w1, (2, 3, 1, 0))                         # [dy, dx, cin, cmid]
    w1 = jnp.pad(w1, ((0, 0), (0, 0), (0, cin_p - cin), (0, LANE - cmid)))
    w1 = w1.reshape(9, cin_p, LANE).astype(jnp.bfloat16)
    shift_p = jnp.pad(shift, (0, LANE - cmid)).reshape(1, LANE).astype(jnp.float32)
    w2 = jnp.pad(p['w2'][:, :, 0, 0].T,
                 ((0, LANE - cmid), (0, LANE - ncls))).astype(jnp.bfloat16)
    b2 = jnp.pad(p['b2'], (0, LANE - ncls)).reshape(1, LANE).astype(jnp.float32)
    return w1, shift_p, w2, b2


def fcn_head_upsample(feat, head_p, H, W):
    """FCNHead + bilinear resize to (H, W) fused in one pallas_call per head."""
    # TODO(synk): FCNHead's Dropout(0.1) is an inference no-op and is omitted.
    N, ho, wo, cin_p = feat.shape
    wp2 = wo + 2
    m = ho * wp2
    w1, shift, w2, b2 = _head_weights(head_p, cin_p)
    wh = _interp_matrix(H, ho)                                   # [H, ho]
    ww = jnp.pad(_interp_matrix(W, wo), ((0, 0), (0, 2)))        # zero cols for halo/wrap rows
    interp = jnp.einsum('ah,bw->abhw', wh, ww).reshape(H * W, m).astype(jnp.bfloat16)
    # zero-halo pad (+1 extra bottom row of slack) and flatten (h, w) -> one slab axis
    xp = jnp.pad(feat, ((0, 0), (1, 2), (1, 1), (0, 0))).reshape(N, (ho + 3) * wp2, cin_p)
    # TODO(synk): add row-block spatial tiling + vmem_limit_bytes before using real
    # FCN feature sizes (whole-image blocks would outgrow v7x's 64 MiB VMEM).
    return pl.pallas_call(
        functools.partial(_fcn_head_upsample_kernel, ho=ho, wp2=wp2),
        out_shape=jax.ShapeDtypeStruct((N, H * W, LANE), jnp.float32),
        grid=(N,),
        in_specs=[
            pl.BlockSpec((1, (ho + 3) * wp2, cin_p), lambda n: (n, 0, 0)),
            pl.BlockSpec((9, cin_p, LANE), lambda n: (0, 0, 0)),
            pl.BlockSpec((1, LANE), lambda n: (0, 0)),
            pl.BlockSpec((LANE, LANE), lambda n: (0, 0)),
            pl.BlockSpec((1, LANE), lambda n: (0, 0)),
            pl.BlockSpec((H * W, m), lambda n: (0, 0)),
        ],
        out_specs=pl.BlockSpec((1, H * W, LANE), lambda n: (n, 0, 0)),
        compiler_params=pltpu.CompilerParams(dimension_semantics=("parallel",)),
    )(xp, w1, shift, w2, b2, interp)


# ---------------------------------------------------------------------------
# Model pieces
# ---------------------------------------------------------------------------
def backbone_fwd(x_nhwc, p):
    """Synthetic backbone: two stride-2 3x3 convs (bias+ReLU); 'aux' after conv1,
    'out' after conv2."""
    # TODO(synk): the real torchvision FCN backbone (dilated ResNet) is a constructor
    # argument of FCNModel and is stubbed with this small deterministic backbone.
    aux = conv3x3_s2(x_nhwc, p['w1'], p['b1'])       # [N, H/2, W/2, 128] bf16
    out = conv3x3_s2(aux, p['w2'], p['b2'])          # [N, H/4, W/4, 128] bf16
    return {'out': out, 'aux': aux}


def fcn_model_forward(x_nchw, params):
    """Matches FCNModel.forward: {'out','aux'} NCHW logits, bilinearly resized
    (mode='bilinear', align_corners=True) to the input spatial size."""
    N, _, H, W = x_nchw.shape
    x_nhwc = jnp.transpose(x_nchw, (0, 2, 3, 1))
    feats = backbone_fwd(x_nhwc, params['backbone'])
    result = {}
    for name, feat_key, head_key in (('out', 'out', 'classifier'),
                                     ('aux', 'aux', 'aux_classifier')):
        head_p = params[head_key]
        ncls = head_p['w2'].shape[0]
        up = fcn_head_upsample(feats[feat_key], head_p, H, W)    # [N, H*W, 128] f32
        result[name] = jnp.transpose(
            up[..., :ncls].reshape(N, H, W, ncls), (0, 3, 1, 2))
    return result


# ---------------------------------------------------------------------------
# Param init
# ---------------------------------------------------------------------------
def init_params(key, cin=4, c1=8, c2=16, num_classes=3):
    ks = jax.random.split(key, 12)

    def nrm(k, shape, s=0.1):
        return (s * jax.random.normal(k, shape)).astype(jnp.float32)

    backbone = {
        'w1': nrm(ks[0], (c1, cin, 3, 3)), 'b1': nrm(ks[1], (c1,)),
        'w2': nrm(ks[2], (c2, c1, 3, 3)), 'b2': nrm(ks[3], (c2,)),
    }

    def head(kw1, kw2, kb2, cin_h, ncls):
        cmid = max(cin_h // 4, 1)
        return {
            'w1': nrm(kw1, (cmid, cin_h, 3, 3)),
            'gamma': jnp.ones((cmid,), jnp.float32),
            'beta': jnp.full((cmid,), 0.05, jnp.float32),
            'mean': jnp.full((cmid,), 0.1, jnp.float32),
            'var': jnp.full((cmid,), 1.5, jnp.float32),
            'w2': nrm(kw2, (ncls, cmid, 1, 1)),
            'b2': nrm(kb2, (ncls,)),
        }

    classifier = head(ks[4], ks[5], ks[6], c2, num_classes)
    aux_classifier = head(ks[7], ks[8], ks[9], c1, num_classes)
    return {'backbone': backbone, 'classifier': classifier,
            'aux_classifier': aux_classifier}


# ---------------------------------------------------------------------------
# Main
# ---------------------------------------------------------------------------
if __name__ == "__main__":
    key = jax.random.PRNGKey(0)
    k_x, k_p = jax.random.split(key)
    N, C, H, W = 2, 4, 16, 16
    num_classes = 3
    x = jax.random.normal(k_x, (N, C, H, W), dtype=jnp.float32)   # NCHW like PyTorch
    params = init_params(k_p, cin=C, c1=8, c2=16, num_classes=num_classes)

    fwd = jax.jit(fcn_model_forward)
    result = fwd(x, params)
    jax.block_until_ready(result['out'])
    jax.block_until_ready(result['aux'])

    assert result['out'].shape == (N, num_classes, H, W), result['out'].shape
    assert result['aux'].shape == (N, num_classes, H, W), result['aux'].shape
    assert bool(jnp.all(jnp.isfinite(result['out'])))
    assert bool(jnp.all(jnp.isfinite(result['aux'])))
    print("KERNEL_OK")
</pallas_src>

<mosaic_0001>
module attributes {stable_mosaic.version = 11 : i64} {
  func.func @_conv3x3_s2_kernel(%arg0: i32, %arg1: memref<1x90x128xbf16, #tpu.memory_space<vmem>>, %arg2: memref<4x128x128xbf16, #tpu.memory_space<vmem>>, %arg3: memref<1x128xf32, #tpu.memory_space<vmem>>, %arg4: memref<1x72x128xbf16, #tpu.memory_space<vmem>>) attributes {dimension_semantics = [#tpu.dimension_semantics<parallel>], iteration_bounds = array<i64: 2>, scalar_prefetch = 0 : i64, scratch_operands = 0 : i64, tpu.core_type = #tpu.core_type<tc>, window_params = [{transform_indices = @transform_0, window_bounds = array<i64: 1, 90, 128>}, {pipeline_mode = #tpu.pipeline_mode<synchronous>, transform_indices = @transform_1, window_bounds = array<i64: 4, 128, 128>}, {pipeline_mode = #tpu.pipeline_mode<synchronous>, transform_indices = @transform_2, window_bounds = array<i64: 1, 128>}, {transform_indices = @transform_3, window_bounds = array<i64: 1, 72, 128>}]} {
    %c0 = arith.constant 0 : index
    %c0_0 = arith.constant 0 : index
    %c0_1 = arith.constant 0 : index
    %0 = vector.load %arg1[%c0, %c0_0, %c0_1] : memref<1x90x128xbf16, #tpu.memory_space<vmem>>, vector<1x90x128xbf16>
    %1 = vector.shape_cast %0 : vector<1x90x128xbf16> to vector<90x128xbf16>
    %cst = arith.constant 0.000000e+00 : f32
    %2 = vector.broadcast %cst : f32 to vector<72x128xf32>
    %3 = vector.extract_strided_slice %1 {offsets = [0, 0], sizes = [72, 128], strides = [1, 1]} : vector<90x128xbf16> to vector<72x128xbf16>
    %c0_2 = arith.constant 0 : index
    %c0_3 = arith.constant 0 : index
    %c0_4 = arith.constant 0 : index
    %4 = vector.load %arg2[%c0_2, %c0_3, %c0_4] : memref<4x128x128xbf16, #tpu.memory_space<vmem>>, vector<1x128x128xbf16>
    %5 = vector.shape_cast %4 : vector<1x128x128xbf16> to vector<128x128xbf16>
    %cst_5 = arith.constant dense<0.000000e+00> : vector<72x128xf32>
    %6 = tpu.matmul %3, %5, %cst_5 {dimension_numbers = #tpu.dot_dimension_numbers<[1], [0], [0], [1], [0, 0, 1, 1], [], []>} : vector<72x128xbf16>, vector<128x128xbf16>, vector<72x128xf32> -> vector<72x128xf32>
    %7 = arith.addf %2, %6 : vector<72x128xf32>
    %8 = vector.extract_strided_slice %1 {offsets = [1, 0], sizes = [72, 128], strides = [1, 1]} : vector<90x128xbf16> to vector<72x128xbf16>
    %c1 = arith.constant 1 : index
    %c0_6 = arith.constant 0 : index
    %c0_7 = arith.constant 0 : index
    %9 = vector.load %arg2[%c1, %c0_6, %c0_7] : memref<4x128x128xbf16, #tpu.memory_space<vmem>>, vector<1x128x128xbf16>
    %10 = vector.shape_cast %9 : vector<1x128x128xbf16> to vector<128x128xbf16>
    %cst_8 = arith.constant dense<0.000000e+00> : vector<72x128xf32>
    %11 = tpu.matmul %8, %10, %cst_8 {dimension_numbers = #tpu.dot_dimension_numbers<[1], [0], [0], [1], [0, 0, 1, 1], [], []>} : vector<72x128xbf16>, vector<128x128xbf16>, vector<72x128xf32> -> vector<72x128xf32>
    %12 = arith.addf %7, %11 : vector<72x128xf32>
    %13 = vector.extract_strided_slice %1 {offsets = [9, 0], sizes = [72, 128], strides = [1, 1]} : vector<90x128xbf16> to vector<72x128xbf16>
    %c2 = arith.constant 2 : index
    %c0_9 = arith.constant 0 : index
    %c0_10 = arith.constant 0 : index
    %14 = vector.load %arg2[%c2, %c0_9, %c0_10] : memref<4x128x128xbf16, #tpu.memory_space<vmem>>, vector<1x128x128xbf16>
    %15 = vector.shape_cast %14 : vector<1x128x128xbf16> to vector<128x128xbf16>
    %cst_11 = arith.constant dense<0.000000e+00> : vector<72x128xf32>
    %16 = tpu.matmul %13, %15, %cst_11 {dimension_numbers = #tpu.dot_dimension_numbers<[1], [0], [0], [1], [0, 0, 1, 1], [], []>} : vector<72x128xbf16>, vector<128x128xbf16>, vector<72x128xf32> -> vector<72x128xf32>
    %17 = arith.addf %12, %16 : vector<72x128xf32>
    %18 = vector.extract_strided_slice %1 {offsets = [10, 0], sizes = [72, 128], strides = [1, 1]} : vector<90x128xbf16> to vector<72x128xbf16>
    %c3 = arith.constant 3 : index
    %c0_12 = arith.constant 0 : index
    %c0_13 = arith.constant 0 : index
    %19 = vector.load %arg2[%c3, %c0_12, %c0_13] : memref<4x128x128xbf16, #tpu.memory_space<vmem>>, vector<1x128x128xbf16>
    %20 = vector.shape_cast %19 : vector<1x128x128xbf16> to vector<128x128xbf16>
    %cst_14 = arith.constant dense<0.000000e+00> : vector<72x128xf32>
    %21 = tpu.matmul %18, %20, %cst_14 {dimension_numbers = #tpu.dot_dimension_numbers<[1], [0], [0], [1], [0, 0, 1, 1], [], []>} : vector<72x128xbf16>, vector<128x128xbf16>, vector<72x128xf32> -> vector<72x128xf32>
    %22 = arith.addf %17, %21 : vector<72x128xf32>
    %c0_15 = arith.constant 0 : index
    %c0_16 = arith.constant 0 : index
    %23 = vector.load %arg3[%c0_15, %c0_16] : memref<1x128xf32, #tpu.memory_space<vmem>>, vector<1x128xf32>
    %24 = vector.broadcast %23 : vector<1x128xf32> to vector<72x128xf32>
    %25 = arith.addf %22, %24 : vector<72x128xf32>
    %cst_17 = arith.constant 0.000000e+00 : f32
    %26 = vector.broadcast %cst_17 : f32 to vector<72x128xf32>
    %27 = arith.maximumf %25, %26 : vector<72x128xf32>
    %28 = arith.truncf %27 : vector<72x128xf32> to vector<72x128xbf16>
    %c0_18 = arith.constant 0 : index
    %c0_19 = arith.constant 0 : index
    %c0_20 = arith.constant 0 : index
    %29 = vector.load %arg4[%c0_18, %c0_19, %c0_20] : memref<1x72x128xbf16, #tpu.memory_space<vmem>>, vector<1x72x128xbf16>
    %30 = vector.shape_cast %29 : vector<1x72x128xbf16> to vector<72x128xbf16>
    %31 = vector.shape_cast %28 : vector<72x128xbf16> to vector<1x72x128xbf16>
    tpu.vector_store %arg4[%c0_18, %c0_19, %c0_20], %31 {strides = array<i32>} : memref<1x72x128xbf16, #tpu.memory_space<vmem>>, vector<1x72x128xbf16>,
    return
  }
  func.func @transform_0(%arg0: i32) -> (i32, i32, i32) {
    %c0_i32 = arith.constant 0 : i32
    %c0_i32_0 = arith.constant 0 : i32
    %c0_i32_1 = arith.constant 0 : i32
    return %arg0, %c0_i32, %c0_i32_0 : i32, i32, i32
  }
  func.func @transform_1(%arg0: i32) -> (i32, i32, i32) {
    %c0_i32 = arith.constant 0 : i32
    %c0_i32_0 = arith.constant 0 : i32
    %c0_i32_1 = arith.constant 0 : i32
    %c0_i32_2 = arith.constant 0 : i32
    return %c0_i32, %c0_i32_0, %c0_i32_1 : i32, i32, i32
  }
  func.func @transform_2(%arg0: i32) -> (i32, i32) {
    %c0_i32 = arith.constant 0 : i32
    %c0_i32_0 = arith.constant 0 : i32
    %c0_i32_1 = arith.constant 0 : i32
    return %c0_i32, %c0_i32_0 : i32, i32
  }
  func.func @transform_3(%arg0: i32) -> (i32, i32, i32) {
    %c0_i32 = arith.constant 0 : i32
    %c0_i32_0 = arith.constant 0 : i32
    %c0_i32_1 = arith.constant 0 : i32
    return %arg0, %c0_i32, %c0_i32_0 : i32, i32, i32
  }
}

module attributes {stable_mosaic.version = 11 : i64} {
  func.func @_fcn_head_upsample_kernel(%arg0: i32, %arg1: memref<1x110x128xbf16, #tpu.memory_space<vmem>>, %arg2: memref<9x128x128xbf16, #tpu.memory_space<vmem>>, %arg3: memref<1x128xf32, #tpu.memory_space<vmem>>, %arg4: memref<128x128xbf16, #tpu.memory_space<vmem>>, %arg5: memref<1x128xf32, #tpu.memory_space<vmem>>, %arg6: memref<256x80xbf16, #tpu.memory_space<vmem>>, %arg7: memref<1x256x128xf32, #tpu.memory_space<vmem>>) attributes {dimension_semantics = [#tpu.dimension_semantics<parallel>], iteration_bounds = array<i64: 2>, scalar_prefetch = 0 : i64, scratch_operands = 0 : i64, tpu.core_type = #tpu.core_type<tc>, window_params = [{transform_indices = @transform_0, window_bounds = array<i64: 1, 110, 128>}, {pipeline_mode = #tpu.pipeline_mode<synchronous>, transform_indices = @transform_1, window_bounds = array<i64: 9, 128, 128>}, {pipeline_mode = #tpu.pipeline_mode<synchronous>, transform_indices = @transform_2, window_bounds = array<i64: 1, 128>}, {pipeline_mode = #tpu.pipeline_mode<synchronous>, transform_indices = @transform_3, window_bounds = array<i64: 128, 128>}, {pipeline_mode = #tpu.pipeline_mode<synchronous>, transform_indices = @transform_4, window_bounds = array<i64: 1, 128>}, {pipeline_mode = #tpu.pipeline_mode<synchronous>, transform_indices = @transform_5, window_bounds = array<i64: 256, 80>}, {transform_indices = @transform_6, window_bounds = array<i64: 1, 256, 128>}]} {
    %c0 = arith.constant 0 : index
    %c0_0 = arith.constant 0 : index
    %c0_1 = arith.constant 0 : index
    %0 = vector.load %arg1[%c0, %c0_0, %c0_1] : memref<1x110x128xbf16, #tpu.memory_space<vmem>>, vector<1x110x128xbf16>
    %1 = vector.shape_cast %0 : vector<1x110x128xbf16> to vector<110x128xbf16>
    %cst = arith.constant 0.000000e+00 : f32
    %2 = vector.broadcast %cst : f32 to vector<80x128xf32>
    %3 = vector.extract_strided_slice %1 {offsets = [0, 0], sizes = [80, 128], strides = [1, 1]} : vector<110x128xbf16> to vector<80x128xbf16>
    %c0_2 = arith.constant 0 : index
    %c0_3 = arith.constant 0 : index
    %c0_4 = arith.constant 0 : index
    %4 = vector.load %arg2[%c0_2, %c0_3, %c0_4] : memref<9x128x128xbf16, #tpu.memory_space<vmem>>, vector<1x128x128xbf16>
    %5 = vector.shape_cast %4 : vector<1x128x128xbf16> to vector<128x128xbf16>
    %cst_5 = arith.constant dense<0.000000e+00> : vector<80x128xf32>
    %6 = tpu.matmul %3, %5, %cst_5 {dimension_numbers = #tpu.dot_dimension_numbers<[1], [0], [0], [1], [0, 0, 1, 1], [], []>} : vector<80x128xbf16>, vector<128x128xbf16>, vector<80x128xf32> -> vector<80x128xf32>
    %7 = arith.addf %2, %6 : vector<80x128xf32>
    %8 = vector.extract_strided_slice %1 {offsets = [1, 0], sizes = [80, 128], strides = [1, 1]} : vector<110x128xbf16> to vector<80x128xbf16>
    %c1 = arith.constant 1 : index
    %c0_6 = arith.constant 0 : index
    %c0_7 = arith.constant 0 : index
    %9 = vector.load %arg2[%c1, %c0_6, %c0_7] : memref<9x128x128xbf16, #tpu.memory_space<vmem>>, vector<1x128x128xbf16>
    %10 = vector.shape_cast %9 : vector<1x128x128xbf16> to vector<128x128xbf16>
    %cst_8 = arith.constant dense<0.000000e+00> : vector<80x128xf32>
    %11 = tpu.matmul %8, %10, %cst_8 {dimension_numbers = #tpu.dot_dimension_numbers<[1], [0], [0], [1], [0, 0, 1, 1], [], []>} : vector<80x128xbf16>, vector<128x128xbf16>, vector<80x128xf32> -> vector<80x128xf32>
    %12 = arith.addf %7, %11 : vector<80x128xf32>
    %13 = vector.extract_strided_slice %1 {offsets = [2, 0], sizes = [80, 128], strides = [1, 1]} : vector<110x128xbf16> to vector<80x128xbf16>
    %c2 = arith.constant 2 : index
    %c0_9 = arith.constant 0 : index
    %c0_10 = arith.constant 0 : index
    %14 = vector.load %arg2[%c2, %c0_9, %c0_10] : memref<9x128x128xbf16, #tpu.memory_space<vmem>>, vector<1x128x128xbf16>
    %15 = vector.shape_cast %14 : vector<1x128x128xbf16> to vector<128x128xbf16>
    %cst_11 = arith.constant dense<0.000000e+00> : vector<80x128xf32>
    %16 = tpu.matmul %13, %15, %cst_11 {dimension_numbers = #tpu.dot_dimension_numbers<[1], [0], [0], [1], [0, 0, 1, 1], [], []>} : vector<80x128xbf16>, vector<128x128xbf16>, vector<80x128xf32> -> vector<80x128xf32>
    %17 = arith.addf %12, %16 : vector<80x128xf32>
    %18 = vector.extract_strided_slice %1 {offsets = [10, 0], sizes = [80, 128], strides = [1, 1]} : vector<110x128xbf16> to vector<80x128xbf16>
    %c3 = arith.constant 3 : index
    %c0_12 = arith.constant 0 : index
    %c0_13 = arith.constant 0 : index
    %19 = vector.load %arg2[%c3, %c0_12, %c0_13] : memref<9x128x128xbf16, #tpu.memory_space<vmem>>, vector<1x128x128xbf16>
    %20 = vector.shape_cast %19 : vector<1x128x128xbf16> to vector<128x128xbf16>
    %cst_14 = arith.constant dense<0.000000e+00> : vector<80x128xf32>
    %21 = tpu.matmul %18, %20, %cst_14 {dimension_numbers = #tpu.dot_dimension_numbers<[1], [0], [0], [1], [0, 0, 1, 1], [], []>} : vector<80x128xbf16>, vector<128x128xbf16>, vector<80x128xf32> -> vector<80x128xf32>
    %22 = arith.addf %17, %21 : vector<80x128xf32>
    %23 = vector.extract_strided_slice %1 {offsets = [11, 0], sizes = [80, 128], strides = [1, 1]} : vector<110x128xbf16> to vector<80x128xbf16>
    %c4 = arith.constant 4 : index
    %c0_15 = arith.constant 0 : index
    %c0_16 = arith.constant 0 : index
    %24 = vector.load %arg2[%c4, %c0_15, %c0_16] : memref<9x128x128xbf16, #tpu.memory_space<vmem>>, vector<1x128x128xbf16>
    %25 = vector.shape_cast %24 : vector<1x128x128xbf16> to vector<128x128xbf16>
    %cst_17 = arith.constant dense<0.000000e+00> : vector<80x128xf32>
    %26 = tpu.matmul %23, %25, %cst_17 {dimension_numbers = #tpu.dot_dimension_numbers<[1], [0], [0], [1], [0, 0, 1, 1], [], []>} : vector<80x128xbf16>, vector<128x128xbf16>, vector<80x128xf32> -> vector<80x128xf32>
    %27 = arith.addf %22, %26 : vector<80x128xf32>
    %28 = vector.extract_strided_slice %1 {offsets = [12, 0], sizes = [80, 128], strides = [1, 1]} : vector<110x128xbf16> to vector<80x128xbf16>
    %c5 = arith.constant 5 : index
    %c0_18 = arith.constant 0 : index
    %c0_19 = arith.constant 0 : index
    %29 = vector.load %arg2[%c5, %c0_18, %c0_19] : memref<9x128x128xbf16, #tpu.memory_space<vmem>>, vector<1x128x128xbf16>
    %30 = vector.shape_cast %29 : vector<1x128x128xbf16> to vector<128x128xbf16>
    %cst_20 = arith.constant dense<0.000000e+00> : vector<80x128xf32>
    %31 = tpu.matmul %28, %30, %cst_20 {dimension_numbers = #tpu.dot_dimension_numbers<[1], [0], [0], [1], [0, 0, 1, 1], [], []>} : vector<80x128xbf16>, vector<128x128xbf16>, vector<80x128xf32> -> vector<80x128xf32>
    %32 = arith.addf %27, %31 : vector<80x128xf32>
    %33 = vector.extract_strided_slice %1 {offsets = [20, 0], sizes = [80, 128], strides = [1, 1]} : vector<110x128xbf16> to vector<80x128xbf16>
    %c6 = arith.constant 6 : index
    %c0_21 = arith.constant 0 : index
    %c0_22 = arith.constant 0 : index
    %34 = vector.load %arg2[%c6, %c0_21, %c0_22] : memref<9x128x128xbf16, #tpu.memory_space<vmem>>, vector<1x128x128xbf16>
    %35 = vector.shape_cast %34 : vector<1x128x128xbf16> to vector<128x128xbf16>
    %cst_23 = arith.constant dense<0.000000e+00> : vector<80x128xf32>
    %36 = tpu.matmul %33, %35, %cst_23 {dimension_numbers = #tpu.dot_dimension_numbers<[1], [0], [0], [1], [0, 0, 1, 1], [], []>} : vector<80x128xbf16>, vector<128x128xbf16>, vector<80x128xf32> -> vector<80x128xf32>
    %37 = arith.addf %32, %36 : vector<80x128xf32>
    %38 = vector.extract_strided_slice %1 {offsets = [21, 0], sizes = [80, 128], strides = [1, 1]} : vector<110x128xbf16> to vector<80x128xbf16>
    %c7 = arith.constant 7 : index
    %c0_24 = arith.constant 0 : index
    %c0_25 = arith.constant 0 : index
    %39 = vector.load %arg2[%c7, %c0_24, %c0_25] : memref<9x128x128xbf16, #tpu.memory_space<vmem>>, vector<1x128x128xbf16>
    %40 = vector.shape_cast %39 : vector<1x128x128xbf16> to vector<128x128xbf16>
    %cst_26 = arith.constant dense<0.000000e+00> : vector<80x128xf32>
    %41 = tpu.matmul %38, %40, %cst_26 {dimension_numbers = #tpu.dot_dimension_numbers<[1], [0], [0], [1], [0, 0, 1, 1], [], []>} : vector<80x128xbf16>, vector<128x128xbf16>, vector<80x128xf32> -> vector<80x128xf32>
    %42 = arith.addf %37, %41 : vector<80x128xf32>
    %43 = vector.extract_strided_slice %1 {offsets = [22, 0], sizes = [80, 128], strides = [1, 1]} : vector<110x128xbf16> to vector<80x128xbf16>
    %c8 = arith.constant 8 : index
    %c0_27 = arith.constant 0 : index
    %c0_28 = arith.constant 0 : index
    %44 = vector.load %arg2[%c8, %c0_27, %c0_28] : memref<9x128x128xbf16, #tpu.memory_space<vmem>>, vector<1x128x128xbf16>
    %45 = vector.shape_cast %44 : vector<1x128x128xbf16> to vector<128x128xbf16>
    %cst_29 = arith.constant dense<0.000000e+00> : vector<80x128xf32>
    %46 = tpu.matmul %43, %45, %cst_29 {dimension_numbers = #tpu.dot_dimension_numbers<[1], [0], [0], [1], [0, 0, 1, 1], [], []>} : vector<80x128xbf16>, vector<128x128xbf16>, vector<80x128xf32> -> vector<80x128xf32>
    %47 = arith.addf %42, %46 : vector<80x128xf32>
    %c0_30 = arith.constant 0 : index
    %c0_31 = arith.constant 0 : index
    %48 = vector.load %arg3[%c0_30, %c0_31] : memref<1x128xf32, #tpu.memory_space<vmem>>, vector<1x128xf32>
    %49 = vector.broadcast %48 : vector<1x128xf32> to vector<80x128xf32>
    %50 = arith.addf %47, %49 : vector<80x128xf32>
    %cst_32 = arith.constant 0.000000e+00 : f32
    %51 = vector.broadcast %cst_32 : f32 to vector<80x128xf32>
    %52 = arith.maximumf %50, %51 : vector<80x128xf32>
    %53 = arith.truncf %52 : vector<80x128xf32> to vector<80x128xbf16>
    %c0_33 = arith.constant 0 : index
    %c0_34 = arith.constant 0 : index
    %54 = vector.load %arg4[%c0_33, %c0_34] : memref<128x128xbf16, #tpu.memory_space<vmem>>, vector<128x128xbf16>
    %cst_35 = arith.constant dense<0.000000e+00> : vector<80x128xf32>
    %55 = tpu.matmul %53, %54, %cst_35 {dimension_numbers = #tpu.dot_dimension_numbers<[1], [0], [0], [1], [0, 0, 1, 1], [], []>} : vector<80x128xbf16>, vector<128x128xbf16>, vector<80x128xf32> -> vector<80x128xf32>
    %c0_36 = arith.constant 0 : index
    %c0_37 = arith.constant 0 : index
    %56 = vector.load %arg6[%c0_36, %c0_37] : memref<256x80xbf16, #tpu.memory_space<vmem>>, vector<256x80xbf16>
    %57 = arith.truncf %55 : vector<80x128xf32> to vector<80x128xbf16>
    %cst_38 = arith.constant dense<0.000000e+00> : vector<256x128xf32>
    %58 = tpu.matmul %56, %57, %cst_38 {dimension_numbers = #tpu.dot_dimension_numbers<[1], [0], [0], [1], [0, 0, 1, 1], [], []>} : vector<256x80xbf16>, vector<80x128xbf16>, vector<256x128xf32> -> vector<256x128xf32>
    %c0_39 = arith.constant 0 : index
    %c0_40 = arith.constant 0 : index
    %59 = vector.load %arg5[%c0_39, %c0_40] : memref<1x128xf32, #tpu.memory_space<vmem>>, vector<1x128xf32>
    %60 = vector.broadcast %59 : vector<1x128xf32> to vector<256x128xf32>
    %61 = arith.addf %58, %60 : vector<256x128xf32>
    %c0_41 = arith.constant 0 : index
    %c0_42 = arith.constant 0 : index
    %c0_43 = arith.constant 0 : index
    %62 = vector.load %arg7[%c0_41, %c0_42, %c0_43] : memref<1x256x128xf32, #tpu.memory_space<vmem>>, vector<1x256x128xf32>
    %63 = vector.shape_cast %62 : vector<1x256x128xf32> to vector<256x128xf32>
    %64 = vector.shape_cast %61 : vector<256x128xf32> to vector<1x256x128xf32>
    tpu.vector_store %arg7[%c0_41, %c0_42, %c0_43], %64 {strides = array<i32>} : memref<1x256x128xf32, #tpu.memory_space<vmem>>, vector<1x256x128xf32>,
    return
  }
  func.func @transform_0(%arg0: i32) -> (i32, i32, i32) {
    %c0_i32 = arith.constant 0 : i32
    %c0_i32_0 = arith.constant 0 : i32
    %c0_i32_1 = arith.constant 0 : i32
    return %arg0, %c0_i32, %c0_i32_0 : i32, i32, i32
  }
  func.func @transform_1(%arg0: i32) -> (i32, i32, i32) {
    %c0_i32 = arith.constant 0 : i32
    %c0_i32_0 = arith.constant 0 : i32
    %c0_i32_1 = arith.constant 0 : i32
    %c0_i32_2 = arith.constant 0 : i32
    return %c0_i32, %c0_i32_0, %c0_i32_1 : i32, i32, i32
  }
  func.func @transform_2(%arg0: i32) -> (i32, i32) {
    %c0_i32 = arith.constant 0 : i32
    %c0_i32_0 = arith.constant 0 : i32
    %c0_i32_1 = arith.constant 0 : i32
    return %c0_i32, %c0_i32_0 : i32, i32
  }
  func.func @transform_3(%arg0: i32) -> (i32, i32) {
    %c0_i32 = arith.constant 0 : i32
    %c0_i32_0 = arith.constant 0 : i32
    %c0_i32_1 = arith.constant 0 : i32
    return %c0_i32, %c0_i32_0 : i32, i32
  }
  func.func @transform_4(%arg0: i32) -> (i32, i32) {
    %c0_i32 = arith.constant 0 : i32
    %c0_i32_0 = arith.constant 0 : i32
    %c0_i32_1 = arith.constant 0 : i32
    return %c0_i32, %c0_i32_0 : i32, i32
  }
  func.func @transform_5(%arg0: i32) -> (i32, i32) {
    %c0_i32 = arith.constant 0 : i32
    %c0_i32_0 = arith.constant 0 : i32
    %c0_i32_1 = arith.constant 0 : i32
    return %c0_i32, %c0_i32_0 : i32, i32
  }
  func.func @transform_6(%arg0: i32) -> (i32, i32, i32) {
    %c0_i32 = arith.constant 0 : i32
    %c0_i32_0 = arith.constant 0 : i32
    %c0_i32_1 = arith.constant 0 : i32
    return %arg0, %c0_i32, %c0_i32_0 : i32, i32, i32
  }
}

module attributes {stable_mosaic.version = 11 : i64} {
  func.func @_conv3x3_s2_kernel(%arg0: i32, %arg1: memref<1x30x512xbf16, #tpu.memory_space<vmem>>, %arg2: memref<4x512x128xbf16, #tpu.memory_space<vmem>>, %arg3: memref<1x128xf32, #tpu.memory_space<vmem>>, %arg4: memref<1x20x128xbf16, #tpu.memory_space<vmem>>) attributes {dimension_semantics = [#tpu.dimension_semantics<parallel>], iteration_bounds = array<i64: 2>, scalar_prefetch = 0 : i64, scratch_operands = 0 : i64, tpu.core_type = #tpu.core_type<tc>, window_params = [{transform_indices = @transform_0, window_bounds = array<i64: 1, 30, 512>}, {pipeline_mode = #tpu.pipeline_mode<synchronous>, transform_indices = @transform_1, window_bounds = array<i64: 4, 512, 128>}, {pipeline_mode = #tpu.pipeline_mode<synchronous>, transform_indices = @transform_2, window_bounds = array<i64: 1, 128>}, {transform_indices = @transform_3, window_bounds = array<i64: 1, 20, 128>}]} {
    %c0 = arith.constant 0 : index
    %c0_0 = arith.constant 0 : index
    %c0_1 = arith.constant 0 : index
    %0 = vector.load %arg1[%c0, %c0_0, %c0_1] : memref<1x30x512xbf16, #tpu.memory_space<vmem>>, vector<1x30x512xbf16>
    %1 = vector.shape_cast %0 : vector<1x30x512xbf16> to vector<30x512xbf16>
    %cst = arith.constant 0.000000e+00 : f32
    %2 = vector.broadcast %cst : f32 to vector<20x128xf32>
    %3 = vector.extract_strided_slice %1 {offsets = [0, 0], sizes = [20, 512], strides = [1, 1]} : vector<30x512xbf16> to vector<20x512xbf16>
    %c0_2 = arith.constant 0 : index
    %c0_3 = arith.constant 0 : index
    %c0_4 = arith.constant 0 : index
    %4 = vector.load %arg2[%c0_2, %c0_3, %c0_4] : memref<4x512x128xbf16, #tpu.memory_space<vmem>>, vector<1x512x128xbf16>
    %5 = vector.shape_cast %4 : vector<1x512x128xbf16> to vector<512x128xbf16>
    %cst_5 = arith.constant dense<0.000000e+00> : vector<20x128xf32>
    %6 = tpu.matmul %3, %5, %cst_5 {dimension_numbers = #tpu.dot_dimension_numbers<[1], [0], [0], [1], [0, 0, 1, 1], [], []>} : vector<20x512xbf16>, vector<512x128xbf16>, vector<20x128xf32> -> vector<20x128xf32>
    %7 = arith.addf %2, %6 : vector<20x128xf32>
    %8 = vector.extract_strided_slice %1 {offsets = [1, 0], sizes = [20, 512], strides = [1, 1]} : vector<30x512xbf16> to vector<20x512xbf16>
    %c1 = arith.constant 1 : index
    %c0_6 = arith.constant 0 : index
    %c0_7 = arith.constant 0 : index
    %9 = vector.load %arg2[%c1, %c0_6, %c0_7] : memref<4x512x128xbf16, #tpu.memory_space<vmem>>, vector<1x512x128xbf16>
    %10 = vector.shape_cast %9 : vector<1x512x128xbf16> to vector<512x128xbf16>
    %cst_8 = arith.constant dense<0.000000e+00> : vector<20x128xf32>
    %11 = tpu.matmul %8, %10, %cst_8 {dimension_numbers = #tpu.dot_dimension_numbers<[1], [0], [0], [1], [0, 0, 1, 1], [], []>} : vector<20x512xbf16>, vector<512x128xbf16>, vector<20x128xf32> -> vector<20x128xf32>
    %12 = arith.addf %7, %11 : vector<20x128xf32>
    %13 = vector.extract_strided_slice %1 {offsets = [5, 0], sizes = [20, 512], strides = [1, 1]} : vector<30x512xbf16> to vector<20x512xbf16>
    %c2 = arith.constant 2 : index
    %c0_9 = arith.constant 0 : index
    %c0_10 = arith.constant 0 : index
    %14 = vector.load %arg2[%c2, %c0_9, %c0_10] : memref<4x512x128xbf16, #tpu.memory_space<vmem>>, vector<1x512x128xbf16>
    %15 = vector.shape_cast %14 : vector<1x512x128xbf16> to vector<512x128xbf16>
    %cst_11 = arith.constant dense<0.000000e+00> : vector<20x128xf32>
    %16 = tpu.matmul %13, %15, %cst_11 {dimension_numbers = #tpu.dot_dimension_numbers<[1], [0], [0], [1], [0, 0, 1, 1], [], []>} : vector<20x512xbf16>, vector<512x128xbf16>, vector<20x128xf32> -> vector<20x128xf32>
    %17 = arith.addf %12, %16 : vector<20x128xf32>
    %18 = vector.extract_strided_slice %1 {offsets = [6, 0], sizes = [20, 512], strides = [1, 1]} : vector<30x512xbf16> to vector<20x512xbf16>
    %c3 = arith.constant 3 : index
    %c0_12 = arith.constant 0 : index
    %c0_13 = arith.constant 0 : index
    %19 = vector.load %arg2[%c3, %c0_12, %c0_13] : memref<4x512x128xbf16, #tpu.memory_space<vmem>>, vector<1x512x128xbf16>
    %20 = vector.shape_cast %19 : vector<1x512x128xbf16> to vector<512x128xbf16>
    %cst_14 = arith.constant dense<0.000000e+00> : vector<20x128xf32>
    %21 = tpu.matmul %18, %20, %cst_14 {dimension_numbers = #tpu.dot_dimension_numbers<[1], [0], [0], [1], [0, 0, 1, 1], [], []>} : vector<20x512xbf16>, vector<512x128xbf16>, vector<20x128xf32> -> vector<20x128xf32>
    %22 = arith.addf %17, %21 : vector<20x128xf32>
    %c0_15 = arith.constant 0 : index
    %c0_16 = arith.constant 0 : index
    %23 = vector.load %arg3[%c0_15, %c0_16] : memref<1x128xf32, #tpu.memory_space<vmem>>, vector<1x128xf32>
    %24 = vector.broadcast %23 : vector<1x128xf32> to vector<20x128xf32>
    %25 = arith.addf %22, %24 : vector<20x128xf32>
    %cst_17 = arith.constant 0.000000e+00 : f32
    %26 = vector.broadcast %cst_17 : f32 to vector<20x128xf32>
    %27 = arith.maximumf %25, %26 : vector<20x128xf32>
    %28 = arith.truncf %27 : vector<20x128xf32> to vector<20x128xbf16>
    %c0_18 = arith.constant 0 : index
    %c0_19 = arith.constant 0 : index
    %c0_20 = arith.constant 0 : index
    %29 = vector.load %arg4[%c0_18, %c0_19, %c0_20] : memref<1x20x128xbf16, #tpu.memory_space<vmem>>, vector<1x20x128xbf16>
    %30 = vector.shape_cast %29 : vector<1x20x128xbf16> to vector<20x128xbf16>
    %31 = vector.shape_cast %28 : vector<20x128xbf16> to vector<1x20x128xbf16>
    tpu.vector_store %arg4[%c0_18, %c0_19, %c0_20], %31 {strides = array<i32>} : memref<1x20x128xbf16, #tpu.memory_space<vmem>>, vector<1x20x128xbf16>,
    return
  }
  func.func @transform_0(%arg0: i32) -> (i32, i32, i32) {
    %c0_i32 = arith.constant 0 : i32
    %c0_i32_0 = arith.constant 0 : i32
    %c0_i32_1 = arith.constant 0 : i32
    return %arg0, %c0_i32, %c0_i32_0 : i32, i32, i32
  }
  func.func @transform_1(%arg0: i32) -> (i32, i32, i32) {
    %c0_i32 = arith.constant 0 : i32
    %c0_i32_0 = arith.constant 0 : i32
    %c0_i32_1 = arith.constant 0 : i32
    %c0_i32_2 = arith.constant 0 : i32
    return %c0_i32, %c0_i32_0, %c0_i32_1 : i32, i32, i32
  }
  func.func @transform_2(%arg0: i32) -> (i32, i32) {
    %c0_i32 = arith.constant 0 : i32
    %c0_i32_0 = arith.constant 0 : i32
    %c0_i32_1 = arith.constant 0 : i32
    return %c0_i32, %c0_i32_0 : i32, i32
  }
  func.func @transform_3(%arg0: i32) -> (i32, i32, i32) {
    %c0_i32 = arith.constant 0 : i32
    %c0_i32_0 = arith.constant 0 : i32
    %c0_i32_1 = arith.constant 0 : i32
    return %arg0, %c0_i32, %c0_i32_0 : i32, i32, i32
  }
}

module attributes {stable_mosaic.version = 11 : i64} {
  func.func @_fcn_head_upsample_kernel(%arg0: i32, %arg1: memref<1x42x128xbf16, #tpu.memory_space<vmem>>, %arg2: memref<9x128x128xbf16, #tpu.memory_space<vmem>>, %arg3: memref<1x128xf32, #tpu.memory_space<vmem>>, %arg4: memref<128x128xbf16, #tpu.memory_space<vmem>>, %arg5: memref<1x128xf32, #tpu.memory_space<vmem>>, %arg6: memref<256x24xbf16, #tpu.memory_space<vmem>>, %arg7: memref<1x256x128xf32, #tpu.memory_space<vmem>>) attributes {dimension_semantics = [#tpu.dimension_semantics<parallel>], iteration_bounds = array<i64: 2>, scalar_prefetch = 0 : i64, scratch_operands = 0 : i64, tpu.core_type = #tpu.core_type<tc>, window_params = [{transform_indices = @transform_0, window_bounds = array<i64: 1, 42, 128>}, {pipeline_mode = #tpu.pipeline_mode<synchronous>, transform_indices = @transform_1, window_bounds = array<i64: 9, 128, 128>}, {pipeline_mode = #tpu.pipeline_mode<synchronous>, transform_indices = @transform_2, window_bounds = array<i64: 1, 128>}, {pipeline_mode = #tpu.pipeline_mode<synchronous>, transform_indices = @transform_3, window_bounds = array<i64: 128, 128>}, {pipeline_mode = #tpu.pipeline_mode<synchronous>, transform_indices = @transform_4, window_bounds = array<i64: 1, 128>}, {pipeline_mode = #tpu.pipeline_mode<synchronous>, transform_indices = @transform_5, window_bounds = array<i64: 256, 24>}, {transform_indices = @transform_6, window_bounds = array<i64: 1, 256, 128>}]} {
    %c0 = arith.constant 0 : index
    %c0_0 = arith.constant 0 : index
    %c0_1 = arith.constant 0 : index
    %0 = vector.load %arg1[%c0, %c0_0, %c0_1] : memref<1x42x128xbf16, #tpu.memory_space<vmem>>, vector<1x42x128xbf16>
    %1 = vector.shape_cast %0 : vector<1x42x128xbf16> to vector<42x128xbf16>
    %cst = arith.constant 0.000000e+00 : f32
    %2 = vector.broadcast %cst : f32 to vector<24x128xf32>
    %3 = vector.extract_strided_slice %1 {offsets = [0, 0], sizes = [24, 128], strides = [1, 1]} : vector<42x128xbf16> to vector<24x128xbf16>
    %c0_2 = arith.constant 0 : index
    %c0_3 = arith.constant 0 : index
    %c0_4 = arith.constant 0 : index
    %4 = vector.load %arg2[%c0_2, %c0_3, %c0_4] : memref<9x128x128xbf16, #tpu.memory_space<vmem>>, vector<1x128x128xbf16>
    %5 = vector.shape_cast %4 : vector<1x128x128xbf16> to vector<128x128xbf16>
    %cst_5 = arith.constant dense<0.000000e+00> : vector<24x128xf32>
    %6 = tpu.matmul %3, %5, %cst_5 {dimension_numbers = #tpu.dot_dimension_numbers<[1], [0], [0], [1], [0, 0, 1, 1], [], []>} : vector<24x128xbf16>, vector<128x128xbf16>, vector<24x128xf32> -> vector<24x128xf32>
    %7 = arith.addf %2, %6 : vector<24x128xf32>
    %8 = vector.extract_strided_slice %1 {offsets = [1, 0], sizes = [24, 128], strides = [1, 1]} : vector<42x128xbf16> to vector<24x128xbf16>
    %c1 = arith.constant 1 : index
    %c0_6 = arith.constant 0 : index
    %c0_7 = arith.constant 0 : index
    %9 = vector.load %arg2[%c1, %c0_6, %c0_7] : memref<9x128x128xbf16, #tpu.memory_space<vmem>>, vector<1x128x128xbf16>
    %10 = vector.shape_cast %9 : vector<1x128x128xbf16> to vector<128x128xbf16>
    %cst_8 = arith.constant dense<0.000000e+00> : vector<24x128xf32>
    %11 = tpu.matmul %8, %10, %cst_8 {dimension_numbers = #tpu.dot_dimension_numbers<[1], [0], [0], [1], [0, 0, 1, 1], [], []>} : vector<24x128xbf16>, vector<128x128xbf16>, vector<24x128xf32> -> vector<24x128xf32>
    %12 = arith.addf %7, %11 : vector<24x128xf32>
    %13 = vector.extract_strided_slice %1 {offsets = [2, 0], sizes = [24, 128], strides = [1, 1]} : vector<42x128xbf16> to vector<24x128xbf16>
    %c2 = arith.constant 2 : index
    %c0_9 = arith.constant 0 : index
    %c0_10 = arith.constant 0 : index
    %14 = vector.load %arg2[%c2, %c0_9, %c0_10] : memref<9x128x128xbf16, #tpu.memory_space<vmem>>, vector<1x128x128xbf16>
    %15 = vector.shape_cast %14 : vector<1x128x128xbf16> to vector<128x128xbf16>
    %cst_11 = arith.constant dense<0.000000e+00> : vector<24x128xf32>
    %16 = tpu.matmul %13, %15, %cst_11 {dimension_numbers = #tpu.dot_dimension_numbers<[1], [0], [0], [1], [0, 0, 1, 1], [], []>} : vector<24x128xbf16>, vector<128x128xbf16>, vector<24x128xf32> -> vector<24x128xf32>
    %17 = arith.addf %12, %16 : vector<24x128xf32>
    %18 = vector.extract_strided_slice %1 {offsets = [6, 0], sizes = [24, 128], strides = [1, 1]} : vector<42x128xbf16> to vector<24x128xbf16>
    %c3 = arith.constant 3 : index
    %c0_12 = arith.constant 0 : index
    %c0_13 = arith.constant 0 : index
    %19 = vector.load %arg2[%c3, %c0_12, %c0_13] : memref<9x128x128xbf16, #tpu.memory_space<vmem>>, vector<1x128x128xbf16>
    %20 = vector.shape_cast %19 : vector<1x128x128xbf16> to vector<128x128xbf16>
    %cst_14 = arith.constant dense<0.000000e+00> : vector<24x128xf32>
    %21 = tpu.matmul %18, %20, %cst_14 {dimension_numbers = #tpu.dot_dimension_numbers<[1], [0], [0], [1], [0, 0, 1, 1], [], []>} : vector<24x128xbf16>, vector<128x128xbf16>, vector<24x128xf32> -> vector<24x128xf32>
    %22 = arith.addf %17, %21 : vector<24x128xf32>
    %23 = vector.extract_strided_slice %1 {offsets = [7, 0], sizes = [24, 128], strides = [1, 1]} : vector<42x128xbf16> to vector<24x128xbf16>
    %c4 = arith.constant 4 : index
    %c0_15 = arith.constant 0 : index
    %c0_16 = arith.constant 0 : index
    %24 = vector.load %arg2[%c4, %c0_15, %c0_16] : memref<9x128x128xbf16, #tpu.memory_space<vmem>>, vector<1x128x128xbf16>
    %25 = vector.shape_cast %24 : vector<1x128x128xbf16> to vector<128x128xbf16>
    %cst_17 = arith.constant dense<0.000000e+00> : vector<24x128xf32>
    %26 = tpu.matmul %23, %25, %cst_17 {dimension_numbers = #tpu.dot_dimension_numbers<[1], [0], [0], [1], [0, 0, 1, 1], [], []>} : vector<24x128xbf16>, vector<128x128xbf16>, vector<24x128xf32> -> vector<24x128xf32>
    %27 = arith.addf %22, %26 : vector<24x128xf32>
    %28 = vector.extract_strided_slice %1 {offsets = [8, 0], sizes = [24, 128], strides = [1, 1]} : vector<42x128xbf16> to vector<24x128xbf16>
    %c5 = arith.constant 5 : index
    %c0_18 = arith.constant 0 : index
    %c0_19 = arith.constant 0 : index
    %29 = vector.load %arg2[%c5, %c0_18, %c0_19] : memref<9x128x128xbf16, #tpu.memory_space<vmem>>, vector<1x128x128xbf16>
    %30 = vector.shape_cast %29 : vector<1x128x128xbf16> to vector<128x128xbf16>
    %cst_20 = arith.constant dense<0.000000e+00> : vector<24x128xf32>
    %31 = tpu.matmul %28, %30, %cst_20 {dimension_numbers = #tpu.dot_dimension_numbers<[1], [0], [0], [1], [0, 0, 1, 1], [], []>} : vector<24x128xbf16>, vector<128x128xbf16>, vector<24x128xf32> -> vector<24x128xf32>
    %32 = arith.addf %27, %31 : vector<24x128xf32>
    %33 = vector.extract_strided_slice %1 {offsets = [12, 0], sizes = [24, 128], strides = [1, 1]} : vector<42x128xbf16> to vector<24x128xbf16>
    %c6 = arith.constant 6 : index
    %c0_21 = arith.constant 0 : index
    %c0_22 = arith.constant 0 : index
    %34 = vector.load %arg2[%c6, %c0_21, %c0_22] : memref<9x128x128xbf16, #tpu.memory_space<vmem>>, vector<1x128x128xbf16>
    %35 = vector.shape_cast %34 : vector<1x128x128xbf16> to vector<128x128xbf16>
    %cst_23 = arith.constant dense<0.000000e+00> : vector<24x128xf32>
    %36 = tpu.matmul %33, %35, %cst_23 {dimension_numbers = #tpu.dot_dimension_numbers<[1], [0], [0], [1], [0, 0, 1, 1], [], []>} : vector<24x128xbf16>, vector<128x128xbf16>, vector<24x128xf32> -> vector<24x128xf32>
    %37 = arith.addf %32, %36 : vector<24x128xf32>
    %38 = vector.extract_strided_slice %1 {offsets = [13, 0], sizes = [24, 128], strides = [1, 1]} : vector<42x128xbf16> to vector<24x128xbf16>
    %c7 = arith.constant 7 : index
    %c0_24 = arith.constant 0 : index
    %c0_25 = arith.constant 0 : index
    %39 = vector.load %arg2[%c7, %c0_24, %c0_25] : memref<9x128x128xbf16, #tpu.memory_space<vmem>>, vector<1x128x128xbf16>
    %40 = vector.shape_cast %39 : vector<1x128x128xbf16> to vector<128x128xbf16>
    %cst_26 = arith.constant dense<0.000000e+00> : vector<24x128xf32>
    %41 = tpu.matmul %38, %40, %cst_26 {dimension_numbers = #tpu.dot_dimension_numbers<[1], [0], [0], [1], [0, 0, 1, 1], [], []>} : vector<24x128xbf16>, vector<128x128xbf16>, vector<24x128xf32> -> vector<24x128xf32>
    %42 = arith.addf %37, %41 : vector<24x128xf32>
    %43 = vector.extract_strided_slice %1 {offsets = [14, 0], sizes = [24, 128], strides = [1, 1]} : vector<42x128xbf16> to vector<24x128xbf16>
    %c8 = arith.constant 8 : index
    %c0_27 = arith.constant 0 : index
    %c0_28 = arith.constant 0 : index
    %44 = vector.load %arg2[%c8, %c0_27, %c0_28] : memref<9x128x128xbf16, #tpu.memory_space<vmem>>, vector<1x128x128xbf16>
    %45 = vector.shape_cast %44 : vector<1x128x128xbf16> to vector<128x128xbf16>
    %cst_29 = arith.constant dense<0.000000e+00> : vector<24x128xf32>
    %46 = tpu.matmul %43, %45, %cst_29 {dimension_numbers = #tpu.dot_dimension_numbers<[1], [0], [0], [1], [0, 0, 1, 1], [], []>} : vector<24x128xbf16>, vector<128x128xbf16>, vector<24x128xf32> -> vector<24x128xf32>
    %47 = arith.addf %42, %46 : vector<24x128xf32>
    %c0_30 = arith.constant 0 : index
    %c0_31 = arith.constant 0 : index
    %48 = vector.load %arg3[%c0_30, %c0_31] : memref<1x128xf32, #tpu.memory_space<vmem>>, vector<1x128xf32>
    %49 = vector.broadcast %48 : vector<1x128xf32> to vector<24x128xf32>
    %50 = arith.addf %47, %49 : vector<24x128xf32>
    %cst_32 = arith.constant 0.000000e+00 : f32
    %51 = vector.broadcast %cst_32 : f32 to vector<24x128xf32>
    %52 = arith.maximumf %50, %51 : vector<24x128xf32>
    %53 = arith.truncf %52 : vector<24x128xf32> to vector<24x128xbf16>
    %c0_33 = arith.constant 0 : index
    %c0_34 = arith.constant 0 : index
    %54 = vector.load %arg4[%c0_33, %c0_34] : memref<128x128xbf16, #tpu.memory_space<vmem>>, vector<128x128xbf16>
    %cst_35 = arith.constant dense<0.000000e+00> : vector<24x128xf32>
    %55 = tpu.matmul %53, %54, %cst_35 {dimension_numbers = #tpu.dot_dimension_numbers<[1], [0], [0], [1], [0, 0, 1, 1], [], []>} : vector<24x128xbf16>, vector<128x128xbf16>, vector<24x128xf32> -> vector<24x128xf32>
    %c0_36 = arith.constant 0 : index
    %c0_37 = arith.constant 0 : index
    %56 = vector.load %arg6[%c0_36, %c0_37] : memref<256x24xbf16, #tpu.memory_space<vmem>>, vector<256x24xbf16>
    %57 = arith.truncf %55 : vector<24x128xf32> to vector<24x128xbf16>
    %cst_38 = arith.constant dense<0.000000e+00> : vector<256x128xf32>
    %58 = tpu.matmul %56, %57, %cst_38 {dimension_numbers = #tpu.dot_dimension_numbers<[1], [0], [0], [1], [0, 0, 1, 1], [], []>} : vector<256x24xbf16>, vector<24x128xbf16>, vector<256x128xf32> -> vector<256x128xf32>
    %c0_39 = arith.constant 0 : index
    %c0_40 = arith.constant 0 : index
    %59 = vector.load %arg5[%c0_39, %c0_40] : memref<1x128xf32, #tpu.memory_space<vmem>>, vector<1x128xf32>
    %60 = vector.broadcast %59 : vector<1x128xf32> to vector<256x128xf32>
    %61 = arith.addf %58, %60 : vector<256x128xf32>
    %c0_41 = arith.constant 0 : index
    %c0_42 = arith.constant 0 : index
    %c0_43 = arith.constant 0 : index
    %62 = vector.load %arg7[%c0_41, %c0_42, %c0_43] : memref<1x256x128xf32, #tpu.memory_space<vmem>>, vector<1x256x128xf32>
    %63 = vector.shape_cast %62 : vector<1x256x128xf32> to vector<256x128xf32>
    %64 = vector.shape_cast %61 : vector<256x128xf32> to vector<1x256x128xf32>
    tpu.vector_store %arg7[%c0_41, %c0_42, %c0_43], %64 {strides = array<i32>} : memref<1x256x128xf32, #tpu.memory_space<vmem>>, vector<1x256x128xf32>,
    return
  }
  func.func @transform_0(%arg0: i32) -> (i32, i32, i32) {
    %c0_i32 = arith.constant 0 : i32
    %c0_i32_0 = arith.constant 0 : i32
    %c0_i32_1 = arith.constant 0 : i32
    return %arg0, %c0_i32, %c0_i32_0 : i32, i32, i32
  }
  func.func @transform_1(%arg0: i32) -> (i32, i32, i32) {
    %c0_i32 = arith.constant 0 : i32
    %c0_i32_0 = arith.constant 0 : i32
    %c0_i32_1 = arith.constant 0 : i32
    %c0_i32_2 = arith.constant 0 : i32
    return %c0_i32, %c0_i32_0, %c0_i32_1 : i32, i32, i32
  }
  func.func @transform_2(%arg0: i32) -> (i32, i32) {
    %c0_i32 = arith.constant 0 : i32
    %c0_i32_0 = arith.constant 0 : i32
    %c0_i32_1 = arith.constant 0 : i32
    return %c0_i32, %c0_i32_0 : i32, i32
  }
  func.func @transform_3(%arg0: i32) -> (i32, i32) {
    %c0_i32 = arith.constant 0 : i32
    %c0_i32_0 = arith.constant 0 : i32
    %c0_i32_1 = arith.constant 0 : i32
    return %c0_i32, %c0_i32_0 : i32, i32
  }
  func.func @transform_4(%arg0: i32) -> (i32, i32) {
    %c0_i32 = arith.constant 0 : i32
    %c0_i32_0 = arith.constant 0 : i32
    %c0_i32_1 = arith.constant 0 : i32
    return %c0_i32, %c0_i32_0 : i32, i32
  }
  func.func @transform_5(%arg0: i32) -> (i32, i32) {
    %c0_i32 = arith.constant 0 : i32
    %c0_i32_0 = arith.constant 0 : i32
    %c0_i32_1 = arith.constant 0 : i32
    return %c0_i32, %c0_i32_0 : i32, i32
  }
  func.func @transform_6(%arg0: i32) -> (i32, i32, i32) {
    %c0_i32 = arith.constant 0 : i32
    %c0_i32_0 = arith.constant 0 : i32
    %c0_i32_1 = arith.constant 0 : i32
    return %arg0, %c0_i32, %c0_i32_0 : i32, i32, i32
  }
}

</mosaic_0001>

<bundles_post_ra>
// kernel: fcn_model_forward.4
= control target key start
LH: loop header
LB: loop body
LE: loop exit
PB: predicated region body
PF: predicated region fallthrough
CT: control target
= control target key end

     0   :  { %s1439_s12 = smov 0   ;;  %s1764_s0 = inlined_call_operand.vmem [shape: bf16[2,90,128], index: 0, kind: input, shape index: {}]   ;;  %s1765_s1 = inlined_call_operand.vmem [shape: bf16[4,128,128], index: 1, kind: input, shape index: {}]   ;;  %s1766_s2 = inlined_call_operand.vmem [shape: f32[1,128], index: 2, kind: input, shape index: {}]   ;;  %s1767_s3 = inlined_call_operand.vmem [shape: bf16[2,72,128], index: 3, kind: output, shape index: {}]  }
   0x1 LB: > { %s1016_s13 = sadd.s32 4294967295, %s1415_s12   ;;  %p1020_p0 = scmp.ge.s32.totalorder %s1415_s12, 1  ;;  %s1415_s12 = sphi %s1439_s12, %s13_s12  }
   0x2   : > { %p137_p1 = scmp.lt.s32.totalorder %s1415_s12, 3 }
   0x4   : > { %p138_p2 = pnand %p1020_p0, %p137_p1 }
   0x5   : > { %p161_p3 = scmp.lt.s32.totalorder (!%p138_p2), %s1016_s13, 1 }
   0x6   : > { %141 = sbr.rel (%p138_p2) target bundleno = 320 (0x140), region = 32 }
   0xb   : > { %v1366_v0 = vld [vmem:[%s1765_s1 + $0x78] sm:$0xff]   ;;  %v1417_v1 = vmov 0.0   ;;  %v1368_v3 = vld [vmem:[%s1765_s1 + $0x70] sm:$0xff]   ;;  %vm1418_vm0 = vmmov 0   ;;  %s1769_s13 = smov (!%p161_p3, %s1016_s13), 1  ;;  %v1370_v5 = vld [vmem:[%s1765_s1 + $0x68] sm:$0xff]  }
   0xc   : > { %1210 = vmatprep.subr.bf16.mxu0 %v1417_v1  ;;  %1246 = vmatprep.subr.bf16.mxu1 %v1417_v1  ;;  %v1367_v2 = vld [vmem:[%s1765_s1 + $0x38] sm:$0xff]   ;;  %v1369_v4 = vld [vmem:[%s1765_s1 + $0x30] sm:$0xff]   ;;  %v1371_v6 = vld [vmem:[%s1765_s1 + $0x28] sm:$0xff]   ;;  %s1354_s26 = smul.u32 48, %s1769_s13  ;;  %vm241_vm1 = vsmask.f32 7424 }
   0xd   : > { %1211 = vmatpush3.bf16.msra.mxu0 %v1366_v0  ;;  %1226 = vmatprep.mubr.msk.bf16.mxu0 %vm1418_vm0, %v1417_v1  ;;  %v1372_v7 = vld [vmem:[%s1765_s1 + $0x60] sm:$0xff]   ;;  %v1374_v9 = vld [vmem:[%s1765_s1 + $0x58] sm:$0xff]   ;;  %v1376_v16 = vld [vmem:[%s1765_s1 + $0x50] sm:$0xff]   ;;  %vm746_vm2 = vcmask 1046528   ;;  %s1355_s8 = smul.u32 36, %s1769_s13 }
   0xe   : > { %1247 = vmatpush3.bf16.msra.mxu1 %v1367_v2  ;;  %1212 = vmatprep.subr.bf16.mxu0 %v1417_v1  ;;  %v1373_v8 = vld [vmem:[%s1765_s1 + $0x20] sm:$0xff]   ;;  %s1489_s6 = scalar_lea.vmem %s1764_s0, %s1354_s26  ;;  %v1375_v10 = vld [vmem:[%s1765_s1 + $0x18] sm:$0xff]   ;;  %v1377_v18 = vld [vmem:[%s1765_s1 + $0x10] sm:$0xff]  }
   0xf   : > { %1248 = vmatprep.subr.bf16.mxu1 %v1417_v1  ;;  %1262 = vmatprep.mubr.msk.bf16.mxu1 %vm1418_vm0, %v1417_v1  ;;  %v172_v11 = vld [vmem:[%s1489_s6] sm:$0xf]  ;;  %v1501_v12 = vld [vmem:[%s1489_s6 + $0x4] sm:$0xf]  ;;  %v1504_v13 = vld [vmem:[%s1489_s6 + $0x8] sm:$0xf]  ;;  %s1739_s10 = scalar_lea.vmem %s1767_s3, %s1355_s8 }
  0x10   : > { %v1507_v14 = vld [vmem:[%s1489_s6 + $0xc] sm:$0xf]  ;;  %v1039_v15 = vcombine.low %v172_v11, %v1501_v12  ;;  %v1529_v23 = vld [vmem:[%s1489_s6 + $0x10] sm:$0xf]  ;;  %v1532_v24 = vld [vmem:[%s1489_s6 + $0x14] sm:$0xf] }
  0x11   : > { %1213 = vmatpush3.bf16.msra.mxu0 %v1368_v3  ;;  %v1515_v17 = vcombine.low %v1504_v13, %v1507_v14  ;;  %v1378_v20 = vld [vmem:[%s1765_s1 + $0x48] sm:$0xff]   ;;  %v1539_v27 = vcombine.low %v1529_v23, %v1532_v24  ;;  %v1380_v28 = vld [vmem:[%s1765_s1 + $0x40] sm:$0xff]   ;;  %v1385_v33 = vld [vmem:[%s1765_s1 + $0xb8] sm:$0xff]  }
  0x12   : > { %1249 = vmatpush3.bf16.msra.mxu1 %v1369_v4  ;;  %1214 = vmatprep.subr.bf16.mxu0 %v1417_v1  ;;  %v245_v19 = vshll.u32 %v1039_v15, 16  ;;  %v1379_v21 = vld [vmem:[%s1765_s1 + $0x8] sm:$0xff]   ;;  %v243_v22 = vshrl.u32 %v1039_v15, 16  ;;  %v1381_v29 = vld [vmem:[%s1765_s1] sm:$0xff]   ;;  %v1386_v34 = vld [vmem:[%s1765_s1 + $0xf8] sm:$0xff]  }
  0x13   : > { %1250 = vmatprep.subr.bf16.mxu1 %v1417_v1  ;;  %v250_v26 = vshll.u32 %v1515_v17, 16  ;;  %v258_v32 = vshll.u32 %v1539_v27, 16  ;;  %v254_v35 = vshrl.u32 %v1515_v17, 16  ;;  %v1559_v37 = vld [vmem:[%s1489_s6 + $0x18] sm:$0xf]  ;;  %v1387_v39 = vld [vmem:[%s1765_s1 + $0xb0] sm:$0xff]  }
  0x14   : > { %v247_v25 = vrot.slane %v245_v19, 1  ;;  %v179_v38 = vld [vmem:[%s1489_s6 + $0x1c] sm:$0xf]  ;;  %v1568_v41 = vld [vmem:[%s1489_s6 + $0x20] sm:$0xf]  ;;  %v1390_v45 = vld [vmem:[%s1765_s1 + $0xf0] sm:$0xff]  }
  0x15   : > { %1215 = vmatpush3.bf16.msra.mxu0 %v1370_v5  ;;  %v252_v31 = vrot.slane %v250_v26, 1  ;;  %v260_v40 = vrot.slane %v258_v32, 1  ;;  %v1571_v43 = vcombine.low %v1559_v37, %v179_v38  ;;  %v182_v44 = vld [vmem:[%s1489_s6 + $0x28] sm:$0xf]  ;;  %v1579_v46 = vcombine.low %v179_v38, %v1568_v41  ;;  %v181_v47 = vld [vmem:[%s1489_s6 + $0x24] sm:$0xf] }
  0x16   : > { %1251 = vmatpush3.bf16.msra.mxu1 %v1371_v6  ;;  %1216 = vmatprep.subr.bf16.mxu0 %v1417_v1  ;;  %v248_v30 = vor.u32 %v247_v25, %v243_v22  ;;  %v1587_v48 = vcombine.low %v181_v47, %v182_v44  ;;  %v1391_v50 = vld [vmem:[%s1765_s1 + $0xa8] sm:$0xff]   ;;  %v262_v51 = vshrl.u32 %v1539_v27, 16  ;;  %v1394_v60 = vld [vmem:[%s1765_s1 + $0xa0] sm:$0xff]   ;;  %v1043_v61 = vcombine.low %v1568_v41, %v181_v47  ;;  %v1396_v4 = vld [vmem:[%s1765_s1 + $0x98] sm:$0xff]  }
  0x17   : > { %1252 = vmatprep.subr.bf16.mxu1 %v1417_v1  ;;  %v256_v42 = vor.u32 %v254_v35, %v252_v31  ;;  %v266_v52 = vshll.u32 %v1571_v43, 16  ;;  %v1392_v53 = vld [vmem:[%s1765_s1 + $0xe8] sm:$0xff]   ;;  %v580_v54 = vshll.u32 %v1579_v46, 16  ;;  %v584_v55 = vshrl.u32 %v1579_v46, 16  ;;  %v1395_v62 = vld [vmem:[%s1765_s1 + $0xe0] sm:$0xff]   ;;  %v1401_v11 = vld [vmem:[%s1765_s1 + $0xd0] sm:$0xff]  }
  0x18   : > { %v253_v36 = vsel %vm241_vm1, %v248_v30, %v252_v31  ;;  %v588_v57 = vshll.u32 %v1587_v48, 16  ;;  %v264_v58 = vor.u32 %v262_v51, %v260_v40  ;;  %v270_v5 = vshrl.u32 %v1571_v43, 16 }
  0x19   : > { %1217 = vmatpush3.bf16.msra.mxu0 %v1372_v7  ;;  %v261_v49 = vsel %vm241_vm1, %v256_v42, %v260_v40  ;;  %v1602_v56 = vrot.slane %v580_v54, 1  ;;  %v268_v59 = vrot.slane %v266_v52, 1  ;;  %v274_v6 = vshll.u32 %v1043_v61, 16  ;;  %v1397_v7 = vld [vmem:[%s1765_s1 + $0xd8] sm:$0xff]  }
  0x1a   : > { %1253 = vmatpush3.bf16.msra.mxu1 %v1373_v8  ;;  %1218 = vmatprep.subr.bf16.mxu0 %v1417_v1  ;;  %v1616_v0 = vrot.slane %v588_v57, 1  ;;  %v278_v19 = vshrl.u32 %v1043_v61, 16  ;;  %v1052_v22 = vcombine.low %v1568_v41, %v1568_v41  ;;  %v752_v42 = vrot.slane %v1579_v46, 1 }
  0x1b   : > { %1254 = vmatprep.subr.bf16.mxu1 %v1417_v1  ;;  %v586_v63 = vor.u32 %v584_v55, %v1602_v56  ;;  %v269_v3 = vsel %vm241_vm1, %v264_v58, %v268_v59  ;;  %v272_v8 = vor.u32 %v270_v5, %v268_v59  ;;  %v592_v46 = vshrl.u32 %v1587_v48, 16 }
  0x1d   : > { %1219 = vmatpush3.bf16.msra.mxu0 %v1374_v9  ;;  %v1624_v2 = vsel %vm241_vm1, %v586_v63, %v1616_v0  ;;  %v276_v9 = vrot.slane %v274_v6, 1 }
  0x1e   : > { %1255 = vmatpush3.bf16.msra.mxu1 %v1375_v10  ;;  %1220 = vmatprep.subr.bf16.mxu0 %v1417_v1  ;;  %v1400_v10 = vld [vmem:[%s1765_s1 + $0x90] sm:$0xff]  }
  0x1f   : > { %1256 = vmatprep.subr.bf16.mxu1 %v1417_v1 }
  0x21   : > { %1221 = vmatpush3.bf16.msra.mxu0 %v1376_v16  ;;  %v277_v16 = vsel %vm241_vm1, %v272_v8, %v276_v9 }
  0x22   : > { %1257 = vmatpush3.bf16.msra.mxu1 %v1377_v18  ;;  %1222 = vmatprep.subr.bf16.mxu0 %v1417_v1  ;;  %v1404_v18 = vld [vmem:[%s1765_s1 + $0xc8] sm:$0xff]  }
  0x23   : > { %1258 = vmatprep.subr.bf16.mxu1 %v1417_v1 }
  0x25   : > { %1223 = vmatpush3.bf16.msra.mxu0 %v1378_v20  ;;  %v1405_v20 = vld [vmem:[%s1765_s1 + $0x80] sm:$0xff]  }
  0x26   : > { %1259 = vmatpush3.bf16.msra.mxu1 %v1379_v21  ;;  %1224 = vmatprep.subr.bf16.mxu0 %v1417_v1  ;;  %v280_v21 = vor.u32 %v278_v19, %v276_v9 }
  0x27   : > { %1260 = vmatprep.subr.bf16.mxu1 %v1417_v1 }
  0x29   : > { %1225 = vmatpush3.bf16.msra.mxu0 %v1380_v28 }
  0x2a   : > { %1261 = vmatpush3.bf16.msra.mxu1 %v1381_v29  ;;  %1282 = vmatprep.subr.bf16.mxu0 %v1417_v1  ;;  %v1079_v29 = vcombine.low %v1532_v24, %v1559_v37 }
  0x2b   : > { %1318 = vmatprep.subr.bf16.mxu1 %v1417_v1 }
  0x2c   : > { %1227 = vmatmul.mubr.bf16.vlgmr.msra.gmra.mxu0 %v253_v36  ;;  %v750_v24 = vrot.slane %v1079_v29, 1 }
  0x2d   : > { %1263 = vmatmul.mubr.bf16.vlgmr.msra.gmra.mxu1 %v1039_v15  ;;  %1283 = vmatpush3.bf16.msra.mxu0 %v1385_v33  ;;  %v1077_v15 = vcombine.low %v1501_v12, %v1504_v13  ;;  %v1078_v12 = vcombine.low %v1507_v14, %v1529_v23  ;;  %v1406_v14 = vld [vmem:[%s1765_s1 + $0xc0] sm:$0xff]  }
  0x2e   : > { %1319 = vmatpush3.bf16.msra.mxu1 %v1386_v34  ;;  %1284 = vmatprep.subr.bf16.mxu0 %v1417_v1  ;;  %v572_v34 = vshll.u32 %v1079_v29, 16  ;;  %v753_v44 = vsel %vm746_vm2, %v750_v24, %v752_v42 }
  0x2f   : > { %1230 = vmatprep.mubr.msk.bf16.mxu0 %vm1418_vm0, %v1417_v1  ;;  %1266 = vmatprep.mubr.msk.bf16.mxu1 %vm1418_vm0, %v1417_v1  ;;  %v559_v13 = vshll.u32 %v1077_v15, 16  ;;  %v557_v23 = vshrl.u32 %v1077_v15, 16  ;;  %v564_v26 = vshll.u32 %v1078_v12, 16  ;;  %v747_v30 = vrot.slane %v1077_v15, 1 }
  0x30   : > { %1320 = vmatprep.subr.bf16.mxu1 %v1417_v1  ;;  %v748_v31 = vrot.slane %v1078_v12, 1  ;;  %v568_v33 = vshrl.u32 %v1078_v12, 16  ;;  %v574_v38 = vrot.slane %v572_v34, 1  ;;  %v1731_v34 = vld [vmem:[%s1766_s2] ss:$0 sm:$0xff] }
  0x31   : > { %1285 = vmatpush3.bf16.msra.mxu0 %v1387_v39  ;;  %v561_v25 = vrot.slane %v559_v13, 1  ;;  %v566_v28 = vrot.slane %v564_v26, 1  ;;  %v576_v39 = vshrl.u32 %v1079_v29, 16 }
  0x32   : > { %1321 = vmatpush3.bf16.msra.mxu1 %v1390_v45  ;;  %1286 = vmatprep.subr.bf16.mxu0 %v1417_v1  ;;  %v749_v35 = vsel %vm746_vm2, %v747_v30, %v748_v31  ;;  %v751_v40 = vsel %vm746_vm2, %v748_v31, %v750_v24  ;;  %v754_v45 = vrot.slane %v1587_v48, 1 }
  0x33   : > { %1322 = vmatprep.subr.bf16.mxu1 %v1417_v1  ;;  %v570_v36 = vor.u32 %v568_v33, %v566_v28  ;;  %v578_v41 = vor.u32 %v576_v39, %v574_v38 }
  0x34   : > { %1231 = vmatmul.mubr.bf16.gmra.mxu0 %v261_v49  ;;  %v755_v47 = vsel %vm746_vm2, %v752_v42, %v754_v45  ;;  %v594_v49 = vor.u32 %v592_v46, %v1616_v0 }
  0x35   : > { %1267 = vmatmul.mubr.bf16.gmra.mxu1 %v1515_v17  ;;  %1287 = vmatpush3.bf16.msra.mxu0 %v1391_v50  ;;  %v1402_v17 = vld [vmem:[%s1765_s1 + $0x88] sm:$0xff]   ;;  %v575_v37 = vsel %vm241_vm1, %v570_v36, %v574_v38 }
  0x36   : > { %1323 = vmatpush3.bf16.msra.mxu1 %v1392_v53  ;;  %1234 = vmatprep.mubr.msk.bf16.mxu0 %vm1418_vm0, %v1417_v1 }
  0x37   : > { %1270 = vmatprep.mubr.msk.bf16.mxu1 %vm1418_vm0, %v1417_v1  ;;  %1288 = vmatprep.subr.bf16.mxu0 %v1417_v1 }
  0x38   : > { %1324 = vmatprep.subr.bf16.mxu1 %v1417_v1 }
  0x39   : > { %1289 = vmatpush3.bf16.msra.mxu0 %v1394_v60 }
  0x3a   : > { %1325 = vmatpush3.bf16.msra.mxu1 %v1395_v62  ;;  %1290 = vmatprep.subr.bf16.mxu0 %v1417_v1 }
  0x3b   : > { %1326 = vmatprep.subr.bf16.mxu1 %v1417_v1 }
  0x3c   : > { %1235 = vmatmul.mubr.bf16.gmra.mxu0 %v269_v3 }
  0x3d   : > { %1271 = vmatmul.mubr.bf16.gmra.mxu1 %v1539_v27  ;;  %1291 = vmatpush3.bf16.msra.mxu0 %v1396_v4  ;;  %v562_v27 = vor.u32 %v561_v25, %v557_v23 }
  0x3e   : > { %1238 = vmatprep.mubr.msk.bf16.mxu0 %vm1418_vm0, %v1417_v1  ;;  %1274 = vmatprep.mubr.msk.bf16.mxu1 %vm1418_vm0, %v1417_v1 }
  0x3f   : > { %1327 = vmatpush3.bf16.msra.mxu1 %v1397_v7  ;;  %1292 = vmatprep.subr.bf16.mxu0 %v1417_v1  ;;  %v567_v32 = vsel %vm241_vm1, %v562_v27, %v566_v28 }
  0x40   : > { %1328 = vmatprep.subr.bf16.mxu1 %v1417_v1 }
  0x41   : > { %1293 = vmatpush3.bf16.msra.mxu0 %v1400_v10 }
  0x42   : > { %1294 = vmatprep.subr.bf16.mxu0 %v1417_v1 }
  0x43   : > { %1329 = vmatpush3.bf16.msra.mxu1 %v1401_v11 }
  0x44   : > { %1239 = vmatmul.mubr.bf16.gmra.mxu0 %v277_v16  ;;  %1330 = vmatprep.subr.bf16.mxu1 %v1417_v1 }
  0x45   : > { %1275 = vmatmul.mubr.bf16.gmra.mxu1 %v1571_v43  ;;  %1242 = vmatprep.mubr.msk.bf16.mxu0 %vm1418_vm0, %v1417_v1  ;;  %v583_v43 = vsel %vm241_vm1, %v578_v41, %v1602_v56 }
  0x46   : > { %1278 = vmatprep.mubr.msk.bf16.mxu1 %vm1418_vm0, %v1417_v1  ;;  %1295 = vmatpush3.bf16.msra.mxu0 %v1402_v17 }
  0x47   : > { %1331 = vmatpush3.bf16.msra.mxu1 %v1404_v18  ;;  %1296 = vmatprep.subr.bf16.mxu0 %v1417_v1 }
  0x48   : > { %1332 = vmatprep.subr.bf16.mxu1 %v1417_v1 }
  0x4a   : > { %1297 = vmatpush3.bf16.msra.mxu0 %v1405_v20 }
  0x4b   : > { %1333 = vmatpush3.bf16.msra.mxu1 %v1406_v14 }
  0x4c   : > { %1243 = vmatmul.mubr.bf16.gmra.mxu0 %v280_v21 }
  0x4d   : > { %1279 = vmatmul.mubr.bf16.gmra.mxu1 %v1052_v22  ;;  %1298 = vmatprep.mubr.msk.bf16.mxu0 %vm1418_vm0, %v1417_v1 }
  0x4e   : > { %1334 = vmatprep.mubr.msk.bf16.mxu1 %vm1418_vm0, %v1417_v1 }
  0x54   : > { %1299 = vmatmul.mubr.bf16.vlgmr.msra.gmra.mxu0 %v567_v32 }
  0x55   : > { %1335 = vmatmul.mubr.bf16.vlgmr.msra.gmra.mxu1 %v749_v35  ;;  %1302 = vmatprep.mubr.msk.bf16.mxu0 %vm1418_vm0, %v1417_v1 }
  0x56   : > { %1338 = vmatprep.mubr.msk.bf16.mxu1 %vm1418_vm0, %v1417_v1 }
  0x5c   : > { %1303 = vmatmul.mubr.bf16.gmra.mxu0 %v575_v37 }
  0x5d   : > { %1339 = vmatmul.mubr.bf16.gmra.mxu1 %v751_v40  ;;  %1306 = vmatprep.mubr.msk.bf16.mxu0 %vm1418_vm0, %v1417_v1 }
  0x5e   : > { %1342 = vmatprep.mubr.msk.bf16.mxu1 %vm1418_vm0, %v1417_v1 }
  0x64   : > { %1307 = vmatmul.mubr.bf16.gmra.mxu0 %v583_v43 }
  0x65   : > { %1343 = vmatmul.mubr.bf16.gmra.mxu1 %v753_v44  ;;  %1310 = vmatprep.mubr.msk.bf16.mxu0 %vm1418_vm0, %v1417_v1 }
  0x66   : > { %1346 = vmatprep.mubr.msk.bf16.mxu1 %vm1418_vm0, %v1417_v1 }
  0x6c   : > { %1311 = vmatmul.mubr.bf16.gmra.mxu0 %v1624_v2 }
  0x6d   : > { %1347 = vmatmul.mubr.bf16.gmra.mxu1 %v755_v47  ;;  %1314 = vmatprep.mubr.msk.bf16.mxu0 %vm1418_vm0, %v1417_v1 }
  0x6e   : > { %1350 = vmatprep.mubr.msk.bf16.mxu1 %vm1418_vm0, %v1417_v1 }
  0x74   : > { %1315 = vmatmul.mubr.bf16.gmra.mxu0 %v594_v49 }
  0x75   : > { %1351 = vmatmul.mubr.bf16.gmra.mxu1 %v754_v45 }
  0xec   : > { %v368_v50 = vpop.f32.mrf.mxu0 }
  0xed   : > { %v494_v51 = vpop.f32.mrf.mxu1 }
  0xee   : > { %v1228_v52 = vpop.f32.mrf.mxu0  ;;  %v495_v25 = vadd.f32 %v494_v51, %v368_v50 }
  0xef   : > { %v1264_v53 = vpop.f32.mrf.mxu1 }
  0xf0   : > { %v371_v54 = vpop.f32.mrf.mxu0 }
  0xf1   : > { %v497_v55 = vpop.f32.mrf.mxu1 }
  0xf2   : > { %v1229_v56 = vpop.f32.mrf.mxu0  ;;  %v498_v31 = vadd.f32 %v497_v55, %v371_v54 }
  0xf3   : > { %v1265_v57 = vpop.f32.mrf.mxu1 }
  0xf4   : > { %v376_v48 = vpop.f32.mrf.mxu0 }
  0xf5   : > { %v502_v58 = vpop.f32.mrf.mxu1 }
  0xf6   : > { %v1232_v59 = vpop.f32.mrf.mxu0  ;;  %v503_v37 = vadd.f32 %v502_v58, %v376_v48 }
  0xf7   : > { %v1268_v60 = vpop.f32.mrf.mxu1 }
  0xf8   : > { %v379_v61 = vpop.f32.mrf.mxu0 }
  0xf9   : > { %v505_v62 = vpop.f32.mrf.mxu1 }
  0xfa   : > { %v1233_v63 = vpop.f32.mrf.mxu0  ;;  %v506_v46 = vadd.f32 %v505_v62, %v379_v61 }
  0xfb   : > { %v1269_v1 = vpop.f32.mrf.mxu1 }
  0xfc   : > { %v384_v2 = vpop.f32.mrf.mxu0 }
  0xfd   : > { %v510_v0 = vpop.f32.mrf.mxu1 }
  0xfe   : > { %v1236_v3 = vpop.f32.mrf.mxu0  ;;  %v511_v48 = vadd.f32 %v510_v0, %v384_v2 }
  0xff   : > { %v1272_v4 = vpop.f32.mrf.mxu1 }
 0x100   : > { %v1712_v5 = vpop.f32.mrf.mxu0 }
 0x101   : > { %v1714_v6 = vpop.f32.mrf.mxu1 }
 0x102   : > { %v1237_v7 = vpop.f32.mrf.mxu0  ;;  %v514_v4 = vadd.f32 %v1714_v6, %v1712_v5 }
 0x103   : > { %v1273_v8 = vpop.f32.mrf.mxu1 }
 0x104   : > { %v1716_v9 = vpop.f32.mrf.mxu0 }
 0x105   : > { %v1718_v10 = vpop.f32.mrf.mxu1 }
 0x106   : > { %v1240_v11 = vpop.f32.mrf.mxu0 }
 0x107   : > { %v1276_v15 = vpop.f32.mrf.mxu1 }
 0x108   : > { %v1720_v16 = vpop.f32.mrf.mxu0 }
 0x109   : > { %v1722_v17 = vpop.f32.mrf.mxu1 }
 0x10a   : > { %v1241_v18 = vpop.f32.mrf.mxu0 }
 0x10b   : > { %v1277_v19 = vpop.f32.mrf.mxu1 }
 0x10c   : > { %v1724_v12 = vpop.f32.mrf.mxu0 }
 0x10d   : > { %v1726_v13 = vpop.f32.mrf.mxu1 }
 0x10e   : > { %v1244_v20 = vpop.f32.mrf.mxu0 }
 0x10f   : > { %v1280_v14 = vpop.f32.mrf.mxu1 }
 0x110   : > { %v403_v21 = vpop.f32.mrf.mxu0  ;;  %v519_v14 = vadd.f32 %v1718_v10, %v1716_v9 }
 0x111   : > { %v529_v22 = vpop.f32.mrf.mxu1 }
 0x112   : > { %v1245_v23 = vpop.f32.mrf.mxu0 }
 0x113   : > { %v1281_v26 = vpop.f32.mrf.mxu1 }
 0x114   : > { %v682_v27 = vpop.f32.mrf.mxu0 }
 0x115   : > { %v720_v28 = vadd.f32 %v682_v27, %v495_v25  ;;  %v843_v29 = vpop.f32.mrf.mxu1 }
 0x116   : > { %v1300_v30 = vpop.f32.mrf.mxu0 }
 0x117   : > { %v881_v32 = vadd.f32 %v843_v29, %v720_v28  ;;  %v1336_v33 = vpop.f32.mrf.mxu1  ;;  %v522_v28 = vadd.f32 %v1722_v17, %v1720_v16 }
 0x118   : > { %v685_v35 = vpop.f32.mrf.mxu0 }
 0x119   : > { %v721_v36 = vadd.f32 %v685_v35, %v498_v31  ;;  %v846_v38 = vpop.f32.mrf.mxu1  ;;  %v897_v39 = vadd.f32 %v1731_v34, %v881_v32 }
 0x11a   : > { %v1301_v24 = vpop.f32.mrf.mxu0 }
 0x11b   : > { %v882_v40 = vadd.f32 %v846_v38, %v721_v36  ;;  %v1337_v41 = vpop.f32.mrf.mxu1  ;;  %v906_v49 = vmax.f32 %v897_v39, 0.0  ;;  %v527_v38 = vadd.f32 %v1726_v13, %v1724_v12 }
 0x11c   : > { %v690_v42 = vpop.f32.mrf.mxu0 }
 0x11d   : > { %v898_v43 = vadd.f32 %v1731_v34, %v882_v40  ;;  %v722_v44 = vadd.f32 %v690_v42, %v503_v37  ;;  %v851_v45 = vpop.f32.mrf.mxu1 }
 0x11e   : > { %v1304_v47 = vpop.f32.mrf.mxu0 }
 0x11f   : > { %v907_v50 = vmax.f32 %v898_v43, 0.0  ;;  %v883_v51 = vadd.f32 %v851_v45, %v722_v44  ;;  %v1340_v52 = vpop.f32.mrf.mxu1 }
 0x120   : > { %v693_v53 = vpop.f32.mrf.mxu0 }
 0x121   : > { %v1138_v54 = vpack.c.bf16 %v907_v50, %v906_v49  ;;  %v723_v55 = vadd.f32 %v693_v53, %v506_v46  ;;  %v854_v56 = vpop.f32.mrf.mxu1  ;;  %v899_v58 = vadd.f32 %v1731_v34, %v883_v51 }
 0x122   : > { %v1305_v57 = vpop.f32.mrf.mxu0 }
 0x123   : > { %1139 = vst [vmem:[%s1739_s10] sm:$0xff] %v1138_v54   ;;  %v884_v59 = vadd.f32 %v854_v56, %v723_v55  ;;  %v1341_v60 = vpop.f32.mrf.mxu1  ;;  %v908_v7 = vmax.f32 %v899_v58, 0.0 }
 0x124   : > { %v698_v61 = vpop.f32.mrf.mxu0 }
 0x125   : > { %v900_v62 = vadd.f32 %v1731_v34, %v884_v59  ;;  %v724_v63 = vadd.f32 %v698_v61, %v511_v48  ;;  %v859_v1 = vpop.f32.mrf.mxu1 }
 0x126   : > { %v1308_v3 = vpop.f32.mrf.mxu0 }
 0x127   : > { %v909_v8 = vmax.f32 %v900_v62, 0.0  ;;  %v885_v11 = vadd.f32 %v859_v1, %v724_v63  ;;  %v1344_v15 = vpop.f32.mrf.mxu1 }
 0x128   : > { %v701_v2 = vpop.f32.mrf.mxu0 }
 0x129   : > { %v1143_v0 = vpack.c.bf16 %v909_v8, %v908_v7  ;;  %v725_v18 = vadd.f32 %v701_v2, %v514_v4  ;;  %v862_v19 = vpop.f32.mrf.mxu1  ;;  %v901_v21 = vadd.f32 %v1731_v34, %v885_v11 }
 0x12a   : > { %v1309_v20 = vpop.f32.mrf.mxu0 }
 0x12b   : > { %1155 = vst [vmem:[%s1739_s10 + $0x8] sm:$0xff] %v1143_v0   ;;  %v886_v22 = vadd.f32 %v862_v19, %v725_v18  ;;  %v1345_v23 = vpop.f32.mrf.mxu1  ;;  %v910_v29 = vmax.f32 %v901_v21, 0.0 }
 0x12c   : > { %v706_v25 = vpop.f32.mrf.mxu0 }
 0x12d   : > { %v902_v5 = vadd.f32 %v1731_v34, %v886_v22  ;;  %v726_v6 = vadd.f32 %v706_v25, %v519_v14  ;;  %v867_v26 = vpop.f32.mrf.mxu1 }
 0x12e   : > { %v1312_v27 = vpop.f32.mrf.mxu0 }
 0x12f   : > { %v911_v30 = vmax.f32 %v902_v5, 0.0  ;;  %v887_v31 = vadd.f32 %v867_v26, %v726_v6  ;;  %v1348_v32 = vpop.f32.mrf.mxu1 }
 0x130   : > { %v709_v9 = vpop.f32.mrf.mxu0 }
 0x131   : > { %v1148_v10 = vpack.c.bf16 %v911_v30, %v910_v29  ;;  %v727_v33 = vadd.f32 %v709_v9, %v522_v28  ;;  %v870_v35 = vpop.f32.mrf.mxu1  ;;  %v903_v24 = vadd.f32 %v1731_v34, %v887_v31 }
 0x132   : > { %v1313_v36 = vpop.f32.mrf.mxu0 }
 0x133   : > { %1156 = vst [vmem:[%s1739_s10 + $0x10] sm:$0xff] %v1148_v10   ;;  %v888_v37 = vadd.f32 %v870_v35, %v727_v33  ;;  %v1349_v39 = vpop.f32.mrf.mxu1  ;;  %v912_v43 = vmax.f32 %v903_v24, 0.0 }
 0x134   : > { %v714_v40 = vpop.f32.mrf.mxu0 }
 0x135   : > { %v904_v16 = vadd.f32 %v1731_v34, %v888_v37  ;;  %v728_v17 = vadd.f32 %v714_v40, %v527_v38  ;;  %v875_v41 = vpop.f32.mrf.mxu1 }
 0x136   : > { %v1316_v42 = vpop.f32.mrf.mxu0 }
 0x137   : > { %v913_v44 = vmax.f32 %v904_v16, 0.0  ;;  %v889_v45 = vadd.f32 %v875_v41, %v728_v17  ;;  %v1352_v47 = vpop.f32.mrf.mxu1 }
 0x138   : > { %v717_v46 = vpop.f32.mrf.mxu0 }
 0x139   : > { %v1153_v49 = vpack.c.bf16 %v913_v44, %v912_v43  ;;  %v905_v12 = vadd.f32 %v1731_v34, %v889_v45  ;;  %v878_v13 = vpop.f32.mrf.mxu1 }
 0x13a   : > { %v1317_v50 = vpop.f32.mrf.mxu0 }
 0x13b   : > { %1157 = vst [vmem:[%s1739_s10 + $0x18] sm:$0xff] %v1153_v49   ;;  %v914_v51 = vmax.f32 %v905_v12, 0.0  ;;  %v1353_v52 = vpop.f32.mrf.mxu1 }
 0x13d   : > { %v1134_v53 = vpack.c.bf16 %v914_v51, %v914_v51 }
 0x13f   : > { %960 = vst [vmem:[%s1739_s10 + $0x20] sm:$0xf] %v1134_v53 }
 0x140 PF: > { %s13_s12 = sadd.s32 1, %s1415_s12  }
 0x141   : > { %p10_p4 = scmp.ge.s32.totalorder %s13_s12, 4  }
 0x143   :  { %12 = sbr.rel (!%p10_p4) target bundleno = 1 (0x1), region = 65 }

// kernel: fcn_model_forward.7
= control target key start
LH: loop header
LB: loop body
LE: loop exit
PB: predicated region body
PF: predicated region fallthrough
CT: control target
= control target key end

     0   :  { %s3439_s21 = smov 0   ;;  %s4402_s0 = inlined_call_operand.vmem [shape: bf16[2,110,128], index: 0, kind: input, shape index: {}]   ;;  %s4403_s1 = inlined_call_operand.vmem [shape: bf16[9,128,128], index: 1, kind: input, shape index: {}]   ;;  %s4404_s2 = inlined_call_operand.vmem [shape: f32[1,128], index: 2, kind: input, shape index: {}]   ;;  %s4405_s3 = inlined_call_operand.vmem [shape: bf16[128,128], index: 3, kind: input, shape index: {}]   ;;  %s4406_s4 = inlined_call_operand.vmem [shape: f32[1,128], index: 4, kind: input, shape index: {}]   ;;  %s4407_s5 = inlined_call_operand.vmem [shape: bf16[256,80], index: 5, kind: input, shape index: {}]   ;;  %s4408_s6 = inlined_call_operand.vmem [shape: f32[2,256,128], index: 6, kind: output, shape index: {}]  }
   0x1 LB: > { %s2443_s22 = sadd.s32 4294967295, %s3400_s21   ;;  %p2447_p0 = scmp.ge.s32.totalorder %s3400_s21, 1  ;;  %s3400_s21 = sphi %s3439_s21, %s16_s21  }
   0x2   : > { %p212_p1 = scmp.lt.s32.totalorder %s3400_s21, 3 }
   0x4   : > { %p213_p2 = pnand %p2447_p0, %p212_p1 }
   0x5   : > { %p242_p3 = scmp.lt.s32.totalorder (!%p213_p2), %s2443_s22, 1 }
   0x6   : > { %216 = sbr.rel (%p213_p2) target bundleno = 886 (0x376), region = 44 }
   0xb   : > { %v3284_v0 = vld [vmem:[%s4403_s1 + $0x78] sm:$0xff]   ;;  %v3402_v1 = vmov 0.0   ;;  %v3286_v3 = vld [vmem:[%s4403_s1 + $0x70] sm:$0xff]   ;;  %vm3403_vm0 = vmmov 0   ;;  %s4410_s22 = smov (!%p242_p3, %s2443_s22), 1  ;;  %v3288_v5 = vld [vmem:[%s4403_s1 + $0x68] sm:$0xff]  }
   0xc   : > { %2861 = vmatprep.subr.bf16.mxu0 %v3402_v1  ;;  %2897 = vmatprep.subr.bf16.mxu1 %v3402_v1  ;;  %v3285_v2 = vld [vmem:[%s4403_s1 + $0x38] sm:$0xff]   ;;  %v3287_v4 = vld [vmem:[%s4403_s1 + $0x30] sm:$0xff]   ;;  %v3289_v6 = vld [vmem:[%s4403_s1 + $0x28] sm:$0xff]   ;;  %s3273_s11 = smul.u32 56, %s4410_s22  ;;  %vm327_vm1 = vsmask.f32 7424 }
   0xd   : > { %2862 = vmatpush3.bf16.msra.mxu0 %v3284_v0  ;;  %2877 = vmatprep.mubr.msk.bf16.mxu0 %vm3403_vm0, %v3402_v1  ;;  %v3290_v7 = vld [vmem:[%s4403_s1 + $0x60] sm:$0xff]   ;;  %v3292_v9 = vld [vmem:[%s4403_s1 + $0x58] sm:$0xff]   ;;  %v3294_v14 = vld [vmem:[%s4403_s1 + $0x50] sm:$0xff]   ;;  %vm641_vm2 = vcmask 1046528   ;;  %vm1185_vm3 = vcmask 1045504   ;;  %vm1705_vm5 = vcmask 1044480  }
   0xe   : > { %2898 = vmatpush3.bf16.msra.mxu1 %v3285_v2  ;;  %2863 = vmatprep.subr.bf16.mxu0 %v3402_v1  ;;  %v3291_v8 = vld [vmem:[%s4403_s1 + $0x20] sm:$0xff]   ;;  %s3489_s18 = scalar_lea.vmem %s4402_s0, %s3273_s11  ;;  %v3293_v10 = vld [vmem:[%s4403_s1 + $0x18] sm:$0xff]   ;;  %v3295_v20 = vld [vmem:[%s4403_s1 + $0x10] sm:$0xff]   ;;  %vm1518_vm4 = vsmask.f32 5376  ;;  %vm2146_vm7 = vcmask 654336  }
   0xf   : > { %2899 = vmatprep.subr.bf16.mxu1 %v3402_v1  ;;  %2913 = vmatprep.mubr.msk.bf16.mxu1 %vm3403_vm0, %v3402_v1  ;;  %v253_v11 = vld [vmem:[%s3489_s18] sm:$0xf]  ;;  %v3501_v12 = vld [vmem:[%s3489_s18 + $0x4] sm:$0xf]  ;;  %v3504_v13 = vld [vmem:[%s3489_s18 + $0x8] sm:$0xf] }
  0x10   : > { %v3510_v15 = vld [vmem:[%s3489_s18 + $0xc] sm:$0xf]  ;;  %v3513_v16 = vcombine.low %v253_v11, %v3501_v12  ;;  %v3516_v17 = vld [vmem:[%s3489_s18 + $0x10] sm:$0xf]  ;;  %v3523_v19 = vld [vmem:[%s3489_s18 + $0x14] sm:$0xf] }
  0x11   : > { %2864 = vmatpush3.bf16.msra.mxu0 %v3286_v3  ;;  %v3520_v18 = vcombine.low %v3504_v13, %v3510_v15  ;;  %v3532_v22 = vcombine.low %v3516_v17, %v3523_v19  ;;  %v3296_v25 = vld [vmem:[%s4403_s1 + $0x48] sm:$0xff]   ;;  %v3298_v34 = vld [vmem:[%s4403_s1 + $0x40] sm:$0xff]   ;;  %v3565_v41 = vld [vmem:[%s3489_s18 + $0x18] sm:$0xf]  ;;  %vm978_vm6 = vsmask.f32 6400 }
  0x12   : > { %2900 = vmatpush3.bf16.msra.mxu1 %v3287_v4  ;;  %2865 = vmatprep.subr.bf16.mxu0 %v3402_v1  ;;  %v331_v21 = vshll.u32 %v3513_v16, 16  ;;  %v329_v26 = vshrl.u32 %v3513_v16, 16  ;;  %v3297_v32 = vld [vmem:[%s4403_s1 + $0x8] sm:$0xff]   ;;  %v3299_v37 = vld [vmem:[%s4403_s1] sm:$0xff]   ;;  %v3569_v43 = vld [vmem:[%s3489_s18 + $0x1c] sm:$0xf] }
  0x13   : > { %2901 = vmatprep.subr.bf16.mxu1 %v3402_v1  ;;  %v336_v23 = vshll.u32 %v3520_v18, 16  ;;  %v340_v24 = vshrl.u32 %v3520_v18, 16  ;;  %v344_v27 = vshll.u32 %v3532_v22, 16  ;;  %v348_v31 = vshrl.u32 %v3532_v22, 16  ;;  %v3303_v44 = vld [vmem:[%s4403_s1 + $0xb8] sm:$0xff]   ;;  %v3305_v52 = vld [vmem:[%s4403_s1 + $0xb0] sm:$0xff]  }
  0x14   : > { %v333_v28 = vrot.slane %v331_v21, 1  ;;  %v3304_v45 = vld [vmem:[%s4403_s1 + $0xf8] sm:$0xff]   ;;  %v3581_v47 = vcombine.low %v3565_v41, %v3569_v43  ;;  %v3584_v48 = vld [vmem:[%s3489_s18 + $0x28] sm:$0xf]  ;;  %v3587_v49 = vld [vmem:[%s3489_s18 + $0x2c] sm:$0xf] }
  0x15   : > { %2866 = vmatpush3.bf16.msra.mxu0 %v3288_v5  ;;  %v3542_v29 = vrot.slane %v336_v23, 3  ;;  %v3544_v30 = vrot.slane %v340_v24, 2  ;;  %v1523_v33 = vrot.slane %v344_v27, 3  ;;  %v1522_v35 = vrot.slane %v348_v31, 2  ;;  %v3306_v53 = vld [vmem:[%s4403_s1 + $0xf0] sm:$0xff]   ;;  %v3308_v55 = vld [vmem:[%s4403_s1 + $0xa8] sm:$0xff]  }
  0x16   : > { %2902 = vmatpush3.bf16.msra.mxu1 %v3289_v6  ;;  %2867 = vmatprep.subr.bf16.mxu0 %v3402_v1  ;;  %v334_v38 = vor.u32 %v333_v28, %v329_v26  ;;  %v338_v39 = vrot.slane %v336_v23, 1  ;;  %v346_v46 = vrot.slane %v344_v27, 1  ;;  %v3594_v51 = vcombine.low %v3584_v48, %v3587_v49  ;;  %v3612_v57 = vld [vmem:[%s3489_s18 + $0x20] sm:$0xf]  ;;  %v3615_v58 = vld [vmem:[%s3489_s18 + $0x24] sm:$0xf] }
  0x17   : > { %2903 = vmatprep.subr.bf16.mxu1 %v3402_v1  ;;  %v1521_v36 = vor.u32 %v3542_v29, %v3544_v30  ;;  %v3560_v40 = vor.u32 %v1523_v33, %v1522_v35  ;;  %v352_v54 = vshll.u32 %v3581_v47, 16  ;;  %v3309_v59 = vld [vmem:[%s4403_s1 + $0xe8] sm:$0xff]   ;;  %v3629_v62 = vcombine.low %v3612_v57, %v3615_v58  ;;  %v3310_v63 = vld [vmem:[%s4403_s1 + $0xa0] sm:$0xff]   ;;  %v3313_v5 = vld [vmem:[%s4403_s1 + $0x98] sm:$0xff]   ;;  %s2709_s25 = sshll.u32 %s4410_s22, 8 }
  0x18   : > { %v339_v42 = vsel %vm327_vm1, %v334_v38, %v338_v39  ;;  %v342_v50 = vor.u32 %v340_v24, %v338_v39  ;;  %v350_v60 = vor.u32 %v348_v31, %v346_v46  ;;  %v3311_v0 = vld [vmem:[%s4403_s1 + $0xe0] sm:$0xff]   ;;  %v356_v3 = vshrl.u32 %v3581_v47, 16  ;;  %v3314_v6 = vld [vmem:[%s4403_s1 + $0xd8] sm:$0xff]   ;;  %v3316_v11 = vld [vmem:[%s4403_s1 + $0xd0] sm:$0xff]   ;;  %s4333_s30 = scalar_lea.vmem %s4408_s6, %s2709_s25 }
  0x19   : > { %2868 = vmatpush3.bf16.msra.mxu0 %v3290_v7  ;;  %v354_v61 = vrot.slane %v352_v54, 1  ;;  %v360_v4 = vshll.u32 %v3629_v62, 16  ;;  %v3320_v23 = vld [vmem:[%s4403_s1 + $0x88] sm:$0xff]   ;;  %v3322_v27 = vld [vmem:[%s4403_s1 + $0x80] sm:$0xff]   ;;  %v3706_v33 = vcombine.low %v3510_v15, %v3516_v17  ;;  %v643_v35 = vrot.slane %v3520_v18, 1  ;;  %v3330_v30 = vld [vmem:[%s4403_s1 + $0x170] sm:$0xff]  }
  0x1a   : > { %2904 = vmatpush3.bf16.msra.mxu1 %v3291_v8  ;;  %2869 = vmatprep.subr.bf16.mxu0 %v3402_v1  ;;  %v347_v56 = vsel %vm327_vm1, %v342_v50, %v346_v46  ;;  %v3321_v24 = vld [vmem:[%s4403_s1 + $0xc8] sm:$0xff]   ;;  %v3323_v28 = vld [vmem:[%s4403_s1 + $0xc0] sm:$0xff]   ;;  %v645_v17 = vrot.slane %v3532_v22, 1  ;;  %v647_v38 = vrot.slane %v3581_v47, 1  ;;  %v3328_v46 = vld [vmem:[%s4403_s1 + $0x178] sm:$0xff]   ;;  %v1354_v50 = vrot.slane %v3520_v18, 2 }
  0x1b   : > { %2905 = vmatprep.subr.bf16.mxu1 %v3402_v1  ;;  %v355_v2 = vsel %vm327_vm1, %v350_v60, %v354_v61  ;;  %v358_v7 = vor.u32 %v356_v3, %v354_v61  ;;  %v362_v8 = vrot.slane %v360_v4, 1  ;;  %v1527_v29 = vrot.slane %v352_v54, 3 }
  0x1c   : > { %v1359_v61 = vrot.slane %v3629_v62, 2 }
  0x1d   : > { %2870 = vmatpush3.bf16.msra.mxu0 %v3292_v9  ;;  %v3661_v9 = vcombine.low %v3584_v48, %v3584_v48 }
  0x1e   : > { %2906 = vmatpush3.bf16.msra.mxu1 %v3293_v10  ;;  %2871 = vmatprep.subr.bf16.mxu0 %v3402_v1  ;;  %v3315_v10 = vld [vmem:[%s4403_s1 + $0x90] sm:$0xff]  }
  0x1f   : > { %2907 = vmatprep.subr.bf16.mxu1 %v3402_v1  ;;  %v368_v21 = vshll.u32 %v3661_v9, 16 }
  0x21   : > { %2872 = vmatpush3.bf16.msra.mxu0 %v3294_v14  ;;  %v363_v14 = vsel %vm327_vm1, %v358_v7, %v362_v8  ;;  %v370_v26 = vrot.slane %v368_v21, 1  ;;  %v3809_v21 = vld [vmem:[%s3489_s18 + $0x30] ss:$0 sps:$4 sm:$0xff]  }
  0x22   : > { %2908 = vmatpush3.bf16.msra.mxu1 %v3295_v20  ;;  %2873 = vmatprep.subr.bf16.mxu0 %v3402_v1  ;;  %v364_v20 = vshrl.u32 %v3629_v62, 16 }
  0x23   : > { %2909 = vmatprep.subr.bf16.mxu1 %v3402_v1 }
  0x25   : > { %2874 = vmatpush3.bf16.msra.mxu0 %v3296_v25  ;;  %v366_v25 = vor.u32 %v364_v20, %v362_v8  ;;  %v1535_v8 = vshrl.u32 %v3594_v51, 16 }
  0x26   : > { %2910 = vmatpush3.bf16.msra.mxu1 %v3297_v32  ;;  %2875 = vmatprep.subr.bf16.mxu0 %v3402_v1  ;;  %v3702_v32 = vcombine.low %v3501_v12, %v3504_v13  ;;  %v3717_v12 = vcombine.low %v3569_v43, %v3612_v57  ;;  %v3721_v13 = vcombine.low %v3615_v58, %v3584_v48  ;;  %v651_v48 = vrot.slane %v3661_v9, 1  ;;  %v3329_v57 = vld [vmem:[%s4403_s1 + $0x130] sm:$0xff]  }
  0x27   : > { %2911 = vmatprep.subr.bf16.mxu1 %v3402_v1  ;;  %v371_v31 = vsel %vm327_vm1, %v366_v25, %v370_v26  ;;  %v991_v26 = vshll.u32 %v3706_v33, 16 }
  0x28   : > { %v814_v15 = vrot.slane %v3702_v32, 1  ;;  %v819_v39 = vrot.slane %v3717_v12, 1  ;;  %v821_v43 = vrot.slane %v3721_v13, 1  ;;  %v980_v58 = vshrl.u32 %v3702_v32, 16 }
  0x29   : > { %2876 = vmatpush3.bf16.msra.mxu0 %v3298_v34  ;;  %v642_v34 = vrot.slane %v3513_v16, 1 }
  0x2a   : > { %2912 = vmatpush3.bf16.msra.mxu1 %v3299_v37  ;;  %2933 = vmatprep.subr.bf16.mxu0 %v3402_v1  ;;  %v3713_v37 = vcombine.low %v3523_v19, %v3565_v41  ;;  %v3326_v41 = vld [vmem:[%s4403_s1 + $0x138] sm:$0xff]  }
  0x2b   : > { %2969 = vmatprep.subr.bf16.mxu1 %v3402_v1 }
  0x2c   : > { %2878 = vmatmul.mubr.bf16.vlgmr.msra.gmra.mxu0 %v339_v42  ;;  %v817_v19 = vrot.slane %v3713_v37, 1  ;;  %v649_v42 = vrot.slane %v3629_v62, 1 }
  0x2d   : > { %2914 = vmatmul.mubr.bf16.vlgmr.msra.gmra.mxu1 %v3513_v16  ;;  %2881 = vmatprep.mubr.msk.bf16.mxu0 %vm3403_vm0, %v3402_v1  ;;  %v815_v16 = vrot.slane %v3706_v33, 1 }
  0x2e   : > { %2917 = vmatprep.mubr.msk.bf16.mxu1 %vm3403_vm0, %v3402_v1  ;;  %2934 = vmatpush3.bf16.msra.mxu0 %v3303_v44  ;;  %v644_v44 = vsel %vm641_vm2, %v642_v34, %v643_v35  ;;  %v3334_v34 = vld [vmem:[%s4403_s1 + $0x120] sm:$0xff]  }
  0x2f   : > { %2970 = vmatpush3.bf16.msra.mxu1 %v3304_v45  ;;  %2935 = vmatprep.subr.bf16.mxu0 %v3402_v1  ;;  %v816_v45 = vsel %vm641_vm2, %v814_v15, %v815_v16  ;;  %v1706_v15 = vrot.slane %v3520_v18, 3 }
  0x30   : > { %2971 = vmatprep.subr.bf16.mxu1 %v3402_v1 }
  0x32   : > { %2936 = vmatpush3.bf16.msra.mxu0 %v3305_v52  ;;  %v1355_v52 = vrot.slane %v3532_v22, 2 }
  0x33   : > { %2972 = vmatpush3.bf16.msra.mxu1 %v3306_v53  ;;  %2937 = vmatprep.subr.bf16.mxu0 %v3402_v1  ;;  %v3753_v53 = vsel %vm1518_vm4, %v1521_v36, %v3560_v40  ;;  %v983_v36 = vshll.u32 %v3702_v32, 16 }
  0x34   : > { %2882 = vmatmul.mubr.bf16.gmra.mxu0 %v347_v56  ;;  %2973 = vmatprep.subr.bf16.mxu1 %v3402_v1  ;;  %v1526_v56 = vrot.slane %v356_v3, 2 }
  0x35   : > { %2918 = vmatmul.mubr.bf16.gmra.mxu1 %v3520_v18  ;;  %2885 = vmatprep.mubr.msk.bf16.mxu0 %vm3403_vm0, %v3402_v1 }
  0x36   : > { %2921 = vmatprep.mubr.msk.bf16.mxu1 %vm3403_vm0, %v3402_v1  ;;  %2938 = vmatpush3.bf16.msra.mxu0 %v3308_v55  ;;  %v1357_v55 = vrot.slane %v3581_v47, 2  ;;  %v1528_v54 = vor.u32 %v1527_v29, %v1526_v56  ;;  %v1713_v56 = vrot.slane %v3594_v51, 3 }
  0x37   : > { %2974 = vmatpush3.bf16.msra.mxu1 %v3309_v59  ;;  %2939 = vmatprep.subr.bf16.mxu0 %v3402_v1  ;;  %v3763_v59 = vsel %vm1185_vm3, %v1354_v50, %v1355_v52  ;;  %v1709_v50 = vrot.slane %v3581_v47, 3 }
  0x38   : > { %2975 = vmatprep.subr.bf16.mxu1 %v3402_v1  ;;  %v3774_v60 = vsel %vm1185_vm3, %v1355_v52, %v1357_v55  ;;  %v3786_v3 = vsel %vm1185_vm3, %v1357_v55, %v1359_v61  ;;  %v3795_v7 = vsel %vm1518_vm4, %v3560_v40, %v1528_v54  ;;  %v818_v40 = vsel %vm641_vm2, %v815_v16, %v817_v19 }
  0x39   : > { %v1707_v16 = vrot.slane %v3532_v22, 3  ;;  %v1711_v55 = vrot.slane %v3629_v62, 3 }
  0x3a   : > { %2940 = vmatpush3.bf16.msra.mxu0 %v3310_v63  ;;  %v1530_v63 = vrot.slane %v364_v20, 2 }
  0x3b   : > { %2976 = vmatpush3.bf16.msra.mxu1 %v3311_v0  ;;  %2941 = vmatprep.subr.bf16.mxu0 %v3402_v1  ;;  %v1531_v0 = vrot.slane %v360_v4, 3  ;;  %v3843_v52 = vsel %vm1705_vm5, %v1706_v15, %v1707_v16  ;;  %v3849_v29 = vsel %vm1705_vm5, %v1707_v16, %v1709_v50  ;;  %v1189_v15 = vrot.slane %v3713_v37, 2  ;;  %v3347_v16 = vld [vmem:[%s4403_s1 + $0x1b0] sm:$0xff]  }
  0x3c   : > { %2886 = vmatmul.mubr.bf16.gmra.mxu0 %v355_v2  ;;  %2977 = vmatprep.subr.bf16.mxu1 %v3402_v1  ;;  %v988_v2 = vshrl.u32 %v3706_v33, 16 }
  0x3d   : > { %2922 = vmatmul.mubr.bf16.gmra.mxu1 %v3532_v22  ;;  %2889 = vmatprep.mubr.msk.bf16.mxu0 %vm3403_vm0, %v3402_v1  ;;  %v1532_v4 = vor.u32 %v1531_v0, %v1530_v63  ;;  %v3337_v63 = vld [vmem:[%s4403_s1 + $0x158] sm:$0xff]   ;;  %v3338_v22 = vld [vmem:[%s4403_s1 + $0x110] sm:$0xff]  }
  0x3e   : > { %2925 = vmatprep.mubr.msk.bf16.mxu1 %vm3403_vm0, %v3402_v1  ;;  %2942 = vmatpush3.bf16.msra.mxu0 %v3313_v5  ;;  %v1361_v5 = vrot.slane %v3594_v51, 2 }
  0x3f   : > { %2978 = vmatpush3.bf16.msra.mxu1 %v3314_v6  ;;  %2943 = vmatprep.subr.bf16.mxu0 %v3402_v1  ;;  %v3331_v6 = vld [vmem:[%s4403_s1 + $0x128] sm:$0xff]  }
  0x40   : > { %2979 = vmatprep.subr.bf16.mxu1 %v3402_v1  ;;  %v3806_v20 = vsel %vm1185_vm3, %v1359_v61, %v1361_v5  ;;  %v3856_v61 = vsel %vm1705_vm5, %v1709_v50, %v1711_v55 }
  0x42   : > { %2944 = vmatpush3.bf16.msra.mxu0 %v3315_v10  ;;  %v1538_v10 = vshll.u32 %v3594_v51, 16  ;;  %v648_v51 = vsel %vm641_vm2, %v645_v17, %v647_v38 }
  0x43   : > { %2980 = vmatpush3.bf16.msra.mxu1 %v3316_v11  ;;  %2945 = vmatprep.subr.bf16.mxu0 %v3402_v1  ;;  %v646_v11 = vsel %vm641_vm2, %v643_v35, %v645_v17  ;;  %v3339_v17 = vld [vmem:[%s4403_s1 + $0x150] sm:$0xff]  }
  0x44   : > { %2890 = vmatmul.mubr.bf16.gmra.mxu0 %v363_v14  ;;  %2981 = vmatprep.subr.bf16.mxu1 %v3402_v1  ;;  %v3333_v14 = vld [vmem:[%s4403_s1 + $0x168] sm:$0xff]   ;;  %v1540_v25 = vrot.slane %v1538_v10, 3 }
  0x45   : > { %2926 = vmatmul.mubr.bf16.gmra.mxu1 %v3581_v47  ;;  %2893 = vmatprep.mubr.msk.bf16.mxu0 %vm3403_vm0, %v3402_v1  ;;  %v3342_v10 = vld [vmem:[%s4403_s1 + $0x148] sm:$0xff]  }
  0x46   : > { %2929 = vmatprep.mubr.msk.bf16.mxu1 %vm3403_vm0, %v3402_v1  ;;  %2946 = vmatpush3.bf16.msra.mxu0 %v3320_v23  ;;  %v3815_v23 = vsel %vm1518_vm4, %v1528_v54, %v1532_v4  ;;  %v3859_v54 = vsel %vm1705_vm5, %v1711_v55, %v1713_v56 }
  0x47   : > { %2982 = vmatpush3.bf16.msra.mxu1 %v3321_v24  ;;  %2947 = vmatprep.subr.bf16.mxu0 %v3402_v1  ;;  %v1537_v24 = vrot.slane %v1535_v8, 2  ;;  %v3906_v8 = vcombine.low %v3587_v49, %v3587_v49 }
  0x48   : > { %2983 = vmatprep.subr.bf16.mxu1 %v3402_v1 }
  0x49   : > { %v1541_v35 = vor.u32 %v1540_v25, %v1537_v24  ;;  %v823_v49 = vrot.slane %v3906_v8, 1  ;;  %v990_v24 = vrot.slane %v988_v2, 1  ;;  %v993_v25 = vrot.slane %v991_v26, 2 }
  0x4a   : > { %2948 = vmatpush3.bf16.msra.mxu0 %v3322_v27  ;;  %v1363_v27 = vrot.slane %v3809_v21, 2 }
  0x4b   : > { %2984 = vmatpush3.bf16.msra.mxu1 %v3323_v28  ;;  %3005 = vmatprep.subr.bf16.mxu0 %v3402_v1  ;;  %v1544_v28 = vshrl.u32 %v3809_v21, 16  ;;  %v3840_v18 = vsel %vm1518_vm4, %v1532_v4, %v1541_v35  ;;  %v822_v4 = vsel %vm641_vm2, %v819_v39, %v821_v43 }
  0x4c   : > { %2894 = vmatmul.mubr.bf16.gmra.mxu0 %v371_v31  ;;  %3041 = vmatprep.subr.bf16.mxu1 %v3402_v1  ;;  %v1547_v31 = vshll.u32 %v3809_v21, 16 }
  0x4d   : > { %2930 = vmatmul.mubr.bf16.gmra.mxu1 %v3629_v62  ;;  %2949 = vmatprep.mubr.msk.bf16.mxu0 %vm3403_vm0, %v3402_v1  ;;  %v824_v62 = vsel %vm641_vm2, %v821_v43, %v823_v49  ;;  %v1186_v43 = vrot.slane %v3702_v32, 2  ;;  %v1024_v49 = vshrl.u32 %v3906_v8, 16 }
  0x4e   : > { %2985 = vmatprep.mubr.msk.bf16.mxu1 %vm3403_vm0, %v3402_v1 }
  0x54   : > { %2950 = vmatmul.mubr.bf16.vlgmr.msra.gmra.mxu0 %v644_v44  ;;  %v3834_v44 = vsel %vm1185_vm3, %v1361_v5, %v1363_v27  ;;  %v820_v5 = vsel %vm641_vm2, %v817_v19, %v819_v39  ;;  %v3340_v19 = vld [vmem:[%s4403_s1 + $0x108] sm:$0xff]   ;;  %v3344_v39 = vld [vmem:[%s4403_s1 + $0x140] sm:$0xff]  }
  0x55   : > { %2986 = vmatmul.mubr.bf16.vlgmr.msra.gmra.mxu1 %v816_v45  ;;  %2953 = vmatprep.mubr.msk.bf16.mxu0 %vm3403_vm0, %v3402_v1  ;;  %v1546_v45 = vrot.slane %v1544_v28, 2 }
  0x56   : > { %2989 = vmatprep.mubr.msk.bf16.mxu1 %vm3403_vm0, %v3402_v1  ;;  %3006 = vmatpush3.bf16.msra.mxu0 %v3326_v41  ;;  %v3335_v41 = vld [vmem:[%s4403_s1 + $0x160] sm:$0xff]  }
  0x57   : > { %3042 = vmatpush3.bf16.msra.mxu1 %v3328_v46  ;;  %3007 = vmatprep.subr.bf16.mxu0 %v3402_v1  ;;  %v1549_v46 = vrot.slane %v1547_v31, 3  ;;  %v3345_v31 = vld [vmem:[%s4403_s1 + $0x1b8] sm:$0xff]  }
  0x58   : > { %3043 = vmatprep.subr.bf16.mxu1 %v3402_v1 }
  0x5a   : > { %3008 = vmatpush3.bf16.msra.mxu0 %v3329_v57  ;;  %v1550_v57 = vor.u32 %v1549_v46, %v1546_v45 }
  0x5b   : > { %3044 = vmatpush3.bf16.msra.mxu1 %v3330_v30  ;;  %3009 = vmatprep.subr.bf16.mxu0 %v3402_v1  ;;  %v3336_v30 = vld [vmem:[%s4403_s1 + $0x118] sm:$0xff]  }
  0x5c   : > { %2954 = vmatmul.mubr.bf16.gmra.mxu0 %v646_v11  ;;  %3045 = vmatprep.subr.bf16.mxu1 %v3402_v1  ;;  %v3870_v0 = vsel %vm1518_vm4, %v1541_v35, %v1550_v57  ;;  %v1715_v11 = vrot.slane %v3809_v21, 3  ;;  %v982_v21 = vrot.slane %v980_v58, 1  ;;  %v1000_v58 = vshll.u32 %v3713_v37, 16 }
  0x5d   : > { %2990 = vmatmul.mubr.bf16.gmra.mxu1 %v818_v40  ;;  %2957 = vmatprep.mubr.msk.bf16.mxu0 %vm3403_vm0, %v3402_v1  ;;  %v985_v40 = vrot.slane %v983_v36, 2  ;;  %v1187_v36 = vrot.slane %v3706_v33, 2  ;;  %v1006_v33 = vshrl.u32 %v3717_v12, 16  ;;  %v1009_v35 = vshll.u32 %v3717_v12, 16 }
  0x5e   : > { %2993 = vmatprep.mubr.msk.bf16.mxu1 %vm3403_vm0, %v3402_v1  ;;  %3010 = vmatpush3.bf16.msra.mxu0 %v3331_v6  ;;  %v650_v6 = vsel %vm641_vm2, %v647_v38, %v649_v42  ;;  %v3915_v47 = vsel %vm1705_vm5, %v1713_v56, %v1715_v11  ;;  %v3343_v38 = vld [vmem:[%s4403_s1 + $0x100] sm:$0xff]   ;;  %v1002_v27 = vrot.slane %v1000_v58, 2  ;;  %v3350_v56 = vld [vmem:[%s4403_s1 + $0x1e8] sm:$0xff]  }
  0x5f   : > { %3046 = vmatpush3.bf16.msra.mxu1 %v3333_v14  ;;  %3011 = vmatprep.subr.bf16.mxu0 %v3402_v1  ;;  %v652_v14 = vsel %vm641_vm2, %v649_v42, %v651_v48  ;;  %v986_v9 = vor.u32 %v985_v40, %v982_v21  ;;  %v994_v42 = vor.u32 %v993_v25, %v990_v24  ;;  %v997_v48 = vshrl.u32 %v3713_v37, 16  ;;  %v3349_v37 = vld [vmem:[%s4403_s1 + $0x1a8] sm:$0xff]   ;;  %v3356_v21 = vld [vmem:[%s4403_s1 + $0x1d0] sm:$0xff]   ;;  %v3359_v58 = vld [vmem:[%s4403_s1 + $0x180] sm:$0xff]  }
  0x60   : > { %3047 = vmatprep.subr.bf16.mxu1 %v3402_v1  ;;  %v1188_v28 = vsel %vm1185_vm3, %v1186_v43, %v1187_v36  ;;  %v1008_v46 = vrot.slane %v1006_v33, 1  ;;  %v1011_v50 = vrot.slane %v1009_v35, 2  ;;  %v1190_v55 = vsel %vm1185_vm3, %v1187_v36, %v1189_v15  ;;  %v3360_v43 = vld [vmem:[%s4403_s1 + $0x1c0] sm:$0xff]  }
  0x61   : > { %v995_v2 = vsel %vm978_vm6, %v986_v9, %v994_v42  ;;  %v999_v26 = vrot.slane %v997_v48, 1  ;;  %v1026_v24 = vrot.slane %v1024_v49, 1  ;;  %v3358_v9 = vld [vmem:[%s4403_s1 + $0x1c8] sm:$0xff]   ;;  %v1195_v48 = vrot.slane %v3906_v8, 2 }
  0x62   : > { %3012 = vmatpush3.bf16.msra.mxu0 %v3334_v34  ;;  %v3346_v34 = vld [vmem:[%s4403_s1 + $0x1f8] sm:$0xff]   ;;  %v1012_v57 = vor.u32 %v1011_v50, %v1008_v46 }
  0x63   : > { %3048 = vmatpush3.bf16.msra.mxu1 %v3335_v41  ;;  %3013 = vmatprep.subr.bf16.mxu0 %v3402_v1  ;;  %v1003_v32 = vor.u32 %v1002_v27, %v999_v26  ;;  %v3348_v41 = vld [vmem:[%s4403_s1 + $0x1f0] sm:$0xff]  }
  0x64   : > { %2958 = vmatmul.mubr.bf16.gmra.mxu0 %v648_v51  ;;  %3049 = vmatprep.subr.bf16.mxu1 %v3402_v1  ;;  %v1018_v51 = vshll.u32 %v3721_v13, 16  ;;  %v3362_v26 = vld [vmem:[%s4403_s1 + $0x230] sm:$0xff]  }
  0x65   : > { %2994 = vmatmul.mubr.bf16.gmra.mxu1 %v820_v5  ;;  %2961 = vmatprep.mubr.msk.bf16.mxu0 %vm3403_vm0, %v3402_v1  ;;  %v1004_v45 = vsel %vm978_vm6, %v994_v42, %v1003_v32  ;;  %v3351_v5 = vld [vmem:[%s4403_s1 + $0x1a0] sm:$0xff]  }
  0x66   : > { %2997 = vmatprep.mubr.msk.bf16.mxu1 %vm3403_vm0, %v3402_v1  ;;  %3014 = vmatpush3.bf16.msra.mxu0 %v3336_v30  ;;  %v1015_v30 = vshrl.u32 %v3721_v13, 16 }
  0x67   : > { %3050 = vmatpush3.bf16.msra.mxu1 %v3337_v63  ;;  %3015 = vmatprep.subr.bf16.mxu0 %v3402_v1  ;;  %v1191_v63 = vrot.slane %v3717_v12, 2  ;;  %v3353_v12 = vld [vmem:[%s4403_s1 + $0x198] sm:$0xff]  }
  0x68   : > { %3051 = vmatprep.subr.bf16.mxu1 %v3402_v1 }
  0x6a   : > { %3016 = vmatpush3.bf16.msra.mxu0 %v3338_v22  ;;  %v3352_v22 = vld [vmem:[%s4403_s1 + $0x1e0] sm:$0xff]  }
  0x6b   : > { %3052 = vmatpush3.bf16.msra.mxu1 %v3339_v17  ;;  %3017 = vmatprep.subr.bf16.mxu0 %v3402_v1  ;;  %v1013_v17 = vsel %vm978_vm6, %v1003_v32, %v1012_v57 }
  0x6c   : > { %2962 = vmatmul.mubr.bf16.gmra.mxu0 %v650_v6  ;;  %3053 = vmatprep.subr.bf16.mxu1 %v3402_v1  ;;  %v1020_v6 = vrot.slane %v1018_v51, 2 }
  0x6d   : > { %2998 = vmatmul.mubr.bf16.gmra.mxu1 %v822_v4  ;;  %2965 = vmatprep.mubr.msk.bf16.mxu0 %vm3403_vm0, %v3402_v1  ;;  %v1192_v4 = vsel %vm1185_vm3, %v1189_v15, %v1191_v63 }
  0x6e   : > { %3001 = vmatprep.mubr.msk.bf16.mxu1 %vm3403_vm0, %v3402_v1  ;;  %3018 = vmatpush3.bf16.msra.mxu0 %v3340_v19  ;;  %v1017_v19 = vrot.slane %v1015_v30, 1 }
  0x6f   : > { %3054 = vmatpush3.bf16.msra.mxu1 %v3342_v10  ;;  %3019 = vmatprep.subr.bf16.mxu0 %v3402_v1  ;;  %v3354_v10 = vld [vmem:[%s4403_s1 + $0x1d8] sm:$0xff]  }
  0x70   : > { %3055 = vmatprep.subr.bf16.mxu1 %v3402_v1  ;;  %v1021_v11 = vor.u32 %v1020_v6, %v1017_v19 }
  0x72   : > { %3020 = vmatpush3.bf16.msra.mxu0 %v3343_v38  ;;  %v1027_v38 = vshll.u32 %v3906_v8, 16  ;;  %v1022_v40 = vsel %vm978_vm6, %v1012_v57, %v1021_v11  ;;  %v3361_v8 = vld [vmem:[%s4403_s1 + $0x238] sm:$0xff]  }
  0x73   : > { %3056 = vmatpush3.bf16.msra.mxu1 %v3344_v39  ;;  %3077 = vmatprep.subr.bf16.mxu0 %v3402_v1  ;;  %v1193_v39 = vrot.slane %v3721_v13, 2  ;;  %v3357_v13 = vld [vmem:[%s4403_s1 + $0x188] sm:$0xff]  }
  0x74   : > { %2966 = vmatmul.mubr.bf16.gmra.mxu0 %v652_v14  ;;  %3113 = vmatprep.subr.bf16.mxu1 %v3402_v1  ;;  %v3355_v14 = vld [vmem:[%s4403_s1 + $0x190] sm:$0xff]   ;;  %v1029_v25 = vrot.slane %v1027_v38, 2 }
  0x75   : > { %3002 = vmatmul.mubr.bf16.gmra.mxu1 %v824_v62  ;;  %3021 = vmatprep.mubr.msk.bf16.mxu0 %vm3403_vm0, %v3402_v1  ;;  %v1194_v62 = vsel %vm1185_vm3, %v1191_v63, %v1193_v39 }
  0x76   : > { %3057 = vmatprep.mubr.msk.bf16.mxu1 %vm3403_vm0, %v3402_v1  ;;  %v1030_v42 = vor.u32 %v1029_v25, %v1026_v24 }
  0x78   : > { %v1031_v36 = vsel %vm978_vm6, %v1021_v11, %v1030_v42 }
  0x7c   : > { %3022 = vmatmul.mubr.bf16.vlgmr.msra.gmra.mxu0 %v995_v2  ;;  %v1196_v2 = vsel %vm1185_vm3, %v1193_v39, %v1195_v48 }
  0x7d   : > { %3058 = vmatmul.mubr.bf16.vlgmr.msra.gmra.mxu1 %v1188_v28  ;;  %3025 = vmatprep.mubr.msk.bf16.mxu0 %vm3403_vm0, %v3402_v1 }
  0x7e   : > { %3061 = vmatprep.mubr.msk.bf16.mxu1 %vm3403_vm0, %v3402_v1  ;;  %3078 = vmatpush3.bf16.msra.mxu0 %v3345_v31 }
  0x7f   : > { %3114 = vmatpush3.bf16.msra.mxu1 %v3346_v34  ;;  %3079 = vmatprep.subr.bf16.mxu0 %v3402_v1 }
  0x80   : > { %3115 = vmatprep.subr.bf16.mxu1 %v3402_v1 }
  0x82   : > { %3080 = vmatpush3.bf16.msra.mxu0 %v3347_v16 }
  0x83   : > { %3116 = vmatpush3.bf16.msra.mxu1 %v3348_v41  ;;  %3081 = vmatprep.subr.bf16.mxu0 %v3402_v1 }
  0x84   : > { %3026 = vmatmul.mubr.bf16.gmra.mxu0 %v1004_v45  ;;  %3117 = vmatprep.subr.bf16.mxu1 %v3402_v1 }
  0x85   : > { %3062 = vmatmul.mubr.bf16.gmra.mxu1 %v1190_v55  ;;  %3029 = vmatprep.mubr.msk.bf16.mxu0 %vm3403_vm0, %v3402_v1 }
  0x86   : > { %3065 = vmatprep.mubr.msk.bf16.mxu1 %vm3403_vm0, %v3402_v1  ;;  %3082 = vmatpush3.bf16.msra.mxu0 %v3349_v37  ;;  %v3371_v37 = vld [vmem:[%s4405_s3 + $0x30] sm:$0xff]  }
  0x87   : > { %3118 = vmatpush3.bf16.msra.mxu1 %v3350_v56  ;;  %3083 = vmatprep.subr.bf16.mxu0 %v3402_v1 }
  0x88   : > { %3119 = vmatprep.subr.bf16.mxu1 %v3402_v1 }
  0x8a   : > { %3084 = vmatpush3.bf16.msra.mxu0 %v3351_v5  ;;  %v3372_v5 = vld [vmem:[%s4405_s3 + $0x28] sm:$0xff]  }
  0x8b   : > { %3120 = vmatpush3.bf16.msra.mxu1 %v3352_v22  ;;  %3085 = vmatprep.subr.bf16.mxu0 %v3402_v1 }
  0x8c   : > { %3030 = vmatmul.mubr.bf16.gmra.mxu0 %v1013_v17  ;;  %3121 = vmatprep.subr.bf16.mxu1 %v3402_v1 }
  0x8d   : > { %3066 = vmatmul.mubr.bf16.gmra.mxu1 %v1192_v4  ;;  %3033 = vmatprep.mubr.msk.bf16.mxu0 %vm3403_vm0, %v3402_v1 }
  0x8e   : > { %3069 = vmatprep.mubr.msk.bf16.mxu1 %vm3403_vm0, %v3402_v1  ;;  %3086 = vmatpush3.bf16.msra.mxu0 %v3353_v12  ;;  %v3373_v12 = vld [vmem:[%s4405_s3 + $0x20] sm:$0xff]  }
  0x8f   : > { %3122 = vmatpush3.bf16.msra.mxu1 %v3354_v10  ;;  %3087 = vmatprep.subr.bf16.mxu0 %v3402_v1 }
  0x90   : > { %3123 = vmatprep.subr.bf16.mxu1 %v3402_v1 }
  0x92   : > { %3088 = vmatpush3.bf16.msra.mxu0 %v3355_v14  ;;  %v3374_v14 = vld [vmem:[%s4405_s3 + $0x18] sm:$0xff]  }
  0x93   : > { %3124 = vmatpush3.bf16.msra.mxu1 %v3356_v21  ;;  %3089 = vmatprep.subr.bf16.mxu0 %v3402_v1 }
  0x94   : > { %3034 = vmatmul.mubr.bf16.gmra.mxu0 %v1022_v40  ;;  %3125 = vmatprep.subr.bf16.mxu1 %v3402_v1 }
  0x95   : > { %3070 = vmatmul.mubr.bf16.gmra.mxu1 %v1194_v62  ;;  %3037 = vmatprep.mubr.msk.bf16.mxu0 %vm3403_vm0, %v3402_v1 }
  0x96   : > { %3073 = vmatprep.mubr.msk.bf16.mxu1 %vm3403_vm0, %v3402_v1  ;;  %3090 = vmatpush3.bf16.msra.mxu0 %v3357_v13  ;;  %v3375_v13 = vld [vmem:[%s4405_s3 + $0x10] sm:$0xff]  }
  0x97   : > { %3126 = vmatpush3.bf16.msra.mxu1 %v3358_v9  ;;  %3091 = vmatprep.subr.bf16.mxu0 %v3402_v1 }
  0x98   : > { %3127 = vmatprep.subr.bf16.mxu1 %v3402_v1 }
  0x9a   : > { %3092 = vmatpush3.bf16.msra.mxu0 %v3359_v58 }
  0x9b   : > { %3128 = vmatpush3.bf16.msra.mxu1 %v3360_v43  ;;  %3149 = vmatprep.subr.bf16.mxu0 %v3402_v1 }
  0x9c   : > { %3038 = vmatmul.mubr.bf16.gmra.mxu0 %v1031_v36  ;;  %3185 = vmatprep.subr.bf16.mxu1 %v3402_v1  ;;  %v3376_v36 = vld [vmem:[%s4405_s3 + $0x8] sm:$0xff]  }
  0x9d   : > { %3074 = vmatmul.mubr.bf16.gmra.mxu1 %v1196_v2  ;;  %3093 = vmatprep.mubr.msk.bf16.mxu0 %vm3403_vm0, %v3402_v1 }
  0x9e   : > { %3129 = vmatprep.mubr.msk.bf16.mxu1 %vm3403_vm0, %v3402_v1 }
  0xa4   : > { %3094 = vmatmul.mubr.bf16.vlgmr.msra.gmra.mxu0 %v3763_v59  ;;  %v3363_v59 = vld [vmem:[%s4403_s1 + $0x228] sm:$0xff]  }
  0xa5   : > { %3130 = vmatmul.mubr.bf16.vlgmr.msra.gmra.mxu1 %v3753_v53  ;;  %3097 = vmatprep.mubr.msk.bf16.mxu0 %vm3403_vm0, %v3402_v1  ;;  %v3364_v53 = vld [vmem:[%s4403_s1 + $0x220] sm:$0xff]  }
  0xa6   : > { %3133 = vmatprep.mubr.msk.bf16.mxu1 %vm3403_vm0, %v3402_v1  ;;  %3150 = vmatpush3.bf16.msra.mxu0 %v3361_v8 }
  0xa7   : > { %3151 = vmatprep.subr.bf16.mxu0 %v3402_v1 }
  0xaa   : > { %3152 = vmatpush3.bf16.msra.mxu0 %v3362_v26 }
  0xab   : > { %3153 = vmatprep.subr.bf16.mxu0 %v3402_v1 }
  0xac   : > { %3098 = vmatmul.mubr.bf16.gmra.mxu0 %v3774_v60  ;;  %v3365_v60 = vld [vmem:[%s4403_s1 + $0x218] sm:$0xff]  }
  0xad   : > { %3134 = vmatmul.mubr.bf16.gmra.mxu1 %v3795_v7  ;;  %3101 = vmatprep.mubr.msk.bf16.mxu0 %vm3403_vm0, %v3402_v1  ;;  %v3366_v7 = vld [vmem:[%s4403_s1 + $0x210] sm:$0xff]  }
  0xae   : > { %3137 = vmatprep.mubr.msk.bf16.mxu1 %vm3403_vm0, %v3402_v1  ;;  %3154 = vmatpush3.bf16.msra.mxu0 %v3363_v59 }
  0xaf   : > { %3155 = vmatprep.subr.bf16.mxu0 %v3402_v1 }
  0xb2   : > { %3156 = vmatpush3.bf16.msra.mxu0 %v3364_v53 }
  0xb3   : > { %3157 = vmatprep.subr.bf16.mxu0 %v3402_v1 }
  0xb4   : > { %3102 = vmatmul.mubr.bf16.gmra.mxu0 %v3786_v3  ;;  %v3368_v3 = vld [vmem:[%s4403_s1 + $0x208] sm:$0xff]  }
  0xb5   : > { %3138 = vmatmul.mubr.bf16.gmra.mxu1 %v3815_v23  ;;  %3105 = vmatprep.mubr.msk.bf16.mxu0 %vm3403_vm0, %v3402_v1  ;;  %v3369_v23 = vld [vmem:[%s4403_s1 + $0x200] sm:$0xff]  }
  0xb6   : > { %3141 = vmatprep.mubr.msk.bf16.mxu1 %vm3403_vm0, %v3402_v1  ;;  %3158 = vmatpush3.bf16.msra.mxu0 %v3365_v60 }
  0xb7   : > { %3159 = vmatprep.subr.bf16.mxu0 %v3402_v1 }
  0xba   : > { %3160 = vmatpush3.bf16.msra.mxu0 %v3366_v7  ;;  %v3377_v7 = vld [vmem:[%s4405_s3] sm:$0xff]  }
  0xbb   : > { %3161 = vmatprep.subr.bf16.mxu0 %v3402_v1 }
  0xbc   : > { %3106 = vmatmul.mubr.bf16.gmra.mxu0 %v3806_v20 }
  0xbd   : > { %3142 = vmatmul.mubr.bf16.gmra.mxu1 %v3840_v18  ;;  %3109 = vmatprep.mubr.msk.bf16.mxu0 %vm3403_vm0, %v3402_v1 }
  0xbe   : > { %3145 = vmatprep.mubr.msk.bf16.mxu1 %vm3403_vm0, %v3402_v1  ;;  %3162 = vmatpush3.bf16.msra.mxu0 %v3368_v3 }
  0xbf   : > { %3163 = vmatprep.subr.bf16.mxu0 %v3402_v1 }
  0xc2   : > { %3164 = vmatpush3.bf16.msra.mxu0 %v3369_v23 }
  0xc4   : > { %3110 = vmatmul.mubr.bf16.gmra.mxu0 %v3834_v44 }
  0xc5   : > { %3146 = vmatmul.mubr.bf16.gmra.mxu1 %v3870_v0  ;;  %3165 = vmatprep.mubr.msk.bf16.mxu0 %vm3403_vm0, %v3402_v1 }
  0xc6   : > { %3201 = vmatprep.mubr.msk.bf16.mxu1 %vm3403_vm0, %v3402_v1 }
  0xcc   : > { %3166 = vmatmul.mubr.bf16.vlgmr.msra.gmra.mxu0 %v3843_v52 }
  0xcd   : > { %3169 = vmatprep.mubr.msk.bf16.mxu0 %vm3403_vm0, %v3402_v1 }
  0xd4   : > { %3170 = vmatmul.mubr.bf16.gmra.mxu0 %v3849_v29 }
  0xd5   : > { %3173 = vmatprep.mubr.msk.bf16.mxu0 %vm3403_vm0, %v3402_v1 }
  0xdc   : > { %3174 = vmatmul.mubr.bf16.gmra.mxu0 %v3856_v61 }
  0xdd   : > { %3177 = vmatprep.mubr.msk.bf16.mxu0 %vm3403_vm0, %v3402_v1 }
  0xe4   : > { %3178 = vmatmul.mubr.bf16.gmra.mxu0 %v3859_v54 }
  0xe5   : > { %3181 = vmatprep.mubr.msk.bf16.mxu0 %vm3403_vm0, %v3402_v1 }
  0xec   : > { %v459_v20 = vpop.f32.mrf.mxu0  ;;  %3182 = vmatmul.mubr.bf16.gmra.mxu0 %v3915_v47  ;;  %v3370_v47 = vld [vmem:[%s4405_s3 + $0x38] sm:$0xff]  }
  0xed   : > { %v585_v44 = vpop.f32.mrf.mxu1  ;;  %3186 = vmatpush3.bf16.msra.mxu1 %v3370_v47 }
  0xee   : > { %v4134_v18 = vadd.f32 %v585_v44, %v459_v20  ;;  %v2879_v52 = vpop.f32.mrf.mxu0  ;;  %3187 = vmatprep.subr.bf16.mxu1 %v3402_v1 }
  0xef   : > { %v2915_v29 = vpop.f32.mrf.mxu1 }
  0xf0   : > { %v462_v0 = vpop.f32.mrf.mxu0 }
  0xf1   : > { %v588_v27 = vpop.f32.mrf.mxu1  ;;  %3188 = vmatpush3.bf16.msra.mxu1 %v3371_v37 }
  0xf2   : > { %v4136_v28 = vadd.f32 %v588_v27, %v462_v0  ;;  %v2880_v61 = vpop.f32.mrf.mxu0  ;;  %3189 = vmatprep.subr.bf16.mxu1 %v3402_v1 }
  0xf3   : > { %v2916_v31 = vpop.f32.mrf.mxu1 }
  0xf4   : > { %v467_v34 = vpop.f32.mrf.mxu0 }
  0xf5   : > { %v593_v32 = vpop.f32.mrf.mxu1  ;;  %3190 = vmatpush3.bf16.msra.mxu1 %v3372_v5 }
  0xf6   : > { %v4138_v54 = vadd.f32 %v593_v32, %v467_v34  ;;  %v2883_v33 = vpop.f32.mrf.mxu0  ;;  %3191 = vmatprep.subr.bf16.mxu1 %v3402_v1 }
  0xf7   : > { %v2919_v35 = vpop.f32.mrf.mxu1 }
  0xf8   : > { %v470_v15 = vpop.f32.mrf.mxu0 }
  0xf9   : > { %v596_v16 = vpop.f32.mrf.mxu1  ;;  %3192 = vmatpush3.bf16.msra.mxu1 %v3373_v12 }
  0xfa   : > { %v4143_v41 = vadd.f32 %v596_v16, %v470_v15  ;;  %v2884_v45 = vpop.f32.mrf.mxu0  ;;  %3193 = vmatprep.subr.bf16.mxu1 %v3402_v1 }
  0xfb   : > { %v2920_v46 = vpop.f32.mrf.mxu1 }
  0xfc   : > { %v475_v50 = vpop.f32.mrf.mxu0 }
  0xfd   : > { %v601_v55 = vpop.f32.mrf.mxu1  ;;  %3194 = vmatpush3.bf16.msra.mxu1 %v3374_v14 }
  0xfe   : > { %v4149_v56 = vadd.f32 %v601_v55, %v475_v50  ;;  %v2887_v57 = vpop.f32.mrf.mxu0  ;;  %3195 = vmatprep.subr.bf16.mxu1 %v3402_v1 }
  0xff   : > { %v2923_v30 = vpop.f32.mrf.mxu1 }
 0x100   : > { %v478_v51 = vpop.f32.mrf.mxu0 }
 0x101   : > { %v604_v63 = vpop.f32.mrf.mxu1  ;;  %3196 = vmatpush3.bf16.msra.mxu1 %v3375_v13 }
 0x102   : > { %v4155_v22 = vadd.f32 %v604_v63, %v478_v51  ;;  %v2888_v17 = vpop.f32.mrf.mxu0  ;;  %3197 = vmatprep.subr.bf16.mxu1 %v3402_v1 }
 0x103   : > { %v2924_v19 = vpop.f32.mrf.mxu1 }
 0x104   : > { %v483_v6 = vpop.f32.mrf.mxu0 }
 0x105   : > { %v609_v4 = vpop.f32.mrf.mxu1  ;;  %3198 = vmatpush3.bf16.msra.mxu1 %v3376_v36 }
 0x106   : > { %v4161_v10 = vadd.f32 %v609_v4, %v483_v6  ;;  %v2891_v11 = vpop.f32.mrf.mxu0  ;;  %3199 = vmatprep.subr.bf16.mxu1 %v3402_v1 }
 0x107   : > { %v2927_v49 = vpop.f32.mrf.mxu1 }
 0x108   : > { %v486_v38 = vpop.f32.mrf.mxu0 }
 0x109   : > { %v612_v39 = vpop.f32.mrf.mxu1  ;;  %3200 = vmatpush3.bf16.msra.mxu1 %v3377_v7 }
 0x10a   : > { %v4167_v21 = vadd.f32 %v612_v39, %v486_v38  ;;  %v2892_v40 = vpop.f32.mrf.mxu0 }
 0x10b   : > { %v2928_v24 = vpop.f32.mrf.mxu1 }
 0x10c   : > { %v491_v25 = vpop.f32.mrf.mxu0 }
 0x10d   : > { %v617_v62 = vpop.f32.mrf.mxu1 }
 0x10e   : > { %v4173_v9 = vadd.f32 %v617_v62, %v491_v25  ;;  %v2895_v42 = vpop.f32.mrf.mxu0 }
 0x10f   : > { %v2931_v48 = vpop.f32.mrf.mxu1 }
 0x110   : > { %v494_v58 = vpop.f32.mrf.mxu0 }
 0x111   : > { %v620_v43 = vpop.f32.mrf.mxu1 }
 0x112   : > { %v621_v2 = vadd.f32 %v620_v43, %v494_v58  ;;  %v2896_v8 = vpop.f32.mrf.mxu0 }
 0x113   : > { %v2932_v26 = vpop.f32.mrf.mxu1 }
 0x114   : > { %v740_v59 = vpop.f32.mrf.mxu0 }
 0x115   : > { %v779_v53 = vadd.f32 %v740_v59, %v4134_v18  ;;  %v912_v60 = vpop.f32.mrf.mxu1 }
 0x116   : > { %v2951_v3 = vpop.f32.mrf.mxu0 }
 0x117   : > { %v951_v23 = vadd.f32 %v912_v60, %v779_v53  ;;  %v2987_v20 = vpop.f32.mrf.mxu1 }
 0x118   : > { %v743_v44 = vpop.f32.mrf.mxu0 }
 0x119   : > { %v780_v52 = vadd.f32 %v743_v44, %v4136_v28  ;;  %v915_v29 = vpop.f32.mrf.mxu1 }
 0x11a   : > { %v2952_v0 = vpop.f32.mrf.mxu0 }
 0x11b   : > { %v952_v27 = vadd.f32 %v915_v29, %v780_v52  ;;  %v2988_v61 = vpop.f32.mrf.mxu1 }
 0x11c   : > { %v748_v31 = vpop.f32.mrf.mxu0 }
 0x11d   : > { %v781_v34 = vadd.f32 %v748_v31, %v4138_v54  ;;  %v920_v18 = vpop.f32.mrf.mxu1 }
 0x11e   : > { %v2955_v32 = vpop.f32.mrf.mxu0 }
 0x11f   : > { %v953_v33 = vadd.f32 %v920_v18, %v781_v34  ;;  %v2991_v35 = vpop.f32.mrf.mxu1 }
 0x120   : > { %v751_v15 = vpop.f32.mrf.mxu0 }
 0x121   : > { %v782_v16 = vadd.f32 %v751_v15, %v4143_v41  ;;  %v923_v47 = vpop.f32.mrf.mxu1 }
 0x122   : > { %v2956_v45 = vpop.f32.mrf.mxu0 }
 0x123   : > { %v954_v46 = vadd.f32 %v923_v47, %v782_v16  ;;  %v2992_v50 = vpop.f32.mrf.mxu1 }
 0x124   : > { %v756_v55 = vpop.f32.mrf.mxu0 }
 0x125   : > { %v783_v28 = vadd.f32 %v756_v55, %v4149_v56  ;;  %v928_v37 = vpop.f32.mrf.mxu1 }
 0x126   : > { %v2959_v57 = vpop.f32.mrf.mxu0 }
 0x127   : > { %v955_v30 = vadd.f32 %v928_v37, %v783_v28  ;;  %v2995_v51 = vpop.f32.mrf.mxu1 }
 0x128   : > { %v759_v63 = vpop.f32.mrf.mxu0 }
 0x129   : > { %v784_v54 = vadd.f32 %v759_v63, %v4155_v22  ;;  %v931_v5 = vpop.f32.mrf.mxu1 }
 0x12a   : > { %v2960_v17 = vpop.f32.mrf.mxu0 }
 0x12b   : > { %v956_v19 = vadd.f32 %v931_v5, %v784_v54  ;;  %v2996_v6 = vpop.f32.mrf.mxu1 }
 0x12c   : > { %v764_v4 = vpop.f32.mrf.mxu0 }
 0x12d   : > { %v785_v41 = vadd.f32 %v764_v4, %v4161_v10  ;;  %v936_v12 = vpop.f32.mrf.mxu1 }
 0x12e   : > { %v2963_v11 = vpop.f32.mrf.mxu0 }
 0x12f   : > { %v957_v49 = vadd.f32 %v936_v12, %v785_v41  ;;  %v2999_v38 = vpop.f32.mrf.mxu1 }
 0x130   : > { %v767_v39 = vpop.f32.mrf.mxu0 }
 0x131   : > { %v786_v56 = vadd.f32 %v767_v39, %v4167_v21  ;;  %v939_v14 = vpop.f32.mrf.mxu1 }
 0x132   : > { %v2964_v40 = vpop.f32.mrf.mxu0 }
 0x133   : > { %v958_v24 = vadd.f32 %v939_v14, %v786_v56  ;;  %v3000_v25 = vpop.f32.mrf.mxu1 }
 0x134   : > { %v772_v62 = vpop.f32.mrf.mxu0 }
 0x135   : > { %v787_v22 = vadd.f32 %v772_v62, %v4173_v9  ;;  %v944_v13 = vpop.f32.mrf.mxu1 }
 0x136   : > { %v2967_v42 = vpop.f32.mrf.mxu0 }
 0x137   : > { %v959_v48 = vadd.f32 %v944_v13, %v787_v22  ;;  %v3003_v58 = vpop.f32.mrf.mxu1 }
 0x138   : > { %v775_v43 = vpop.f32.mrf.mxu0 }
 0x139   : > { %v788_v10 = vadd.f32 %v775_v43, %v621_v2  ;;  %v947_v36 = vpop.f32.mrf.mxu1 }
 0x13a   : > { %v2968_v8 = vpop.f32.mrf.mxu0 }
 0x13b   : > { %v960_v26 = vadd.f32 %v947_v36, %v788_v10  ;;  %v3004_v59 = vpop.f32.mrf.mxu1 }
 0x13c   : > { %v1119_v53 = vpop.f32.mrf.mxu0 }
 0x13d   : > { %v1158_v60 = vadd.f32 %v1119_v53, %v951_v23  ;;  %v1284_v21 = vpop.f32.mrf.mxu1 }
 0x13e   : > { %v3023_v7 = vpop.f32.mrf.mxu0 }
 0x13f   : > { %v4192_v3 = vadd.f32 %v1284_v21, %v1158_v60  ;;  %v3059_v20 = vpop.f32.mrf.mxu1 }
 0x140   : > { %v1122_v44 = vpop.f32.mrf.mxu0 }
 0x141   : > { %v1159_v52 = vadd.f32 %v1122_v44, %v952_v27  ;;  %v1287_v9 = vpop.f32.mrf.mxu1 }
 0x142   : > { %v3024_v29 = vpop.f32.mrf.mxu0 }
 0x143   : > { %v4194_v0 = vadd.f32 %v1287_v9, %v1159_v52  ;;  %v3060_v61 = vpop.f32.mrf.mxu1 }
 0x144   : > { %v1127_v31 = vpop.f32.mrf.mxu0 }
 0x145   : > { %v1160_v2 = vadd.f32 %v1127_v31, %v953_v33  ;;  %v1292_v34 = vpop.f32.mrf.mxu1 }
 0x146   : > { %v3027_v18 = vpop.f32.mrf.mxu0 }
 0x147   : > { %v4196_v32 = vadd.f32 %v1292_v34, %v1160_v2  ;;  %v3063_v35 = vpop.f32.mrf.mxu1 }
 0x148   : > { %v1130_v23 = vpop.f32.mrf.mxu0 }
 0x149   : > { %v1161_v15 = vadd.f32 %v1130_v23, %v954_v46  ;;  %v1295_v16 = vpop.f32.mrf.mxu1 }
 0x14a   : > { %v3028_v47 = vpop.f32.mrf.mxu0 }
 0x14b   : > { %v4198_v45 = vadd.f32 %v1295_v16, %v1161_v15  ;;  %v3064_v50 = vpop.f32.mrf.mxu1 }
 0x14c   : > { %v1135_v27 = vpop.f32.mrf.mxu0 }
 0x14d   : > { %v1162_v55 = vadd.f32 %v1135_v27, %v955_v30  ;;  %v1300_v28 = vpop.f32.mrf.mxu1 }
 0x14e   : > { %v3031_v37 = vpop.f32.mrf.mxu0 }
 0x14f   : > { %v4200_v57 = vadd.f32 %v1300_v28, %v1162_v55  ;;  %v3067_v51 = vpop.f32.mrf.mxu1 }
 0x150   : > { %v1138_v33 = vpop.f32.mrf.mxu0 }
 0x151   : > { %v1163_v63 = vadd.f32 %v1138_v33, %v956_v19  ;;  %v1303_v54 = vpop.f32.mrf.mxu1 }
 0x152   : > { %v3032_v5 = vpop.f32.mrf.mxu0 }
 0x153   : > { %v4202_v17 = vadd.f32 %v1303_v54, %v1163_v63  ;;  %v3068_v6 = vpop.f32.mrf.mxu1 }
 0x154   : > { %v1143_v46 = vpop.f32.mrf.mxu0 }
 0x155   : > { %v1164_v4 = vadd.f32 %v1143_v46, %v957_v49  ;;  %v1308_v41 = vpop.f32.mrf.mxu1 }
 0x156   : > { %v3035_v12 = vpop.f32.mrf.mxu0 }
 0x157   : > { %v4204_v11 = vadd.f32 %v1308_v41, %v1164_v4  ;;  %v3071_v38 = vpop.f32.mrf.mxu1 }
 0x158   : > { %v1146_v30 = vpop.f32.mrf.mxu0 }
 0x159   : > { %v1165_v39 = vadd.f32 %v1146_v30, %v958_v24  ;;  %v1311_v56 = vpop.f32.mrf.mxu1 }
 0x15a   : > { %v3036_v14 = vpop.f32.mrf.mxu0 }
 0x15b   : > { %v4206_v40 = vadd.f32 %v1311_v56, %v1165_v39  ;;  %v3072_v25 = vpop.f32.mrf.mxu1 }
 0x15c   : > { %v1151_v19 = vpop.f32.mrf.mxu0 }
 0x15d   : > { %v1166_v62 = vadd.f32 %v1151_v19, %v959_v48  ;;  %v1316_v22 = vpop.f32.mrf.mxu1 }
 0x15e   : > { %v3039_v13 = vpop.f32.mrf.mxu0 }
 0x15f   : > { %v4208_v42 = vadd.f32 %v1316_v22, %v1166_v62  ;;  %v3075_v58 = vpop.f32.mrf.mxu1  ;;  %v4227_v22 = vld [vmem:[%s4404_s2] ss:$0 sm:$0xff] }
 0x160   : > { %v1154_v49 = vpop.f32.mrf.mxu0 }
 0x161   : > { %v1167_v43 = vadd.f32 %v1154_v49, %v960_v26  ;;  %v1319_v10 = vpop.f32.mrf.mxu1 }
 0x162   : > { %v3040_v36 = vpop.f32.mrf.mxu0 }
 0x163   : > { %v4210_v8 = vadd.f32 %v1319_v10, %v1167_v43  ;;  %v3076_v59 = vpop.f32.mrf.mxu1 }
 0x164   : > { %v1452_v24 = vpop.f32.mrf.mxu0 }
 0x165   : > { %v1639_v53 = vpop.f32.mrf.mxu1  ;;  %v1491_v41 = vadd.f32 %v1452_v24, %v4192_v3 }
 0x166   : > { %v3095_v60 = vpop.f32.mrf.mxu0 }
 0x167   : > { %v3131_v21 = vpop.f32.mrf.mxu1  ;;  %v1678_v56 = vadd.f32 %v1639_v53, %v1491_v41 }
 0x168   : > { %v1455_v7 = vpop.f32.mrf.mxu0 }
 0x169   : > { %v1642_v20 = vpop.f32.mrf.mxu1  ;;  %v1492_v14 = vadd.f32 %v1455_v7, %v4194_v0 }
 0x16a   : > { %v3096_v44 = vpop.f32.mrf.mxu0 }
 0x16b   : > { %v3132_v48 = vpop.f32.mrf.mxu1  ;;  %v1679_v58 = vadd.f32 %v1642_v20, %v1492_v14 }
 0x16c   : > { %v1460_v52 = vpop.f32.mrf.mxu0 }
 0x16d   : > { %v1647_v9 = vpop.f32.mrf.mxu1  ;;  %v1493_v3 = vadd.f32 %v1460_v52, %v4196_v32 }
 0x16e   : > { %v3099_v29 = vpop.f32.mrf.mxu0 }
 0x16f   : > { %v3135_v61 = vpop.f32.mrf.mxu1  ;;  %v1680_v59 = vadd.f32 %v1647_v9, %v1493_v3 }
 0x170   : > { %v1463_v31 = vpop.f32.mrf.mxu0 }
 0x171   : > { %v1650_v2 = vpop.f32.mrf.mxu1  ;;  %v1494_v0 = vadd.f32 %v1463_v31, %v4198_v45 }
 0x172   : > { %v3100_v26 = vpop.f32.mrf.mxu0 }
 0x173   : > { %v3136_v34 = vpop.f32.mrf.mxu1  ;;  %v1681_v48 = vadd.f32 %v1650_v2, %v1494_v0 }
 0x174   : > { %v1468_v18 = vpop.f32.mrf.mxu0 }
 0x175   : > { %v1655_v35 = vpop.f32.mrf.mxu1  ;;  %v1495_v20 = vadd.f32 %v1468_v18, %v4200_v57 }
 0x176   : > { %v3103_v23 = vpop.f32.mrf.mxu0 }
 0x177   : > { %v3139_v15 = vpop.f32.mrf.mxu1  ;;  %v1682_v45 = vadd.f32 %v1655_v35, %v1495_v20 }
 0x178   : > { %v1471_v16 = vpop.f32.mrf.mxu0 }
 0x179   : > { %v1658_v47 = vpop.f32.mrf.mxu1  ;;  %v1496_v9 = vadd.f32 %v1471_v16, %v4202_v17 }
 0x17a   : > { %v3104_v50 = vpop.f32.mrf.mxu0 }
 0x17b   : > { %v3140_v27 = vpop.f32.mrf.mxu1  ;;  %v1683_v18 = vadd.f32 %v1658_v47, %v1496_v9 }
 0x17c   : > { %v1476_v55 = vpop.f32.mrf.mxu0 }
 0x17d   : > { %v1663_v28 = vpop.f32.mrf.mxu1  ;;  %v1497_v50 = vadd.f32 %v1476_v55, %v4204_v11 }
 0x17e   : > { %v3107_v37 = vpop.f32.mrf.mxu0 }
 0x17f   : > { %v3143_v51 = vpop.f32.mrf.mxu1  ;;  %v1684_v17 = vadd.f32 %v1663_v28, %v1497_v50 }
 0x180   : > { %v1479_v33 = vpop.f32.mrf.mxu0 }
 0x181   : > { %v4212_v63 = vpop.f32.mrf.mxu1  ;;  %v1498_v35 = vadd.f32 %v1479_v33, %v4206_v40 }
 0x182   : > { %v3108_v54 = vpop.f32.mrf.mxu0 }
 0x183   : > { %v3144_v5 = vpop.f32.mrf.mxu1  ;;  %v1685_v55 = vadd.f32 %v4212_v63, %v1498_v35  ;;  %v3385_v35 = vld [vmem:[%s4407_s5 + $0x58] sm:$0xff]  }
 0x184   : > { %v4214_v6 = vpop.f32.mrf.mxu0 }
 0x185   : > { %v4216_v46 = vpop.f32.mrf.mxu1 }
 0x186   : > { %v3111_v4 = vpop.f32.mrf.mxu0 }
 0x187   : > { %v3147_v12 = vpop.f32.mrf.mxu1 }
 0x188   : > { %v4219_v38 = vpop.f32.mrf.mxu0 }
 0x189   : > { %v4221_v30 = vpop.f32.mrf.mxu1  ;;  %v1500_v33 = vadd.f32 %v4219_v38, %v4210_v8 }
 0x18a   : > { %v3112_v39 = vpop.f32.mrf.mxu0 }
 0x18b   : > { %v3148_v25 = vpop.f32.mrf.mxu1  ;;  %v1499_v39 = vadd.f32 %v4214_v6, %v4208_v42  ;;  %v1687_v3 = vadd.f32 %v4221_v30, %v1500_v33  ;;  %v3378_v30 = vld [vmem:[%s4407_s5] sm:$0xff]  }
 0x18c   : > { %v1804_v19 = vpop.f32.mrf.mxu0  ;;  %3231 = vmatprep.mubr.msk.bf16.mxu0 %vm2146_vm7, %v3378_v30 }
 0x18d   : > { %v1843_v62 = vadd.f32 %v1804_v19, %v1678_v56  ;;  %v1686_v40 = vadd.f32 %v4216_v46, %v1499_v39  ;;  %v3393_v39 = vld [vmem:[%s4407_s5 + $0x78] sm:$0xff]  }
 0x18e   : > { %v3167_v13 = vpop.f32.mrf.mxu0 }
 0x18f   : > { %v1860_v43 = vadd.f32 %v4227_v22, %v1843_v62 }
 0x190   : > { %v1807_v49 = vpop.f32.mrf.mxu0 }
 0x191   : > { %v1844_v10 = vadd.f32 %v1807_v49, %v1679_v58  ;;  %v1870_v60 = vmax.f32 %v1860_v43, 0.0 }
 0x192   : > { %v3168_v36 = vpop.f32.mrf.mxu0 }
 0x193   : > { %v1861_v24 = vadd.f32 %v4227_v22, %v1844_v10 }
 0x194   : > { %v1812_v53 = vpop.f32.mrf.mxu0 }
 0x195   : > { %v1871_v21 = vmax.f32 %v1861_v24, 0.0  ;;  %v1845_v7 = vadd.f32 %v1812_v53, %v1680_v59  ;;  %v3379_v24 = vld [vmem:[%s4407_s5 + $0x40] sm:$0xff]  }
 0x196   : > { %v3171_v44 = vpop.f32.mrf.mxu0 }
 0x197   : > { %v1880_v29 = vpack.c.bf16 %v1871_v21, %v1870_v60  ;;  %v1862_v52 = vadd.f32 %v4227_v22, %v1845_v7 }
 0x198   : > { %v1815_v32 = vpop.f32.mrf.mxu0 }
 0x199   : > { %v1846_v61 = vadd.f32 %v1815_v32, %v1681_v48  ;;  %3202 = vmatmul.mubr.bf16.vlgmr.msra.gmra.mxu1 %v1880_v29  ;;  %v1872_v23 = vmax.f32 %v1862_v52, 0.0 }
 0x19a   : > { %v3172_v26 = vpop.f32.mrf.mxu0  ;;  %3205 = vmatprep.mubr.msk.bf16.mxu1 %vm3403_vm0, %v3402_v1 }
 0x19b   : > { %v1863_v31 = vadd.f32 %v4227_v22, %v1846_v61 }
 0x19c   : > { %v1820_v34 = vpop.f32.mrf.mxu0 }
 0x19d   : > { %v1873_v2 = vmax.f32 %v1863_v31, 0.0  ;;  %v1847_v15 = vadd.f32 %v1820_v34, %v1682_v45 }
 0x19e   : > { %v3175_v57 = vpop.f32.mrf.mxu0 }
 0x19f   : > { %v1881_v27 = vpack.c.bf16 %v1873_v2, %v1872_v23  ;;  %v1864_v51 = vadd.f32 %v4227_v22, %v1847_v15 }
 0x1a0   : > { %v1823_v37 = vpop.f32.mrf.mxu0 }
 0x1a1   : > { %v1848_v54 = vadd.f32 %v1823_v37, %v1683_v18  ;;  %3206 = vmatmul.mubr.bf16.gmra.mxu1 %v1881_v27  ;;  %v1874_v41 = vmax.f32 %v1864_v51, 0.0  ;;  %v3380_v37 = vld [vmem:[%s4407_s5 + $0x8] sm:$0xff]  }
 0x1a2   : > { %v3176_v5 = vpop.f32.mrf.mxu0  ;;  %3209 = vmatprep.mubr.msk.bf16.mxu1 %vm3403_vm0, %v3402_v1  ;;  %v3381_v51 = vld [vmem:[%s4407_s5 + $0x48] sm:$0xff]  }
 0x1a3   : > { %v1865_v16 = vadd.f32 %v4227_v22, %v1848_v54  ;;  %v3382_v54 = vld [vmem:[%s4407_s5 + $0x10] sm:$0xff]  }
 0x1a4   : > { %v1828_v4 = vpop.f32.mrf.mxu0  ;;  %v3383_v5 = vld [vmem:[%s4407_s5 + $0x50] sm:$0xff]  }
 0x1a5   : > { %v1875_v47 = vmax.f32 %v1865_v16, 0.0  ;;  %v1849_v12 = vadd.f32 %v1828_v4, %v1684_v17  ;;  %v3384_v17 = vld [vmem:[%s4407_s5 + $0x18] sm:$0xff]   ;;  %v3386_v16 = vld [vmem:[%s4407_s5 + $0x20] sm:$0xff]  }
 0x1a6   : > { %v3179_v11 = vpop.f32.mrf.mxu0  ;;  %v3387_v4 = vld [vmem:[%s4407_s5 + $0x60] sm:$0xff]  }
 0x1a7   : > { %v1882_v56 = vpack.c.bf16 %v1875_v47, %v1874_v41  ;;  %v1866_v25 = vadd.f32 %v4227_v22, %v1849_v12  ;;  %v3388_v41 = vld [vmem:[%s4407_s5 + $0x28] sm:$0xff]   ;;  %v3390_v12 = vld [vmem:[%s4407_s5 + $0x30] sm:$0xff]  }
 0x1a8   : > { %v1831_v14 = vpop.f32.mrf.mxu0  ;;  %v3389_v47 = vld [vmem:[%s4407_s5 + $0x68] sm:$0xff]   ;;  %v3391_v11 = vld [vmem:[%s4407_s5 + $0x70] sm:$0xff]  }
 0x1a9   : > { %v1850_v19 = vadd.f32 %v1831_v14, %v1685_v55  ;;  %3210 = vmatmul.mubr.bf16.gmra.mxu1 %v1882_v56  ;;  %v1876_v13 = vmax.f32 %v1866_v25, 0.0  ;;  %v3392_v55 = vld [vmem:[%s4407_s5 + $0x38] sm:$0xff]   ;;  %v4328_v56 = vld [vmem:[%s4406_s4] ss:$0 sm:$0xff] }
 0x1aa   : > { %v3180_v28 = vpop.f32.mrf.mxu0  ;;  %3213 = vmatprep.mubr.msk.bf16.mxu1 %vm3403_vm0, %v3402_v1 }
 0x1ab   : > { %v1867_v63 = vadd.f32 %v4227_v22, %v1850_v19 }
 0x1ac   : > { %v1836_v62 = vpop.f32.mrf.mxu0 }
 0x1ad   : > { %v1877_v42 = vmax.f32 %v1867_v63, 0.0  ;;  %v1851_v6 = vadd.f32 %v1836_v62, %v1686_v40 }
 0x1ae   : > { %v3183_v58 = vpop.f32.mrf.mxu0 }
 0x1af   : > { %v1883_v49 = vpack.c.bf16 %v1877_v42, %v1876_v13  ;;  %v1868_v10 = vadd.f32 %v4227_v22, %v1851_v6 }
 0x1b0   : > { %v1839_v43 = vpop.f32.mrf.mxu0 }
 0x1b1   : > { %v1852_v36 = vadd.f32 %v1839_v43, %v1687_v3  ;;  %3214 = vmatmul.mubr.bf16.gmra.mxu1 %v1883_v49  ;;  %v1878_v46 = vmax.f32 %v1868_v10, 0.0 }
 0x1b2   : > { %v3184_v59 = vpop.f32.mrf.mxu0  ;;  %3217 = vmatprep.mubr.msk.bf16.mxu1 %vm3403_vm0, %v3402_v1 }
 0x1b3   : > { %v1869_v8 = vadd.f32 %v4227_v22, %v1852_v36 }
 0x1b5   : > { %v1879_v38 = vmax.f32 %v1869_v8, 0.0 }
 0x1b7   : > { %v1884_v0 = vpack.c.bf16 %v1879_v38, %v1878_v46 }
 0x1b9   : > { %3218 = vmatmul.mubr.bf16.gmra.mxu1 %v1884_v0 }
 0x1ba   : > { %3247 = vmatprep.mubr.msk.bf16.mxu1 %vm2146_vm7, %v3379_v24 }
 0x259   : > { %v1983_v1 = vpop.f32.mrf.mxu1 }
 0x25b   : > { %v3203_v53 = vpop.f32.mrf.mxu1 }
 0x25d   : > { %v1986_v22 = vpop.f32.mrf.mxu1 }
 0x25e   : > { %v2054_v27 = vpack.c.bf16 %v1986_v22, %v1983_v1 }
 0x25f   : > { %v3204_v60 = vpop.f32.mrf.mxu1 }
 0x261   : > { %v1991_v21 = vpop.f32.mrf.mxu1 }
 0x263   : > { %v3207_v7 = vpop.f32.mrf.mxu1 }
 0x265   : > { %v1994_v44 = vpop.f32.mrf.mxu1 }
 0x266   : > { %v2055_v50 = vpack.c.bf16 %v1994_v44, %v1991_v21 }
 0x267   : > { %v3208_v48 = vpop.f32.mrf.mxu1 }
 0x269   : > { %v1999_v20 = vpop.f32.mrf.mxu1 }
 0x26b   : > { %v3211_v29 = vpop.f32.mrf.mxu1 }
 0x26d   : > { %v2002_v32 = vpop.f32.mrf.mxu1 }
 0x26e   : > { %v2056_v18 = vpack.c.bf16 %v2002_v32, %v1999_v20 }
 0x26f   : > { %v3212_v52 = vpop.f32.mrf.mxu1 }
 0x271   : > { %v2007_v61 = vpop.f32.mrf.mxu1 }
 0x273   : > { %v3215_v26 = vpop.f32.mrf.mxu1 }
 0x275   : > { %v2010_v45 = vpop.f32.mrf.mxu1 }
 0x276   : > { %v2057_v57 = vpack.c.bf16 %v2010_v45, %v2007_v61 }
 0x277   : > { %v3216_v9 = vpop.f32.mrf.mxu1 }
 0x279   : > { %v2015_v31 = vpop.f32.mrf.mxu1 }
 0x27b   : > { %v3219_v34 = vpop.f32.mrf.mxu1 }
 0x27d   : > { %v2018_v23 = vpop.f32.mrf.mxu1 }
 0x27e   : > { %v2058_v2 = vpack.c.bf16 %v2018_v23, %v2015_v31 }
 0x27f   : > { %v3220_v15 = vpop.f32.mrf.mxu1 }
 0x280   : > { %3221 = vmatprep.subr.bf16.mxu0 %v2058_v2  ;;  %3263 = vmatprep.subr.bf16.mxu1 %v2058_v2 }
 0x281   : > { %3222 = vmatpush3.bf16.msra.mxu0 %v2058_v2  ;;  %3268 = vmatpush3.bf16.msra.mxu1 %v2058_v2 }
 0x282   : > { %3223 = vmatprep.subr.bf16.mxu0 %v2057_v57  ;;  %3264 = vmatprep.subr.bf16.mxu1 %v2057_v57 }
 0x285   : > { %3224 = vmatpush3.bf16.msra.mxu0 %v2057_v57  ;;  %3269 = vmatpush3.bf16.msra.mxu1 %v2057_v57 }
 0x286   : > { %3225 = vmatprep.subr.bf16.mxu0 %v2056_v18  ;;  %3265 = vmatprep.subr.bf16.mxu1 %v2056_v18 }
 0x289   : > { %3226 = vmatpush3.bf16.msra.mxu0 %v2056_v18  ;;  %3270 = vmatpush3.bf16.msra.mxu1 %v2056_v18 }
 0x28a   : > { %3227 = vmatprep.subr.bf16.mxu0 %v2055_v50  ;;  %3266 = vmatprep.subr.bf16.mxu1 %v2055_v50 }
 0x28d   : > { %3228 = vmatpush3.bf16.msra.mxu0 %v2055_v50  ;;  %3271 = vmatpush3.bf16.msra.mxu1 %v2055_v50 }
 0x28e   : > { %3229 = vmatprep.subr.bf16.mxu0 %v2054_v27  ;;  %3267 = vmatprep.subr.bf16.mxu1 %v2054_v27 }
 0x291   : > { %3230 = vmatpush3.bf16.msra.mxu0 %v2054_v27  ;;  %3272 = vmatpush3.bf16.msra.mxu1 %v2054_v27 }
 0x294   : > { %3232 = vmatmul.mubr.msk.bf16.vlgmr.msra.gmra.mxu0 %vm2146_vm7, %v3380_v37  ;;  %3248 = vmatmul.mubr.msk.bf16.vlgmr.msra.gmra.mxu1 %vm2146_vm7, %v3381_v51 }
 0x295   : > { %3235 = vmatprep.mubr.msk.bf16.mxu0 %vm2146_vm7, %v3382_v54  ;;  %3251 = vmatprep.mubr.msk.bf16.mxu1 %vm2146_vm7, %v3383_v5 }
 0x29c   : > { %3236 = vmatmul.mubr.msk.bf16.gmra.mxu0 %vm2146_vm7, %v3384_v17  ;;  %3252 = vmatmul.mubr.msk.bf16.gmra.mxu1 %vm2146_vm7, %v3385_v35 }
 0x29d   : > { %3239 = vmatprep.mubr.msk.bf16.mxu0 %vm2146_vm7, %v3386_v16  ;;  %3255 = vmatprep.mubr.msk.bf16.mxu1 %vm2146_vm7, %v3387_v4 }
 0x2a4   : > { %3240 = vmatmul.mubr.msk.bf16.gmra.mxu0 %vm2146_vm7, %v3388_v41  ;;  %3256 = vmatmul.mubr.msk.bf16.gmra.mxu1 %vm2146_vm7, %v3389_v47 }
 0x2a5   : > { %3243 = vmatprep.mubr.msk.bf16.mxu0 %vm2146_vm7, %v3390_v12  ;;  %3259 = vmatprep.mubr.msk.bf16.mxu1 %vm2146_vm7, %v3391_v11 }
 0x2ac   : > { %3244 = vmatmul.mubr.msk.bf16.gmra.mxu0 %vm2146_vm7, %v3392_v55  ;;  %3260 = vmatmul.mubr.msk.bf16.gmra.mxu1 %vm2146_vm7, %v3393_v39 }
 0x354   : > { %v3233_v14 = vpop.f32.mrf.mxu0  ;;  %v3249_v25 = vpop.f32.mrf.mxu1 }
 0x355   : > { %v2238_v19 = vadd.f32 %v3233_v14, %v4328_v56  ;;  %v2302_v28 = vadd.f32 %v3249_v25, %v4328_v56 }
 0x356   : > { %v2229_v40 = vpop.f32.mrf.mxu0  ;;  %v2293_v33 = vpop.f32.mrf.mxu1 }
 0x357   : > { %2358 = vst [vmem:[%s4333_s30 + $0x10] sm:$0xff] %v2238_v19  ;;  %2374 = vst [vmem:[%s4333_s30 + $0x90] sm:$0xff] %v2302_v28  ;;  %v2230_v63 = vadd.f32 %v4328_v56, %v2229_v40  ;;  %v2294_v62 = vadd.f32 %v4328_v56, %v2293_v33 }
 0x358   : > { %v3234_v13 = vpop.f32.mrf.mxu0  ;;  %v3250_v42 = vpop.f32.mrf.mxu1 }
 0x359   : > { %2356 = vst [vmem:[%s4333_s30] sm:$0xff] %v2230_v63  ;;  %2372 = vst [vmem:[%s4333_s30 + $0x80] sm:$0xff] %v2294_v62  ;;  %v2241_v6 = vadd.f32 %v3234_v13, %v4328_v56  ;;  %v2305_v58 = vadd.f32 %v3250_v42, %v4328_v56 }
 0x35a   : > { %v2232_v3 = vpop.f32.mrf.mxu0  ;;  %v2296_v49 = vpop.f32.mrf.mxu1 }
 0x35b   : > { %2359 = vst [vmem:[%s4333_s30 + $0x18] sm:$0xff] %v2241_v6  ;;  %2375 = vst [vmem:[%s4333_s30 + $0x98] sm:$0xff] %v2305_v58  ;;  %v2233_v43 = vadd.f32 %v4328_v56, %v2232_v3  ;;  %v2297_v10 = vadd.f32 %v4328_v56, %v2296_v49 }
 0x35c   : > { %v3237_v36 = vpop.f32.mrf.mxu0  ;;  %v3253_v59 = vpop.f32.mrf.mxu1 }
 0x35d   : > { %2357 = vst [vmem:[%s4333_s30 + $0x8] sm:$0xff] %v2233_v43  ;;  %2373 = vst [vmem:[%s4333_s30 + $0x88] sm:$0xff] %v2297_v10  ;;  %v2254_v8 = vadd.f32 %v3237_v36, %v4328_v56  ;;  %v2318_v46 = vadd.f32 %v3253_v59, %v4328_v56 }
 0x35e   : > { %v2245_v38 = vpop.f32.mrf.mxu0  ;;  %v2309_v0 = vpop.f32.mrf.mxu1 }
 0x35f   : > { %2362 = vst [vmem:[%s4333_s30 + $0x30] sm:$0xff] %v2254_v8  ;;  %2378 = vst [vmem:[%s4333_s30 + $0xb0] sm:$0xff] %v2318_v46  ;;  %v2246_v30 = vadd.f32 %v4328_v56, %v2245_v38  ;;  %v2310_v24 = vadd.f32 %v4328_v56, %v2309_v0 }
 0x360   : > { %v3238_v1 = vpop.f32.mrf.mxu0  ;;  %v3254_v53 = vpop.f32.mrf.mxu1 }
 0x361   : > { %2360 = vst [vmem:[%s4333_s30 + $0x20] sm:$0xff] %v2246_v30  ;;  %2376 = vst [vmem:[%s4333_s30 + $0xa0] sm:$0xff] %v2310_v24  ;;  %v2257_v22 = vadd.f32 %v3238_v1, %v4328_v56  ;;  %v2321_v60 = vadd.f32 %v3254_v53, %v4328_v56 }
 0x362   : > { %v2248_v21 = vpop.f32.mrf.mxu0  ;;  %v2312_v7 = vpop.f32.mrf.mxu1 }
 0x363   : > { %2363 = vst [vmem:[%s4333_s30 + $0x38] sm:$0xff] %v2257_v22  ;;  %2379 = vst [vmem:[%s4333_s30 + $0xb8] sm:$0xff] %v2321_v60  ;;  %v2249_v44 = vadd.f32 %v4328_v56, %v2248_v21  ;;  %v2313_v48 = vadd.f32 %v4328_v56, %v2312_v7 }
 0x364   : > { %v3241_v20 = vpop.f32.mrf.mxu0  ;;  %v3257_v29 = vpop.f32.mrf.mxu1 }
 0x365   : > { %2361 = vst [vmem:[%s4333_s30 + $0x28] sm:$0xff] %v2249_v44  ;;  %2377 = vst [vmem:[%s4333_s30 + $0xa8] sm:$0xff] %v2313_v48  ;;  %v2270_v32 = vadd.f32 %v3241_v20, %v4328_v56  ;;  %v2334_v52 = vadd.f32 %v3257_v29, %v4328_v56 }
 0x366   : > { %v2261_v61 = vpop.f32.mrf.mxu0  ;;  %v2325_v26 = vpop.f32.mrf.mxu1 }
 0x367   : > { %2366 = vst [vmem:[%s4333_s30 + $0x50] sm:$0xff] %v2270_v32  ;;  %2382 = vst [vmem:[%s4333_s30 + $0xd0] sm:$0xff] %v2334_v52  ;;  %v2262_v45 = vadd.f32 %v4328_v56, %v2261_v61  ;;  %v2326_v9 = vadd.f32 %v4328_v56, %v2325_v26 }
 0x368   : > { %v3242_v31 = vpop.f32.mrf.mxu0  ;;  %v3258_v34 = vpop.f32.mrf.mxu1 }
 0x369   : > { %2364 = vst [vmem:[%s4333_s30 + $0x40] sm:$0xff] %v2262_v45  ;;  %2380 = vst [vmem:[%s4333_s30 + $0xc0] sm:$0xff] %v2326_v9  ;;  %v2273_v23 = vadd.f32 %v3242_v31, %v4328_v56  ;;  %v2337_v2 = vadd.f32 %v3258_v34, %v4328_v56 }
 0x36a   : > { %v2264_v15 = vpop.f32.mrf.mxu0  ;;  %v2328_v57 = vpop.f32.mrf.mxu1 }
 0x36b   : > { %2367 = vst [vmem:[%s4333_s30 + $0x58] sm:$0xff] %v2273_v23  ;;  %2383 = vst [vmem:[%s4333_s30 + $0xd8] sm:$0xff] %v2337_v2  ;;  %v2265_v18 = vadd.f32 %v4328_v56, %v2264_v15  ;;  %v2329_v50 = vadd.f32 %v4328_v56, %v2328_v57 }
 0x36c   : > { %v3245_v27 = vpop.f32.mrf.mxu0  ;;  %v3261_v37 = vpop.f32.mrf.mxu1 }
 0x36d   : > { %2365 = vst [vmem:[%s4333_s30 + $0x48] sm:$0xff] %v2265_v18  ;;  %2381 = vst [vmem:[%s4333_s30 + $0xc8] sm:$0xff] %v2329_v50  ;;  %v2286_v51 = vadd.f32 %v3245_v27, %v4328_v56  ;;  %v2350_v54 = vadd.f32 %v3261_v37, %v4328_v56 }
 0x36e   : > { %v2277_v5 = vpop.f32.mrf.mxu0  ;;  %v2341_v17 = vpop.f32.mrf.mxu1 }
 0x36f   : > { %2370 = vst [vmem:[%s4333_s30 + $0x70] sm:$0xff] %v2286_v51  ;;  %2386 = vst [vmem:[%s4333_s30 + $0xf0] sm:$0xff] %v2350_v54  ;;  %v2278_v35 = vadd.f32 %v4328_v56, %v2277_v5  ;;  %v2342_v16 = vadd.f32 %v4328_v56, %v2341_v17 }
 0x370   : > { %v3246_v4 = vpop.f32.mrf.mxu0  ;;  %v3262_v41 = vpop.f32.mrf.mxu1 }
 0x371   : > { %2368 = vst [vmem:[%s4333_s30 + $0x60] sm:$0xff] %v2278_v35  ;;  %2384 = vst [vmem:[%s4333_s30 + $0xe0] sm:$0xff] %v2342_v16  ;;  %v2289_v47 = vadd.f32 %v3246_v4, %v4328_v56  ;;  %v2353_v12 = vadd.f32 %v3262_v41, %v4328_v56 }
 0x372   : > { %v2280_v11 = vpop.f32.mrf.mxu0  ;;  %v2344_v55 = vpop.f32.mrf.mxu1 }
 0x373   : > { %2371 = vst [vmem:[%s4333_s30 + $0x78] sm:$0xff] %v2289_v47  ;;  %2387 = vst [vmem:[%s4333_s30 + $0xf8] sm:$0xff] %v2353_v12  ;;  %v2281_v39 = vadd.f32 %v4328_v56, %v2280_v11  ;;  %v2345_v14 = vadd.f32 %v4328_v56, %v2344_v55 }
 0x375   : > { %2369 = vst [vmem:[%s4333_s30 + $0x68] sm:$0xff] %v2281_v39  ;;  %2385 = vst [vmem:[%s4333_s30 + $0xe8] sm:$0xff] %v2345_v14 }
 0x376 PF: > { %s16_s21 = sadd.s32 1, %s3400_s21  }
 0x377   : > { %p13_p4 = scmp.ge.s32.totalorder %s16_s21, 4  }
 0x379   :  { %15 = sbr.rel (!%p13_p4) target bundleno = 1 (0x1), region = 82 }

// kernel: fcn_model_forward.5
= control target key start
LH: loop header
LB: loop body
LE: loop exit
PB: predicated region body
PF: predicated region fallthrough
CT: control target
= control target key end

     0   :  { %s2630_s12 = smov 0   ;;  %s3192_s0 = inlined_call_operand.vmem [shape: bf16[2,30,512], index: 0, kind: input, shape index: {}]   ;;  %s3193_s1 = inlined_call_operand.vmem [shape: bf16[4,512,128], index: 1, kind: input, shape index: {}]   ;;  %s3194_s2 = inlined_call_operand.vmem [shape: f32[1,128], index: 2, kind: input, shape index: {}]   ;;  %s3195_s3 = inlined_call_operand.vmem [shape: bf16[2,20,128], index: 3, kind: output, shape index: {}]  }
   0x1 LB: > { %s1872_s13 = sadd.s32 4294967295, %s2608_s12   ;;  %p1876_p0 = scmp.ge.s32.totalorder %s2608_s12, 1  ;;  %s2608_s12 = sphi %s2630_s12, %s13_s12  }
   0x2   : > { %p137_p1 = scmp.lt.s32.totalorder %s2608_s12, 3 }
   0x4   : > { %p138_p2 = pnand %p1876_p0, %p137_p1 }
   0x5   : > { %p161_p3 = scmp.lt.s32.totalorder (!%p138_p2), %s1872_s13, 1 }
   0x6   : > { %141 = sbr.rel (%p138_p2) target bundleno = 359 (0x167), region = 32 }
   0xb   : > { %v2460_v0 = vld [vmem:[%s3193_s1 + $0x178] sm:$0xff]   ;;  %v2464_v4 = vld [vmem:[%s3193_s1 + $0x170] sm:$0xff]   ;;  %v2468_v8 = vld [vmem:[%s3193_s1 + $0x168] sm:$0xff]   ;;  %s3197_s13 = smov (!%p161_p3, %s1872_s13), 1  ;;  %vm335_vm0 = vsmask.f32 7424 }
   0xc   : > { %v2461_v1 = vld [vmem:[%s3193_s1 + $0x1f8] sm:$0xff]   ;;  %2227 = vmatprep.subr.bf16.mxu0 %v2460_v0  ;;  %v2465_v5 = vld [vmem:[%s3193_s1 + $0x1f0] sm:$0xff]   ;;  %v2469_v9 = vld [vmem:[%s3193_s1 + $0x1e8] sm:$0xff]   ;;  %s2218_s18 = sshll.u32 %s3197_s13, 6  ;;  %vm1063_vm1 = vsmask.f32 5376 }
   0xd   : > { %v2462_v2 = vld [vmem:[%s3193_s1 + $0x138] sm:$0xff]   ;;  %2255 = vmatprep.subr.bf16.mxu1 %v2461_v1  ;;  %v2466_v6 = vld [vmem:[%s3193_s1 + $0x130] sm:$0xff]   ;;  %v2470_v10 = vld [vmem:[%s3193_s1 + $0x128] sm:$0xff]   ;;  %s2738_s27 = scalar_lea.vmem %s3192_s0, %s2218_s18  ;;  %vm1476_vm2 = vcmask 1044480   ;;  %s2451_s4 = smul.u32 12, %s3197_s13 }
   0xe   : > { %v2463_v3 = vld [vmem:[%s3193_s1 + $0x1b8] sm:$0xff]   ;;  %2228 = vmatpush3.bf16.msra.mxu0 %v2462_v2  ;;  %v2467_v7 = vld [vmem:[%s3193_s1 + $0x1b0] sm:$0xff]   ;;  %v2471_v11 = vld [vmem:[%s3193_s1 + $0x1a8] sm:$0xff]  }
   0xf   : > { %2256 = vmatpush3.bf16.msra.mxu1 %v2463_v3  ;;  %2229 = vmatprep.subr.bf16.mxu0 %v2464_v4  ;;  %v2472_v12 = vld [vmem:[%s3193_s1 + $0x160] sm:$0xff]   ;;  %v2476_v16 = vld [vmem:[%s3193_s1 + $0x158] sm:$0xff]   ;;  %v2480_v20 = vld [vmem:[%s3193_s1 + $0x150] sm:$0xff]   ;;  %s170_s7 = scalar_lea.vmem %s3195_s3, %s2451_s4 }
  0x10   : > { %2257 = vmatprep.subr.bf16.mxu1 %v2465_v5  ;;  %v2473_v13 = vld [vmem:[%s3193_s1 + $0x1e0] sm:$0xff]   ;;  %v2477_v17 = vld [vmem:[%s3193_s1 + $0x1d8] sm:$0xff]   ;;  %v2481_v21 = vld [vmem:[%s3193_s1 + $0x1d0] sm:$0xff]  }
  0x11   : > { %v2474_v14 = vld [vmem:[%s3193_s1 + $0x120] sm:$0xff]   ;;  %v2478_v18 = vld [vmem:[%s3193_s1 + $0x118] sm:$0xff]   ;;  %v2482_v22 = vld [vmem:[%s3193_s1 + $0x110] sm:$0xff]  }
  0x12   : > { %2230 = vmatpush3.bf16.msra.mxu0 %v2466_v6  ;;  %v2475_v15 = vld [vmem:[%s3193_s1 + $0x1a0] sm:$0xff]   ;;  %v2479_v19 = vld [vmem:[%s3193_s1 + $0x198] sm:$0xff]   ;;  %v2483_v23 = vld [vmem:[%s3193_s1 + $0x190] sm:$0xff]  }
  0x13   : > { %2258 = vmatpush3.bf16.msra.mxu1 %v2467_v7  ;;  %2231 = vmatprep.subr.bf16.mxu0 %v2468_v8  ;;  %v2484_v24 = vld [vmem:[%s3193_s1 + $0x148] sm:$0xff]   ;;  %v2488_v28 = vld [vmem:[%s3193_s1 + $0x140] sm:$0xff]   ;;  %v2502_v44 = vld [vmem:[%s3193_s1 + $0x78] sm:$0xff]  }
  0x14   : > { %2259 = vmatprep.subr.bf16.mxu1 %v2469_v9  ;;  %v2485_v25 = vld [vmem:[%s3193_s1 + $0x1c8] sm:$0xff]   ;;  %v2489_v29 = vld [vmem:[%s3193_s1 + $0x1c0] sm:$0xff]   ;;  %v2503_v56 = vld [vmem:[%s3193_s1 + $0xf8] sm:$0xff]  }
  0x15   : > { %v2486_v26 = vld [vmem:[%s3193_s1 + $0x108] sm:$0xff]   ;;  %v2490_v30 = vld [vmem:[%s3193_s1 + $0x100] sm:$0xff]   ;;  %v2504_v61 = vld [vmem:[%s3193_s1 + $0x38] sm:$0xff]  }
  0x16   : > { %2232 = vmatpush3.bf16.msra.mxu0 %v2470_v10  ;;  %v2487_v27 = vld [vmem:[%s3193_s1 + $0x188] sm:$0xff]   ;;  %v2491_v31 = vld [vmem:[%s3193_s1 + $0x180] sm:$0xff]   ;;  %v2505_v9 = vld [vmem:[%s3193_s1 + $0xb8] sm:$0xff]  }
  0x17   : > { %2260 = vmatpush3.bf16.msra.mxu1 %v2471_v11  ;;  %2233 = vmatprep.subr.bf16.mxu0 %v2472_v12  ;;  %v2747_v32 = vld [vmem:[%s2738_s27 + $0x20] sm:$0xff]  ;;  %v2761_v36 = vld [vmem:[%s2738_s27 + $0x28] sm:$0xff]  ;;  %v2506_v10 = vld [vmem:[%s3193_s1 + $0x70] sm:$0xff]  }
  0x18   : > { %2261 = vmatprep.subr.bf16.mxu1 %v2473_v13  ;;  %v2750_v33 = vld [vmem:[%s2738_s27 + $0x4] ss:$16 sps:$4 sm:$0xff]   ;;  %v2754_v34 = vcombine.high %v2747_v32, %v2747_v32  ;;  %v2758_v35 = vcombine.low %v2747_v32, %v2747_v32  ;;  %v2764_v37 = vld [vmem:[%s2738_s27 + $0xc] ss:$16 sps:$4 sm:$0xff]   ;;  %v2767_v38 = vld [vmem:[%s2738_s27] ss:$16 sps:$4 sm:$0xff]   ;;  %v2774_v42 = vcombine.high %v2761_v36, %v2761_v36  ;;  %v2794_v55 = vcombine.low %v2761_v36, %v2761_v36 }
  0x19   : > { %v349_v39 = vshrl.u32 %v2750_v33, 16  ;;  %v351_v40 = vshll.u32 %v2750_v33, 16  ;;  %v2777_v43 = vld [vmem:[%s2738_s27 + $0x8] ss:$16 sps:$4 sm:$0xff]   ;;  %v373_v45 = vshrl.u32 %v2764_v37, 16  ;;  %v375_v46 = vshll.u32 %v2764_v37, 16 }
  0x1a   : > { %2234 = vmatpush3.bf16.msra.mxu0 %v2474_v14  ;;  %v356_v41 = vshll.u32 %v2754_v34, 16  ;;  %v337_v47 = vshrl.u32 %v2767_v38, 16  ;;  %v339_v48 = vshll.u32 %v2767_v38, 16  ;;  %v380_v51 = vshll.u32 %v2774_v42, 16  ;;  %v2507_v13 = vld [vmem:[%s3193_s1 + $0xf0] sm:$0xff]  }
  0x1b   : > { %2262 = vmatpush3.bf16.msra.mxu1 %v2475_v15  ;;  %2235 = vmatprep.subr.bf16.mxu0 %v2476_v16  ;;  %v353_v49 = vrot.slane %v351_v40, 1  ;;  %v344_v52 = vshll.u32 %v2758_v35, 16  ;;  %v377_v53 = vrot.slane %v375_v46, 1  ;;  %v361_v60 = vshrl.u32 %v2777_v43, 16  ;;  %v2508_v15 = vld [vmem:[%s3193_s1 + $0x30] sm:$0xff]  }
  0x1c   : > { %2263 = vmatprep.subr.bf16.mxu1 %v2477_v17  ;;  %v358_v50 = vrot.slane %v356_v41, 1  ;;  %v341_v54 = vrot.slane %v339_v48, 1  ;;  %v382_v58 = vrot.slane %v380_v51, 1  ;;  %v363_v0 = vshll.u32 %v2777_v43, 16  ;;  %v2518_v51 = vld [vmem:[%s3193_s1 + $0x58] sm:$0xff]  }
  0x1d   : > { %v354_v57 = vor.u32 %v353_v49, %v349_v39  ;;  %v346_v59 = vrot.slane %v344_v52, 1  ;;  %v378_v62 = vor.u32 %v377_v53, %v373_v45  ;;  %v368_v1 = vshll.u32 %v2794_v55, 16  ;;  %v2517_v49 = vld [vmem:[%s3193_s1 + $0xa0] sm:$0xff]   ;;  %v2519_v52 = vld [vmem:[%s3193_s1 + $0xd8] sm:$0xff]  }
  0x1e   : > { %2236 = vmatpush3.bf16.msra.mxu0 %v2478_v18  ;;  %v342_v63 = vor.u32 %v341_v54, %v337_v47  ;;  %v2806_v3 = vrot.slane %v337_v47, 2  ;;  %v2808_v4 = vrot.slane %v361_v60, 2  ;;  %v365_v7 = vrot.slane %v363_v0, 1  ;;  %v2516_v47 = vld [vmem:[%s3193_s1 + $0x20] sm:$0xff]   ;;  %v2520_v53 = vld [vmem:[%s3193_s1 + $0x18] sm:$0xff]  }
  0x1f   : > { %2264 = vmatpush3.bf16.msra.mxu1 %v2479_v19  ;;  %2237 = vmatprep.subr.bf16.mxu0 %v2480_v20  ;;  %v359_v2 = vsel %vm335_vm0, %v354_v57, %v358_v50  ;;  %v383_v5 = vsel %vm335_vm0, %v378_v62, %v382_v58  ;;  %v370_v8 = vrot.slane %v368_v1, 1  ;;  %v387_v11 = vshrl.u32 %v2754_v34, 16  ;;  %v2509_v19 = vld [vmem:[%s3193_s1 + $0xb0] sm:$0xff]   ;;  %v2521_v54 = vld [vmem:[%s3193_s1 + $0x98] sm:$0xff]   ;;  %v2528_v62 = vld [vmem:[%s3193_s1 + $0x8] sm:$0xff]  }
  0x20   : > { %2265 = vmatprep.subr.bf16.mxu1 %v2481_v21  ;;  %628 = vmatprep.mubr.bf16.mxu0 %v359_v2  ;;  %v347_v6 = vsel %vm335_vm0, %v342_v63, %v346_v59  ;;  %v366_v12 = vor.u32 %v365_v7, %v361_v60  ;;  %v393_v14 = vshrl.u32 %v2774_v42, 16  ;;  %v384_v17 = vshrl.u32 %v2758_v35, 16  ;;  %v2523_v57 = vld [vmem:[%s3193_s1 + $0xd0] sm:$0xff]   ;;  %v2526_v60 = vld [vmem:[%s3193_s1 + $0x48] sm:$0xff]   ;;  %v2531_v1 = vld [vmem:[%s3193_s1 + $0xc0] sm:$0xff]  }
  0x21   : > { %676 = vmatprep.mubr.bf16.mxu1 %v383_v5  ;;  %v389_v16 = vor.u32 %v387_v11, %v358_v50  ;;  %v390_v21 = vshrl.u32 %v2794_v55, 16  ;;  %v2861_v41 = vrot.slane %v339_v48, 3  ;;  %v2529_v63 = vld [vmem:[%s3193_s1 + $0x88] sm:$0xff]   ;;  %v2532_v2 = vld [vmem:[%s3193_s1] sm:$0xff]   ;;  %v2535_v7 = vld [vmem:[%s3193_s1 + $0x2f8] sm:$0xff]  }
  0x22   : > { %2238 = vmatpush3.bf16.msra.mxu0 %v2482_v22  ;;  %v371_v18 = vsel %vm335_vm0, %v366_v12, %v370_v8  ;;  %v395_v20 = vor.u32 %v393_v14, %v382_v58  ;;  %v2510_v22 = vld [vmem:[%s3193_s1 + $0x68] sm:$0xff]   ;;  %v2524_v58 = vld [vmem:[%s3193_s1 + $0x10] sm:$0xff]   ;;  %v2533_v5 = vld [vmem:[%s3193_s1 + $0x80] sm:$0xff]  }
  0x23   : > { %2266 = vmatpush3.bf16.msra.mxu1 %v2483_v23  ;;  %2239 = vmatprep.subr.bf16.mxu0 %v2484_v24  ;;  %v386_v23 = vor.u32 %v384_v17, %v346_v59  ;;  %v2835_v24 = vrot.slane %v349_v39, 2  ;;  %v2514_v39 = vld [vmem:[%s3193_s1 + $0x60] sm:$0xff]   ;;  %v1066_v48 = vor.u32 %v2861_v41, %v2806_v3  ;;  %v2525_v59 = vld [vmem:[%s3193_s1 + $0x90] sm:$0xff]   ;;  %v2542_v14 = vld [vmem:[%s3193_s1 + $0x268] sm:$0xff]  }
  0x24   : > { %2267 = vmatprep.subr.bf16.mxu1 %v2485_v25  ;;  %v2511_v25 = vld [vmem:[%s3193_s1 + $0xe8] sm:$0xff]   ;;  %v2539_v11 = vld [vmem:[%s3193_s1 + $0x2f0] sm:$0xff]   ;;  %v2546_v17 = vld [vmem:[%s3193_s1 + $0x260] sm:$0xff]  }
  0x25   : > { %v2540_v12 = vld [vmem:[%s3193_s1 + $0x230] sm:$0xff]   ;;  %v2578_v3 = vld [vmem:[%s3193_s1 + $0x368] sm:$0xff]  }
  0x26   : > { %2240 = vmatpush3.bf16.msra.mxu0 %v2486_v26  ;;  %v2840_v26 = vrot.slane %v351_v40, 3  ;;  %v392_v40 = vor.u32 %v390_v21, %v370_v8  ;;  %v2536_v8 = vld [vmem:[%s3193_s1 + $0x238] sm:$0xff]   ;;  %v2580_v41 = vld [vmem:[%s3193_s1 + $0x328] sm:$0xff]  }
  0x27   : > { %2268 = vmatpush3.bf16.msra.mxu1 %v2487_v27  ;;  %2241 = vmatprep.subr.bf16.mxu0 %v2488_v28  ;;  %v2512_v27 = vld [vmem:[%s3193_s1 + $0x28] sm:$0xff]   ;;  %v2845_v28 = vrot.slane %v373_v45, 2  ;;  %v2552_v21 = vld [vmem:[%s3193_s1 + $0x218] sm:$0xff]  }
  0x28   : > { %2269 = vmatprep.subr.bf16.mxu1 %v2489_v29  ;;  %v2513_v29 = vld [vmem:[%s3193_s1 + $0xa8] sm:$0xff]  }
  0x2a   : > { %2242 = vmatpush3.bf16.msra.mxu0 %v2490_v30  ;;  %v1078_v30 = vor.u32 %v2840_v26, %v2835_v24  ;;  %v2576_v26 = vld [vmem:[%s3193_s1 + $0x330] sm:$0xff]  }
  0x2b   : > { %2270 = vmatpush3.bf16.msra.mxu1 %v2491_v31  ;;  %2283 = vmatprep.subr.bf16.mxu0 %v2502_v44  ;;  %v2854_v31 = vrot.slane %v375_v46, 3  ;;  %v2515_v44 = vld [vmem:[%s3193_s1 + $0xe0] sm:$0xff]   ;;  %v2868_v46 = vrot.slane %v363_v0, 3 }
  0x2c   : > { %2311 = vmatprep.subr.bf16.mxu1 %v2503_v56  ;;  %v2522_v56 = vld [vmem:[%s3193_s1 + $0x50] sm:$0xff]   ;;  %v2530_v0 = vld [vmem:[%s3193_s1 + $0x40] sm:$0xff]  }
  0x2d   : > { %629 = vmatmul.mubr.bf16.vlgmr.msra.gmra.mxu0 %v347_v6  ;;  %v1102_v45 = vor.u32 %v2854_v31, %v2845_v28  ;;  %v1090_v50 = vor.u32 %v2868_v46, %v2808_v4  ;;  %v2534_v6 = vld [vmem:[%s3193_s1 + $0x278] sm:$0xff]   ;;  %v2577_v28 = vld [vmem:[%s3193_s1 + $0x3b0] sm:$0xff]   ;;  %v1480_v4 = vrot.slane %v2750_v33, 3  ;;  %v1486_v31 = vrot.slane %v2764_v37, 3 }
  0x2e   : > { %2284 = vmatpush3.bf16.msra.mxu0 %v2504_v61  ;;  %677 = vmatmul.mubr.bf16.vlgmr.msra.gmra.mxu1 %v371_v18  ;;  %v2527_v61 = vld [vmem:[%s3193_s1 + $0xc8] sm:$0xff]   ;;  %v2547_v18 = vld [vmem:[%s3193_s1 + $0x2e0] sm:$0xff]  }
  0x2f   : > { %2285 = vmatprep.subr.bf16.mxu0 %v2506_v10  ;;  %636 = vmatprep.mubr.bf16.mxu0 %v389_v16  ;;  %v2538_v10 = vld [vmem:[%s3193_s1 + $0x270] sm:$0xff]   ;;  %v2544_v16 = vld [vmem:[%s3193_s1 + $0x228] sm:$0xff]  }
  0x30   : > { %2312 = vmatpush3.bf16.msra.mxu1 %v2505_v9  ;;  %684 = vmatprep.mubr.bf16.mxu1 %v395_v20  ;;  %v2537_v9 = vld [vmem:[%s3193_s1 + $0x2b8] sm:$0xff]  }
  0x31   : > { %2313 = vmatprep.subr.bf16.mxu1 %v2507_v13  ;;  %v2541_v13 = vld [vmem:[%s3193_s1 + $0x2b0] sm:$0xff]   ;;  %v2551_v20 = vld [vmem:[%s3193_s1 + $0x2d8] sm:$0xff]  }
  0x32   : > { %2286 = vmatpush3.bf16.msra.mxu0 %v2508_v15  ;;  %v2543_v15 = vld [vmem:[%s3193_s1 + $0x2e8] sm:$0xff]  }
  0x33   : > { %2287 = vmatprep.subr.bf16.mxu0 %v2510_v22  ;;  %v2554_v22 = vld [vmem:[%s3193_s1 + $0x250] sm:$0xff]  }
  0x34   : > { %2314 = vmatpush3.bf16.msra.mxu1 %v2509_v19  ;;  %v2550_v19 = vld [vmem:[%s3193_s1 + $0x258] sm:$0xff]  }
  0x35   : > { %637 = vmatmul.mubr.bf16.gmra.mxu0 %v386_v23  ;;  %2315 = vmatprep.subr.bf16.mxu1 %v2511_v25  ;;  %v2555_v23 = vld [vmem:[%s3193_s1 + $0x2d0] sm:$0xff]  }
  0x36   : > { %2288 = vmatpush3.bf16.msra.mxu0 %v2512_v27  ;;  %924 = vmatprep.mubr.bf16.mxu0 %v2750_v33  ;;  %v2556_v25 = vld [vmem:[%s3193_s1 + $0x210] sm:$0xff]   ;;  %v2581_v33 = vld [vmem:[%s3193_s1 + $0x3a8] sm:$0xff]  }
  0x37   : > { %2289 = vmatprep.subr.bf16.mxu0 %v2514_v39  ;;  %685 = vmatmul.mubr.bf16.gmra.mxu1 %v392_v40  ;;  %v2557_v27 = vld [vmem:[%s3193_s1 + $0x290] sm:$0xff]   ;;  %v2559_v39 = vld [vmem:[%s3193_s1 + $0x2c8] sm:$0xff]  }
  0x38   : > { %2316 = vmatpush3.bf16.msra.mxu1 %v2513_v29  ;;  %972 = vmatprep.mubr.bf16.mxu1 %v2764_v37  ;;  %v2558_v29 = vld [vmem:[%s3193_s1 + $0x248] sm:$0xff]   ;;  %v2582_v37 = vld [vmem:[%s3193_s1 + $0x360] sm:$0xff]  }
  0x39   : > { %2317 = vmatprep.subr.bf16.mxu1 %v2515_v44  ;;  %v2560_v40 = vld [vmem:[%s3193_s1 + $0x208] sm:$0xff]  }
  0x3a   : > { %2290 = vmatpush3.bf16.msra.mxu0 %v2516_v47  ;;  %v2561_v44 = vld [vmem:[%s3193_s1 + $0x288] sm:$0xff]   ;;  %v2562_v47 = vld [vmem:[%s3193_s1 + $0x240] sm:$0xff]  }
  0x3b   : > { %2291 = vmatprep.subr.bf16.mxu0 %v2518_v51  ;;  %v2564_v51 = vld [vmem:[%s3193_s1 + $0x200] sm:$0xff]  }
  0x3c   : > { %2318 = vmatpush3.bf16.msra.mxu1 %v2517_v49  ;;  %v2563_v49 = vld [vmem:[%s3193_s1 + $0x2c0] sm:$0xff]  }
  0x3d   : > { %2319 = vmatprep.subr.bf16.mxu1 %v2519_v52  ;;  %v2565_v52 = vld [vmem:[%s3193_s1 + $0x280] sm:$0xff]  }
  0x3e   : > { %2292 = vmatpush3.bf16.msra.mxu0 %v2520_v53  ;;  %v178_v53 = vld [vmem:[%s2738_s27 + $0x30] sm:$0x77] }
  0x3f   : > { %2293 = vmatprep.subr.bf16.mxu0 %v2522_v56  ;;  %v3035_v56 = vcombine.low %v2747_v32, %v178_v53 }
  0x40   : > { %2320 = vmatpush3.bf16.msra.mxu1 %v2521_v54  ;;  %v179_v54 = vld [vmem:[%s2738_s27 + $0x38] sm:$0x77] }
  0x41   : > { %2321 = vmatprep.subr.bf16.mxu1 %v2523_v57  ;;  %v3038_v57 = vcombine.high %v2747_v32, %v178_v53  ;;  %v2596_v53 = vld [vmem:[%s3193_s1 + $0x308] sm:$0xff]  }
  0x42   : > { %2294 = vmatpush3.bf16.msra.mxu0 %v2524_v58  ;;  %v3041_v58 = vcombine.low %v2761_v36, %v179_v54 }
  0x43   : > { %2295 = vmatprep.subr.bf16.mxu0 %v2526_v60  ;;  %v2570_v60 = vld [vmem:[%s3193_s1 + $0x378] sm:$0xff]   ;;  %v1080_v32 = vshrl.u32 %v3038_v57, 16 }
  0x44   : > { %2322 = vmatpush3.bf16.msra.mxu1 %v2525_v59  ;;  %v3044_v59 = vcombine.high %v2761_v36, %v179_v54  ;;  %v2597_v54 = vld [vmem:[%s3193_s1 + $0x388] sm:$0xff]  }
  0x45   : > { %2323 = vmatprep.subr.bf16.mxu1 %v2527_v61  ;;  %v2571_v61 = vld [vmem:[%s3193_s1 + $0x3f8] sm:$0xff]  }
  0x46   : > { %2296 = vmatpush3.bf16.msra.mxu0 %v2528_v62  ;;  %v1083_v62 = vshll.u32 %v3038_v57, 16  ;;  %v1107_v36 = vshll.u32 %v3044_v59, 16  ;;  %v1487_v46 = vrot.slane %v3044_v59, 3 }
  0x47   : > { %2297 = vmatprep.subr.bf16.mxu0 %v2530_v0  ;;  %v1068_v0 = vshrl.u32 %v3035_v56, 16 }
  0x48   : > { %2324 = vmatpush3.bf16.msra.mxu1 %v2529_v63  ;;  %v1104_v63 = vshrl.u32 %v3044_v59, 16  ;;  %v2598_v59 = vld [vmem:[%s3193_s1 + $0x340] sm:$0xff]  }
  0x49   : > { %2325 = vmatprep.subr.bf16.mxu1 %v2531_v1  ;;  %v1071_v1 = vshll.u32 %v3035_v56, 16 }
  0x4a   : > { %2298 = vmatpush3.bf16.msra.mxu0 %v2532_v2  ;;  %v1092_v2 = vshrl.u32 %v3041_v58, 16 }
  0x4b   : > { %2339 = vmatprep.subr.bf16.mxu0 %v2534_v6  ;;  %v1082_v6 = vrot.slane %v1080_v32, 2  ;;  %v2601_v32 = vld [vmem:[%s3193_s1 + $0x380] sm:$0xff]  }
  0x4c   : > { %2326 = vmatpush3.bf16.msra.mxu1 %v2533_v5  ;;  %v1095_v5 = vshll.u32 %v3041_v58, 16 }
  0x4d   : > { %925 = vmatmul.mubr.bf16.vlgmr.msra.gmra.mxu0 %v2767_v38  ;;  %2367 = vmatprep.subr.bf16.mxu1 %v2535_v7  ;;  %v1085_v7 = vrot.slane %v1083_v62, 3  ;;  %v1477_v62 = vrot.slane %v2767_v38, 3 }
  0x4e   : > { %2340 = vmatpush3.bf16.msra.mxu0 %v2536_v8  ;;  %932 = vmatprep.mubr.bf16.mxu0 %v2754_v34  ;;  %v2545_v34 = vld [vmem:[%s3193_s1 + $0x2a8] sm:$0xff]   ;;  %v1106_v8 = vrot.slane %v1104_v63, 2  ;;  %v1478_v63 = vrot.slane %v3035_v56, 3 }
  0x4f   : > { %2341 = vmatprep.subr.bf16.mxu0 %v2538_v10  ;;  %973 = vmatmul.mubr.bf16.vlgmr.msra.gmra.mxu1 %v2777_v43  ;;  %v1070_v10 = vrot.slane %v1068_v0, 2  ;;  %v1484_v0 = vrot.slane %v3041_v58, 3 }
  0x50   : > { %2368 = vmatpush3.bf16.msra.mxu1 %v2537_v9  ;;  %980 = vmatprep.mubr.bf16.mxu1 %v2774_v42  ;;  %v2548_v42 = vld [vmem:[%s3193_s1 + $0x220] sm:$0xff]   ;;  %v1109_v9 = vrot.slane %v1107_v36, 3  ;;  %v1483_v36 = vrot.slane %v2777_v43, 3 }
  0x51   : > { %2369 = vmatprep.subr.bf16.mxu1 %v2539_v11  ;;  %v1073_v11 = vrot.slane %v1071_v1, 3  ;;  %v1479_v1 = vsel %vm1476_vm2, %v1477_v62, %v1478_v63 }
  0x52   : > { %2342 = vmatpush3.bf16.msra.mxu0 %v2540_v12  ;;  %v1094_v12 = vrot.slane %v1092_v2, 2  ;;  %v1485_v2 = vsel %vm1476_vm2, %v1483_v36, %v1484_v0 }
  0x53   : > { %2343 = vmatprep.subr.bf16.mxu0 %v2542_v14  ;;  %v2572_v14 = vld [vmem:[%s3193_s1 + $0x338] sm:$0xff]  }
  0x54   : > { %2370 = vmatpush3.bf16.msra.mxu1 %v2541_v13  ;;  %v1097_v13 = vrot.slane %v1095_v5, 3 }
  0x55   : > { %933 = vmatmul.mubr.bf16.gmra.mxu0 %v2758_v35  ;;  %2371 = vmatprep.subr.bf16.mxu1 %v2543_v15  ;;  %v2549_v35 = vld [vmem:[%s3193_s1 + $0x2a0] sm:$0xff]   ;;  %v2573_v15 = vld [vmem:[%s3193_s1 + $0x3b8] sm:$0xff]  }
  0x56   : > { %2344 = vmatpush3.bf16.msra.mxu0 %v2544_v16  ;;  %v1086_v16 = vor.u32 %v1085_v7, %v1082_v6 }
  0x57   : > { %2345 = vmatprep.subr.bf16.mxu0 %v2546_v17  ;;  %981 = vmatmul.mubr.bf16.gmra.mxu1 %v2794_v55  ;;  %v2553_v55 = vld [vmem:[%s3193_s1 + $0x298] sm:$0xff]   ;;  %v1074_v17 = vor.u32 %v1073_v11, %v1070_v10 }
  0x58   : > { %2372 = vmatpush3.bf16.msra.mxu1 %v2545_v34  ;;  %v1110_v34 = vor.u32 %v1109_v9, %v1106_v8 }
  0x59   : > { %2373 = vmatprep.subr.bf16.mxu1 %v2547_v18  ;;  %v1098_v18 = vor.u32 %v1097_v13, %v1094_v12 }
  0x5a   : > { %2346 = vmatpush3.bf16.msra.mxu0 %v2548_v42  ;;  %v2574_v42 = vld [vmem:[%s3193_s1 + $0x370] sm:$0xff]  }
  0x5b   : > { %2347 = vmatprep.subr.bf16.mxu0 %v2550_v19  ;;  %v1111_v19 = vsel %vm1063_vm1, %v1102_v45, %v1110_v34  ;;  %v1099_v24 = vsel %vm1063_vm1, %v1090_v50, %v1098_v18  ;;  %v1481_v45 = vrot.slane %v3038_v57, 3  ;;  %v2584_v50 = vld [vmem:[%s3193_s1 + $0x320] sm:$0xff]  }
  0x5c   : > { %2374 = vmatpush3.bf16.msra.mxu1 %v2549_v35  ;;  %v1087_v35 = vsel %vm1063_vm1, %v1078_v30, %v1086_v16  ;;  %1392 = vmatprep.mubr.bf16.mxu1 %v1111_v19  ;;  %v2579_v30 = vld [vmem:[%s3193_s1 + $0x3e8] sm:$0xff]  }
  0x5d   : > { %2375 = vmatprep.subr.bf16.mxu1 %v2551_v20  ;;  %v2575_v20 = vld [vmem:[%s3193_s1 + $0x3f0] sm:$0xff]   ;;  %1344 = vmatprep.mubr.bf16.mxu0 %v1087_v35 }
  0x5e   : > { %2348 = vmatpush3.bf16.msra.mxu0 %v2552_v21  ;;  %v1075_v21 = vsel %vm1063_vm1, %v1066_v48, %v1074_v17  ;;  %v2583_v48 = vld [vmem:[%s3193_s1 + $0x3e0] sm:$0xff]  }
  0x5f   : > { %2349 = vmatprep.subr.bf16.mxu0 %v2554_v22  ;;  %v1482_v22 = vsel %vm1476_vm2, %v1480_v4, %v1481_v45 }
  0x60   : > { %2376 = vmatpush3.bf16.msra.mxu1 %v2553_v55  ;;  %v2585_v55 = vld [vmem:[%s3193_s1 + $0x3a0] sm:$0xff]  }
  0x61   : > { %2377 = vmatprep.subr.bf16.mxu1 %v2555_v23  ;;  %v1488_v23 = vsel %vm1476_vm2, %v1486_v31, %v1487_v46 }
  0x62   : > { %2350 = vmatpush3.bf16.msra.mxu0 %v2556_v25  ;;  %v2586_v25 = vld [vmem:[%s3193_s1 + $0x358] sm:$0xff]  }
  0x63   : > { %2351 = vmatprep.subr.bf16.mxu0 %v2558_v29  ;;  %v2588_v29 = vld [vmem:[%s3193_s1 + $0x318] sm:$0xff]  }
  0x64   : > { %2378 = vmatpush3.bf16.msra.mxu1 %v2557_v27  ;;  %v2587_v27 = vld [vmem:[%s3193_s1 + $0x3d8] sm:$0xff]  }
  0x65   : > { %2379 = vmatprep.subr.bf16.mxu1 %v2559_v39  ;;  %v2589_v39 = vld [vmem:[%s3193_s1 + $0x398] sm:$0xff]  }
  0x66   : > { %2352 = vmatpush3.bf16.msra.mxu0 %v2560_v40  ;;  %v2590_v40 = vld [vmem:[%s3193_s1 + $0x350] sm:$0xff]  }
  0x67   : > { %2353 = vmatprep.subr.bf16.mxu0 %v2562_v47  ;;  %v2592_v47 = vld [vmem:[%s3193_s1 + $0x310] sm:$0xff]  }
  0x68   : > { %2380 = vmatpush3.bf16.msra.mxu1 %v2561_v44  ;;  %v2591_v44 = vld [vmem:[%s3193_s1 + $0x3d0] sm:$0xff]  }
  0x69   : > { %2381 = vmatprep.subr.bf16.mxu1 %v2563_v49  ;;  %v2593_v49 = vld [vmem:[%s3193_s1 + $0x390] sm:$0xff]  }
  0x6a   : > { %2354 = vmatpush3.bf16.msra.mxu0 %v2564_v51  ;;  %v2594_v51 = vld [vmem:[%s3193_s1 + $0x348] sm:$0xff]  }
  0x6b   : > { %2395 = vmatprep.subr.bf16.mxu0 %v2570_v60  ;;  %v2599_v60 = vld [vmem:[%s3193_s1 + $0x3c0] sm:$0xff]  }
  0x6c   : > { %2382 = vmatpush3.bf16.msra.mxu1 %v2565_v52  ;;  %v2595_v52 = vld [vmem:[%s3193_s1 + $0x3c8] sm:$0xff]  }
  0x6d   : > { %2423 = vmatprep.subr.bf16.mxu1 %v2571_v61  ;;  %1345 = vmatmul.mubr.bf16.vlgmr.msra.gmra.mxu0 %v1075_v21  ;;  %v2600_v61 = vld [vmem:[%s3193_s1 + $0x300] sm:$0xff]  }
  0x6e   : > { %2396 = vmatpush3.bf16.msra.mxu0 %v2572_v14  ;;  %1352 = vmatprep.mubr.bf16.mxu0 %v1086_v16 }
  0x6f   : > { %1393 = vmatmul.mubr.bf16.vlgmr.msra.gmra.mxu1 %v1099_v24  ;;  %2397 = vmatprep.subr.bf16.mxu0 %v2574_v42 }
  0x70   : > { %2424 = vmatpush3.bf16.msra.mxu1 %v2573_v15  ;;  %1400 = vmatprep.mubr.bf16.mxu1 %v1110_v34 }
  0x71   : > { %2425 = vmatprep.subr.bf16.mxu1 %v2575_v20 }
  0x72   : > { %2398 = vmatpush3.bf16.msra.mxu0 %v2576_v26 }
  0x73   : > { %2399 = vmatprep.subr.bf16.mxu0 %v2578_v3 }
  0x74   : > { %2426 = vmatpush3.bf16.msra.mxu1 %v2577_v28 }
  0x75   : > { %2427 = vmatprep.subr.bf16.mxu1 %v2579_v30  ;;  %1353 = vmatmul.mubr.bf16.gmra.mxu0 %v1074_v17 }
  0x76   : > { %2400 = vmatpush3.bf16.msra.mxu0 %v2580_v41  ;;  %1721 = vmatprep.mubr.bf16.mxu0 %v1482_v22 }
  0x77   : > { %1401 = vmatmul.mubr.bf16.gmra.mxu1 %v1098_v18  ;;  %2401 = vmatprep.subr.bf16.mxu0 %v2582_v37 }
  0x78   : > { %2428 = vmatpush3.bf16.msra.mxu1 %v2581_v33  ;;  %1769 = vmatprep.mubr.bf16.mxu1 %v1488_v23 }
  0x79   : > { %2429 = vmatprep.subr.bf16.mxu1 %v2583_v48 }
  0x7a   : > { %2402 = vmatpush3.bf16.msra.mxu0 %v2584_v50 }
  0x7b   : > { %2403 = vmatprep.subr.bf16.mxu0 %v2586_v25 }
  0x7c   : > { %2430 = vmatpush3.bf16.msra.mxu1 %v2585_v55 }
  0x7d   : > { %2431 = vmatprep.subr.bf16.mxu1 %v2587_v27 }
  0x7e   : > { %2404 = vmatpush3.bf16.msra.mxu0 %v2588_v29 }
  0x7f   : > { %2405 = vmatprep.subr.bf16.mxu0 %v2590_v40 }
  0x80   : > { %2432 = vmatpush3.bf16.msra.mxu1 %v2589_v39 }
  0x81   : > { %2433 = vmatprep.subr.bf16.mxu1 %v2591_v44 }
  0x82   : > { %2406 = vmatpush3.bf16.msra.mxu0 %v2592_v47 }
  0x83   : > { %2407 = vmatprep.subr.bf16.mxu0 %v2594_v51 }
  0x84   : > { %2434 = vmatpush3.bf16.msra.mxu1 %v2593_v49 }
  0x85   : > { %2435 = vmatprep.subr.bf16.mxu1 %v2595_v52 }
  0x86   : > { %2408 = vmatpush3.bf16.msra.mxu0 %v2596_v53 }
  0x87   : > { %2409 = vmatprep.subr.bf16.mxu0 %v2598_v59 }
  0x88   : > { %2436 = vmatpush3.bf16.msra.mxu1 %v2597_v54 }
  0x89   : > { %2437 = vmatprep.subr.bf16.mxu1 %v2599_v60 }
  0x8a   : > { %2410 = vmatpush3.bf16.msra.mxu0 %v2600_v61 }
  0x8c   : > { %2438 = vmatpush3.bf16.msra.mxu1 %v2601_v32 }
  0x8d   : > { %1722 = vmatmul.mubr.bf16.vlgmr.msra.gmra.mxu0 %v1479_v1 }
  0x8e   : > { %1729 = vmatprep.mubr.bf16.mxu0 %v1481_v45 }
  0x8f   : > { %1770 = vmatmul.mubr.bf16.vlgmr.msra.gmra.mxu1 %v1485_v2 }
  0x90   : > { %1777 = vmatprep.mubr.bf16.mxu1 %v1487_v46 }
  0x95   : > { %1730 = vmatmul.mubr.bf16.gmra.mxu0 %v1478_v63 }
  0x97   : > { %1778 = vmatmul.mubr.bf16.gmra.mxu1 %v1484_v0 }
  0xed   : > { %v2243_v38 = vpop.f32.mrf.mxu0 }
  0xee   : > { %v2271_v58 = vpop.f32.mrf.mxu1 }
  0xef   : > { %v2244_v43 = vpop.f32.mrf.mxu0 }
  0xf0   : > { %v2245_v56 = vadd.f32 %v2244_v43, %v2243_v38  ;;  %v2272_v6 = vpop.f32.mrf.mxu1 }
  0xf1   : > { %v2246_v5 = vpop.f32.mrf.mxu0  ;;  %v2273_v8 = vadd.f32 %v2272_v6, %v2271_v58 }
  0xf2   : > { %v2274_v10 = vpop.f32.mrf.mxu1 }
  0xf3   : > { %v2247_v7 = vpop.f32.mrf.mxu0  ;;  %v679_v12 = vadd.f32 %v2273_v8, %v2245_v56 }
  0xf4   : > { %v2248_v9 = vadd.f32 %v2247_v7, %v2246_v5  ;;  %v2275_v13 = vpop.f32.mrf.mxu1 }
  0xf5   : > { %v2249_v11 = vpop.f32.mrf.mxu0  ;;  %v2276_v15 = vadd.f32 %v2275_v13, %v2274_v10 }
  0xf7   : > { %v2250_v14 = vpop.f32.mrf.mxu0  ;;  %v2277_v16 = vpop.f32.mrf.mxu1  ;;  %v682_v17 = vadd.f32 %v2276_v15, %v2248_v9 }
  0xf8   : > { %v2251_v57 = vadd.f32 %v2250_v14, %v2249_v11 }
  0xf9   : > { %v2252_v34 = vpop.f32.mrf.mxu0  ;;  %v2278_v18 = vpop.f32.mrf.mxu1 }
  0xfa   : > { %v2279_v35 = vadd.f32 %v2278_v18, %v2277_v16 }
  0xfb   : > { %v2253_v42 = vpop.f32.mrf.mxu0  ;;  %v2280_v19 = vpop.f32.mrf.mxu1 }
  0xfc   : > { %v687_v20 = vadd.f32 %v2279_v35, %v2251_v57 }
  0xfd   : > { %v2281_v21 = vpop.f32.mrf.mxu1 }
 0x10d   : > { %v2299_v24 = vpop.f32.mrf.mxu0 }
 0x10f   : > { %v2300_v26 = vpop.f32.mrf.mxu0  ;;  %v2327_v3 = vpop.f32.mrf.mxu1 }
 0x110   : > { %v2301_v28 = vadd.f32 %v2300_v26, %v2299_v24 }
 0x111   : > { %v2302_v4 = vpop.f32.mrf.mxu0  ;;  %v2328_v31 = vpop.f32.mrf.mxu1 }
 0x112   : > { %v927_v30 = vadd.f32 %v2301_v28, %v679_v12  ;;  %v2329_v45 = vadd.f32 %v2328_v31, %v2327_v3  ;;  %v2212_v3 = vld [vmem:[%s3194_s2] ss:$0 sm:$0xff] }
 0x113   : > { %v2303_v41 = vpop.f32.mrf.mxu0  ;;  %v2330_v46 = vpop.f32.mrf.mxu1 }
 0x114   : > { %v2304_v33 = vadd.f32 %v2303_v41, %v2302_v4  ;;  %v975_v48 = vadd.f32 %v2329_v45, %v927_v30 }
 0x115   : > { %v2305_v37 = vpop.f32.mrf.mxu0  ;;  %v2331_v55 = vpop.f32.mrf.mxu1 }
 0x116   : > { %v930_v50 = vadd.f32 %v2304_v33, %v682_v17  ;;  %v2332_v23 = vadd.f32 %v2331_v55, %v2330_v46 }
 0x117   : > { %v2306_v22 = vpop.f32.mrf.mxu0  ;;  %v2333_v27 = vpop.f32.mrf.mxu1 }
 0x118   : > { %v2307_v25 = vadd.f32 %v2306_v22, %v2305_v37  ;;  %v978_v39 = vadd.f32 %v2332_v23, %v930_v50 }
 0x119   : > { %v2308_v29 = vpop.f32.mrf.mxu0  ;;  %v2334_v44 = vpop.f32.mrf.mxu1 }
 0x11a   : > { %v935_v40 = vadd.f32 %v2307_v25, %v687_v20  ;;  %v2335_v49 = vadd.f32 %v2334_v44, %v2333_v27 }
 0x11b   : > { %v2309_v47 = vpop.f32.mrf.mxu0  ;;  %v2336_v51 = vpop.f32.mrf.mxu1 }
 0x11c   : > { %v983_v52 = vadd.f32 %v2335_v49, %v935_v40 }
 0x11d   : > { %v2337_v53 = vpop.f32.mrf.mxu1 }
 0x12d   : > { %v2355_v54 = vpop.f32.mrf.mxu0 }
 0x12f   : > { %v2383_v59 = vpop.f32.mrf.mxu1  ;;  %v2356_v60 = vpop.f32.mrf.mxu0 }
 0x130   : > { %v2357_v6 = vadd.f32 %v2356_v60, %v2355_v54 }
 0x131   : > { %v2384_v61 = vpop.f32.mrf.mxu1  ;;  %v2358_v32 = vpop.f32.mrf.mxu0 }
 0x132   : > { %v2385_v7 = vadd.f32 %v2384_v61, %v2383_v59 }
 0x133   : > { %v2386_v62 = vpop.f32.mrf.mxu1  ;;  %v2359_v63 = vpop.f32.mrf.mxu0 }
 0x134   : > { %v1395_v8 = vadd.f32 %v2385_v7, %v2357_v6  ;;  %v2360_v11 = vadd.f32 %v2359_v63, %v2358_v32 }
 0x135   : > { %v2387_v36 = vpop.f32.mrf.mxu1  ;;  %v2361_v0 = vpop.f32.mrf.mxu0 }
 0x136   : > { %v2388_v12 = vadd.f32 %v2387_v36, %v2386_v62  ;;  %v1408_v16 = vadd.f32 %v1395_v8, %v975_v48 }
 0x137   : > { %v2389_v1 = vpop.f32.mrf.mxu1  ;;  %v2362_v2 = vpop.f32.mrf.mxu0 }
 0x138   : > { %v1398_v18 = vadd.f32 %v2388_v12, %v2360_v11  ;;  %v2363_v42 = vadd.f32 %v2362_v2, %v2361_v0 }
 0x139   : > { %v2390_v38 = vpop.f32.mrf.mxu1  ;;  %v2364_v43 = vpop.f32.mrf.mxu0 }
 0x13a   : > { %v2391_v35 = vadd.f32 %v2390_v38, %v2389_v1  ;;  %v1409_v31 = vadd.f32 %v1398_v18, %v978_v39 }
 0x13b   : > { %v2392_v56 = vpop.f32.mrf.mxu1  ;;  %v2365_v58 = vpop.f32.mrf.mxu0 }
 0x13c   : > { %v1403_v41 = vadd.f32 %v2391_v35, %v2363_v42 }
 0x13d   : > { %v2393_v5 = vpop.f32.mrf.mxu1 }
 0x13e   : > { %v1410_v25 = vadd.f32 %v1403_v41, %v983_v52 }
 0x14d   : > { %v2411_v9 = vpop.f32.mrf.mxu0 }
 0x14f   : > { %v2439_v10 = vpop.f32.mrf.mxu1  ;;  %v2412_v13 = vpop.f32.mrf.mxu0 }
 0x150   : > { %v2413_v15 = vadd.f32 %v2412_v13, %v2411_v9 }
 0x151   : > { %v2440_v14 = vpop.f32.mrf.mxu1  ;;  %v2414_v34 = vpop.f32.mrf.mxu0 }
 0x152   : > { %v2441_v57 = vadd.f32 %v2440_v14, %v2439_v10 }
 0x153   : > { %v2442_v17 = vpop.f32.mrf.mxu1  ;;  %v2415_v20 = vpop.f32.mrf.mxu0 }
 0x154   : > { %v1772_v19 = vadd.f32 %v2441_v57, %v2413_v15  ;;  %v2416_v26 = vadd.f32 %v2415_v20, %v2414_v34 }
 0x155   : > { %v2443_v21 = vpop.f32.mrf.mxu1  ;;  %v2417_v4 = vpop.f32.mrf.mxu0 }
 0x156   : > { %v1785_v24 = vadd.f32 %v1772_v19, %v1408_v16  ;;  %v2444_v28 = vadd.f32 %v2443_v21, %v2442_v17 }
 0x157   : > { %v2445_v30 = vpop.f32.mrf.mxu1  ;;  %v2418_v33 = vpop.f32.mrf.mxu0 }
 0x158   : > { %v1775_v45 = vadd.f32 %v2444_v28, %v2416_v26  ;;  %v1795_v37 = vadd.f32 %v2212_v3, %v1785_v24  ;;  %v2419_v50 = vadd.f32 %v2418_v33, %v2417_v4 }
 0x159   : > { %v2446_v46 = vpop.f32.mrf.mxu1  ;;  %v2420_v22 = vpop.f32.mrf.mxu0 }
 0x15a   : > { %v1786_v48 = vadd.f32 %v1775_v45, %v1409_v31  ;;  %v2447_v55 = vadd.f32 %v2446_v46, %v2445_v30  ;;  %v1798_v47 = vmax.f32 %v1795_v37, 0.0 }
 0x15b   : > { %v2448_v23 = vpop.f32.mrf.mxu1  ;;  %v2421_v40 = vpop.f32.mrf.mxu0 }
 0x15c   : > { %v1796_v27 = vadd.f32 %v2212_v3, %v1786_v48  ;;  %v1780_v29 = vadd.f32 %v2447_v55, %v2419_v50 }
 0x15d   : > { %v2449_v44 = vpop.f32.mrf.mxu1 }
 0x15e   : > { %v1799_v49 = vmax.f32 %v1796_v27, 0.0  ;;  %v1787_v51 = vadd.f32 %v1780_v29, %v1410_v25 }
 0x160   : > { %v2225_v39 = vpack.c.bf16 %v1799_v49, %v1798_v47  ;;  %v1797_v53 = vadd.f32 %v2212_v3, %v1787_v51 }
 0x162   : > { %v1800_v54 = vmax.f32 %v1797_v53, 0.0  ;;  %2226 = vst [vmem:[%s170_s7] sm:$0xff] %v2225_v39  }
 0x164   : > { %v2221_v59 = vpack.c.bf16 %v1800_v54, %v1800_v54 }
 0x166   : > { %1816 = vst [vmem:[%s170_s7 + $0x8] sm:$0x3] %v2221_v59 }
 0x167 PF: > { %s13_s12 = sadd.s32 1, %s2608_s12  }
 0x168   : > { %p10_p4 = scmp.ge.s32.totalorder %s13_s12, 4  }
 0x16a   :  { %12 = sbr.rel (!%p10_p4) target bundleno = 1 (0x1), region = 65 }

// kernel: fcn_model_forward.6
= control target key start
LH: loop header
LB: loop body
LE: loop exit
PB: predicated region body
PF: predicated region fallthrough
CT: control target
= control target key end

     0   :  { %s2703_s21 = smov 0   ;;  %s3170_s0 = inlined_call_operand.vmem [shape: bf16[2,42,128], index: 0, kind: input, shape index: {}]   ;;  %s3171_s1 = inlined_call_operand.vmem [shape: bf16[9,128,128], index: 1, kind: input, shape index: {}]   ;;  %s3172_s2 = inlined_call_operand.vmem [shape: f32[1,128], index: 2, kind: input, shape index: {}]   ;;  %s3173_s3 = inlined_call_operand.vmem [shape: bf16[128,128], index: 3, kind: input, shape index: {}]   ;;  %s3174_s4 = inlined_call_operand.vmem [shape: f32[1,128], index: 4, kind: input, shape index: {}]   ;;  %s3175_s5 = inlined_call_operand.vmem [shape: bf16[256,24], index: 5, kind: input, shape index: {}]   ;;  %s3176_s6 = inlined_call_operand.vmem [shape: f32[2,256,128], index: 6, kind: output, shape index: {}]  }
   0x1 LB: > { %s1935_s22 = sadd.s32 4294967295, %s2666_s21   ;;  %p1939_p0 = scmp.ge.s32.totalorder %s2666_s21, 1  ;;  %s2666_s21 = sphi %s2703_s21, %s16_s21  }
   0x2   : > { %p212_p1 = scmp.lt.s32.totalorder %s2666_s21, 3 }
   0x4   : > { %p213_p2 = pnand %p1939_p0, %p212_p1 }
   0x5   : > { %p242_p3 = scmp.lt.s32.totalorder (!%p213_p2), %s1935_s22, 1 }
   0x6   : > { %216 = sbr.rel (%p213_p2) target bundleno = 845 (0x34d), region = 44 }
   0xb   : > { %v2558_v0 = vld [vmem:[%s3171_s1 + $0x78] sm:$0xff]   ;;  %v2559_v1 = vld [vmem:[%s3171_s1 + $0x70] sm:$0xff]   ;;  %s3178_s22 = smov (!%p242_p3, %s1935_s22), 1  ;;  %v2560_v2 = vld [vmem:[%s3171_s1 + $0x68] sm:$0xff]   ;;  %vm301_vm0 = vsmask.f32 7424 }
   0xc   : > { %2312 = vmatprep.subr.bf16.mxu1 %v2558_v0  ;;  %s2549_s29 = smul.u32 24, %s3178_s22  ;;  %v2561_v3 = vld [vmem:[%s3171_s1 + $0x60] sm:$0xff]   ;;  %v2566_v4 = vld [vmem:[%s3171_s1 + $0xb8] sm:$0xff]   ;;  %v2570_v14 = vld [vmem:[%s3171_s1 + $0xb0] sm:$0xff]   ;;  %vm531_vm1 = vcmask 1046528   ;;  %vm653_vm3 = vcmask 1044480  }
   0xd   : > { %2313 = vmatpush3.bf16.msra.mxu1 %v2558_v0  ;;  %2352 = vmatprep.subr.bf16.mxu0 %v2566_v4  ;;  %v2562_v11 = vld [vmem:[%s3171_s1 + $0x58] sm:$0xff]   ;;  %v2572_v17 = vld [vmem:[%s3171_s1 + $0xa8] sm:$0xff]   ;;  %v2563_v19 = vld [vmem:[%s3171_s1 + $0x50] sm:$0xff]   ;;  %vm775_vm2 = vsmask.f32 4352  ;;  %vm1024_vm4 = vcmask 1045504  }
   0xe   : > { %2314 = vmatprep.subr.bf16.mxu1 %v2559_v1  ;;  %s2726_s8 = scalar_lea.vmem %s3170_s0, %s2549_s29  ;;  %2353 = vmatpush3.bf16.msra.mxu0 %v2566_v4  ;;  %v2574_v22 = vld [vmem:[%s3171_s1 + $0xa0] sm:$0xff]   ;;  %v2564_v26 = vld [vmem:[%s3171_s1 + $0x48] sm:$0xff]   ;;  %v2576_v27 = vld [vmem:[%s3171_s1 + $0x98] sm:$0xff]   ;;  %vm1146_vm5 = vsmask.f32 5376  ;;  %vm1634_vm6 = vcmask 195584  }
   0xf   : > { %v253_v5 = vld [vmem:[%s2726_s8] sm:$0xf]  ;;  %v2736_v6 = vld [vmem:[%s2726_s8 + $0x4] sm:$0xf]  ;;  %v2739_v7 = vld [vmem:[%s2726_s8 + $0x8] sm:$0xf]  ;;  %2354 = vmatprep.subr.bf16.mxu0 %v2570_v14 }
  0x10   : > { %v2742_v8 = vld [vmem:[%s2726_s8 + $0xc] sm:$0xf]  ;;  %v2745_v9 = vcombine.low %v253_v5, %v2736_v6  ;;  %v2565_v28 = vld [vmem:[%s3171_s1 + $0x40] sm:$0xff]   ;;  %v2578_v29 = vld [vmem:[%s3171_s1 + $0x90] sm:$0xff]   ;;  %v1969_v59 = vcombine.low %v2739_v7, %v2739_v7  ;;  %v2859_v0 = vcombine.low %v2736_v6, %v2739_v7  ;;  %vm1683_vm7 = vcmask 1043456   ;;  %s2193_s25 = sshll.u32 %s3178_s22, 8 }
  0x11   : > { %2315 = vmatpush3.bf16.msra.mxu1 %v2559_v1  ;;  %v2749_v10 = vcombine.low %v2739_v7, %v2742_v8  ;;  %v2569_v31 = vld [vmem:[%s3171_s1 + $0x38] sm:$0xff]   ;;  %v2580_v32 = vld [vmem:[%s3171_s1 + $0x88] sm:$0xff]   ;;  %v2571_v34 = vld [vmem:[%s3171_s1 + $0x30] sm:$0xff]   ;;  %s3101_s30 = scalar_lea.vmem %s3176_s6, %s2193_s25 }
  0x12   : > { %2316 = vmatprep.subr.bf16.mxu1 %v2560_v2  ;;  %v303_v12 = vshrl.u32 %v2745_v9, 16  ;;  %v305_v13 = vshll.u32 %v2745_v9, 16  ;;  %2355 = vmatpush3.bf16.msra.mxu0 %v2570_v14  ;;  %v532_v21 = vrot.slane %v2745_v9, 1  ;;  %v2582_v35 = vld [vmem:[%s3171_s1 + $0x80] sm:$0xff]   ;;  %v2573_v40 = vld [vmem:[%s3171_s1 + $0x28] sm:$0xff]   ;;  %v2584_v41 = vld [vmem:[%s3171_s1 + $0x138] sm:$0xff]  }
  0x13   : > { %v310_v15 = vshll.u32 %v2749_v10, 16  ;;  %2356 = vmatprep.subr.bf16.mxu0 %v2572_v17  ;;  %v533_v23 = vrot.slane %v2749_v10, 1  ;;  %v314_v30 = vshrl.u32 %v2749_v10, 16  ;;  %v2575_v44 = vld [vmem:[%s3171_s1 + $0x20] sm:$0xff]   ;;  %v2587_v45 = vld [vmem:[%s3171_s1 + $0x130] sm:$0xff]   ;;  %v2577_v47 = vld [vmem:[%s3171_s1 + $0x18] sm:$0xff]  }
  0x14   : > { %v307_v16 = vrot.slane %v305_v13, 1  ;;  %v776_v37 = vrot.slane %v303_v12, 3  ;;  %v777_v38 = vrot.slane %v305_v13, 4  ;;  %v2589_v48 = vld [vmem:[%s3171_s1 + $0x128] sm:$0xff]   ;;  %v2579_v49 = vld [vmem:[%s3171_s1 + $0x10] sm:$0xff]   ;;  %v2591_v50 = vld [vmem:[%s3171_s1 + $0x120] sm:$0xff]  }
  0x15   : > { %2317 = vmatpush3.bf16.msra.mxu1 %v2560_v2  ;;  %v312_v18 = vrot.slane %v310_v15, 1  ;;  %v534_v25 = vsel %vm531_vm1, %v532_v21, %v533_v23  ;;  %v779_v36 = vrot.slane %v314_v30, 3  ;;  %v780_v39 = vrot.slane %v310_v15, 4  ;;  %v2581_v51 = vld [vmem:[%s3171_s1 + $0x8] sm:$0xff]   ;;  %v2593_v52 = vld [vmem:[%s3171_s1 + $0x118] sm:$0xff]   ;;  %v2583_v53 = vld [vmem:[%s3171_s1] sm:$0xff]  }
  0x16   : > { %2318 = vmatprep.subr.bf16.mxu1 %v2561_v3  ;;  %v308_v20 = vor.u32 %v307_v16, %v303_v12  ;;  %2357 = vmatpush3.bf16.msra.mxu0 %v2572_v17  ;;  %v778_v42 = vor.u32 %v777_v38, %v776_v37  ;;  %v2595_v54 = vld [vmem:[%s3171_s1 + $0x110] sm:$0xff]   ;;  %v654_v55 = vrot.slane %v2745_v9, 3  ;;  %v2586_v56 = vld [vmem:[%s3171_s1 + $0xf8] sm:$0xff]   ;;  %v655_v57 = vrot.slane %v2749_v10, 3  ;;  %v2597_v58 = vld [vmem:[%s3171_s1 + $0x108] sm:$0xff]  }
  0x17   : > { %2358 = vmatprep.subr.bf16.mxu0 %v2574_v22  ;;  %2368 = vmatprep.mubr.bf16.mxu0 %v534_v25  ;;  %v316_v33 = vor.u32 %v314_v30, %v312_v18  ;;  %v2804_v43 = vor.u32 %v780_v39, %v779_v36  ;;  %v257_v60 = vld [vmem:[%s2726_s8 + $0x10] sm:$0xf]  ;;  %v2599_v63 = vld [vmem:[%s3171_s1 + $0x100] sm:$0xff]   ;;  %v2590_v2 = vld [vmem:[%s3171_s1 + $0xe8] sm:$0xff]   ;;  %v1025_v4 = vrot.slane %v2859_v0, 2  ;;  %v1282_v25 = vrot.slane %v2859_v0, 3 }
  0x18   : > { %v313_v24 = vsel %vm301_vm0, %v308_v20, %v312_v18  ;;  %v2588_v61 = vld [vmem:[%s3171_s1 + $0xf0] sm:$0xff]   ;;  %v656_v62 = vsel %vm653_vm3, %v654_v55, %v655_v57  ;;  %v2862_v1 = vcombine.low %v2742_v8, %v257_v60  ;;  %v2592_v6 = vld [vmem:[%s3171_s1 + $0xe0] sm:$0xff]   ;;  %v2605_v12 = vld [vmem:[%s3171_s1 + $0x1a8] sm:$0xff]  }
  0x19   : > { %2319 = vmatpush3.bf16.msra.mxu1 %v2561_v3  ;;  %2328 = vmatprep.mubr.bf16.mxu1 %v313_v24  ;;  %v782_v46 = vsel %vm775_vm2, %v778_v42, %v2804_v43  ;;  %v2601_v3 = vld [vmem:[%s3171_s1 + $0x1b8] sm:$0xff]   ;;  %v2603_v7 = vld [vmem:[%s3171_s1 + $0x1b0] sm:$0xff]   ;;  %v2607_v14 = vld [vmem:[%s3171_s1 + $0x1a0] sm:$0xff]  }
  0x1a   : > { %2320 = vmatprep.subr.bf16.mxu1 %v2562_v11  ;;  %2359 = vmatpush3.bf16.msra.mxu0 %v2574_v22  ;;  %v1026_v5 = vrot.slane %v2862_v1, 2  ;;  %v2596_v13 = vld [vmem:[%s3171_s1 + $0xd0] sm:$0xff]   ;;  %v2598_v15 = vld [vmem:[%s3171_s1 + $0xc8] sm:$0xff]   ;;  %v2609_v16 = vld [vmem:[%s3171_s1 + $0x198] sm:$0xff]   ;;  %v1156_v36 = vshrl.u32 %v2862_v1, 16  ;;  %v1159_v37 = vshll.u32 %v2862_v1, 16 }
  0x1b   : > { %2360 = vmatprep.subr.bf16.mxu0 %v2576_v27  ;;  %v2600_v17 = vld [vmem:[%s3171_s1 + $0xc0] sm:$0xff]   ;;  %v2611_v18 = vld [vmem:[%s3171_s1 + $0x190] sm:$0xff]   ;;  %v2613_v20 = vld [vmem:[%s3171_s1 + $0x188] sm:$0xff]  }
  0x1c   : > { %v2604_v21 = vld [vmem:[%s3171_s1 + $0x170] sm:$0xff]   ;;  %v2615_v22 = vld [vmem:[%s3171_s1 + $0x180] sm:$0xff]   ;;  %v2619_v24 = vld [vmem:[%s3171_s1 + $0x238] sm:$0xff]   ;;  %v1158_v42 = vrot.slane %v1156_v36, 2 }
  0x1d   : > { %2321 = vmatpush3.bf16.msra.mxu1 %v2562_v11  ;;  %v1027_v11 = vsel %vm1024_vm4, %v1025_v4, %v1026_v5  ;;  %v2608_v10 = vld [vmem:[%s3171_s1 + $0x160] sm:$0xff]   ;;  %v2624_v30 = vld [vmem:[%s3171_s1 + $0x228] sm:$0xff]   ;;  %v2628_v38 = vld [vmem:[%s3171_s1 + $0x218] sm:$0xff]  }
  0x1e   : > { %2322 = vmatprep.subr.bf16.mxu1 %v2563_v19  ;;  %2361 = vmatpush3.bf16.msra.mxu0 %v2576_v27  ;;  %v2622_v27 = vld [vmem:[%s3171_s1 + $0x230] sm:$0xff]   ;;  %v2616_v39 = vld [vmem:[%s3171_s1 + $0x140] sm:$0xff]   ;;  %v2638_v60 = vld [vmem:[%s3173_s3 + $0x28] sm:$0xff]  }
  0x1f   : > { %2362 = vmatprep.subr.bf16.mxu0 %v2578_v29  ;;  %v2631_v55 = vld [vmem:[%s3171_s1 + $0x1d0] sm:$0xff]  }
  0x21   : > { %2323 = vmatpush3.bf16.msra.mxu1 %v2563_v19  ;;  %v2602_v19 = vld [vmem:[%s3171_s1 + $0x178] sm:$0xff]  }
  0x22   : > { %2324 = vmatprep.subr.bf16.mxu1 %v2564_v26  ;;  %2363 = vmatpush3.bf16.msra.mxu0 %v2578_v29  ;;  %v2610_v29 = vld [vmem:[%s3171_s1 + $0x158] sm:$0xff]  }
  0x23   : > { %2364 = vmatprep.subr.bf16.mxu0 %v2580_v32 }
  0x25   : > { %2325 = vmatpush3.bf16.msra.mxu1 %v2564_v26  ;;  %v1283_v26 = vrot.slane %v2862_v1, 3 }
  0x26   : > { %2326 = vmatprep.subr.bf16.mxu1 %v2565_v28  ;;  %2365 = vmatpush3.bf16.msra.mxu0 %v2580_v32  ;;  %v2626_v32 = vld [vmem:[%s3171_s1 + $0x220] sm:$0xff]  }
  0x27   : > { %2366 = vmatprep.subr.bf16.mxu0 %v2582_v35 }
  0x29   : > { %2327 = vmatpush3.bf16.msra.mxu1 %v2565_v28  ;;  %v1284_v28 = vsel %vm653_vm3, %v1282_v25, %v1283_v26 }
  0x2a   : > { %2332 = vmatprep.subr.bf16.mxu1 %v2569_v31  ;;  %2367 = vmatpush3.bf16.msra.mxu0 %v2582_v35  ;;  %v1151_v35 = vshll.u32 %v2859_v0, 16 }
  0x2b   : > { %2392 = vmatprep.subr.bf16.mxu0 %v2584_v41 }
  0x2c   : > { %2329 = vmatmul.mubr.bf16.vlgmr.msra.gmra.mxu1 %v316_v33  ;;  %v2614_v33 = vld [vmem:[%s3171_s1 + $0x148] sm:$0xff]  }
  0x2d   : > { %2333 = vmatpush3.bf16.msra.mxu1 %v2569_v31  ;;  %2348 = vmatprep.mubr.bf16.mxu1 %v2745_v9  ;;  %v2594_v9 = vld [vmem:[%s3171_s1 + $0xd8] sm:$0xff]   ;;  %v2612_v31 = vld [vmem:[%s3171_s1 + $0x150] sm:$0xff]  }
  0x2e   : > { %2334 = vmatprep.subr.bf16.mxu1 %v2571_v34  ;;  %2369 = vmatmul.mubr.bf16.vlgmr.msra.gmra.mxu0 %v533_v23  ;;  %v2606_v23 = vld [vmem:[%s3171_s1 + $0x168] sm:$0xff]  }
  0x2f   : > { %2393 = vmatpush3.bf16.msra.mxu0 %v2584_v41  ;;  %2408 = vmatprep.mubr.bf16.mxu0 %v782_v46  ;;  %v1153_v41 = vrot.slane %v1151_v35, 3 }
  0x30   : > { %2394 = vmatprep.subr.bf16.mxu0 %v2587_v45 }
  0x31   : > { %2335 = vmatpush3.bf16.msra.mxu1 %v2571_v34  ;;  %v1148_v34 = vshrl.u32 %v2859_v0, 16 }
  0x32   : > { %2336 = vmatprep.subr.bf16.mxu1 %v2573_v40 }
  0x33   : > { %2395 = vmatpush3.bf16.msra.mxu0 %v2587_v45  ;;  %v2621_v45 = vld [vmem:[%s3171_s1 + $0x1f8] sm:$0xff]  }
  0x34   : > { %2396 = vmatprep.subr.bf16.mxu0 %v2589_v48 }
  0x35   : > { %2337 = vmatpush3.bf16.msra.mxu1 %v2573_v40  ;;  %v1150_v40 = vrot.slane %v1148_v34, 2 }
  0x36   : > { %2338 = vmatprep.subr.bf16.mxu1 %v2575_v44 }
  0x37   : > { %2397 = vmatpush3.bf16.msra.mxu0 %v2589_v48  ;;  %v1154_v46 = vor.u32 %v1153_v41, %v1150_v40  ;;  %v2632_v48 = vld [vmem:[%s3171_s1 + $0x208] sm:$0xff]  }
  0x38   : > { %2398 = vmatprep.subr.bf16.mxu0 %v2591_v50 }
  0x39   : > { %2339 = vmatpush3.bf16.msra.mxu1 %v2575_v44  ;;  %v2630_v44 = vld [vmem:[%s3171_s1 + $0x210] sm:$0xff]  }
  0x3a   : > { %2340 = vmatprep.subr.bf16.mxu1 %v2577_v47 }
  0x3b   : > { %2399 = vmatpush3.bf16.msra.mxu0 %v2591_v50  ;;  %v2623_v50 = vld [vmem:[%s3171_s1 + $0x1f0] sm:$0xff]  }
  0x3c   : > { %2400 = vmatprep.subr.bf16.mxu0 %v2593_v52 }
  0x3d   : > { %2341 = vmatpush3.bf16.msra.mxu1 %v2577_v47 }
  0x3e   : > { %2342 = vmatprep.subr.bf16.mxu1 %v2579_v49 }
  0x3f   : > { %2401 = vmatpush3.bf16.msra.mxu0 %v2593_v52  ;;  %v2634_v52 = vld [vmem:[%s3171_s1 + $0x200] sm:$0xff]  }
  0x40   : > { %2402 = vmatprep.subr.bf16.mxu0 %v2595_v54 }
  0x41   : > { %2343 = vmatpush3.bf16.msra.mxu1 %v2579_v49  ;;  %v2067_v49 = vcombine.low %v2742_v8, %v2742_v8  ;;  %v2625_v8 = vld [vmem:[%s3171_s1 + $0x1e8] sm:$0xff]  }
  0x42   : > { %2344 = vmatprep.subr.bf16.mxu1 %v2581_v51 }
  0x43   : > { %2403 = vmatpush3.bf16.msra.mxu0 %v2595_v54  ;;  %v2629_v54 = vld [vmem:[%s3171_s1 + $0x1d8] sm:$0xff]  }
  0x44   : > { %2404 = vmatprep.subr.bf16.mxu0 %v2597_v58 }
  0x45   : > { %2345 = vmatpush3.bf16.msra.mxu1 %v2581_v51 }
  0x46   : > { %2346 = vmatprep.subr.bf16.mxu1 %v2583_v53 }
  0x47   : > { %2405 = vmatpush3.bf16.msra.mxu0 %v2597_v58  ;;  %v2636_v58 = vld [vmem:[%s3173_s3 + $0x38] sm:$0xff]  }
  0x48   : > { %2406 = vmatprep.subr.bf16.mxu0 %v2599_v63 }
  0x49   : > { %2347 = vmatpush3.bf16.msra.mxu1 %v2583_v53  ;;  %v2627_v53 = vld [vmem:[%s3171_s1 + $0x1e0] sm:$0xff]  }
  0x4a   : > { %2372 = vmatprep.subr.bf16.mxu1 %v2586_v56 }
  0x4b   : > { %2407 = vmatpush3.bf16.msra.mxu0 %v2599_v63  ;;  %v2640_v63 = vld [vmem:[%s3173_s3 + $0x18] sm:$0xff]  }
  0x4c   : > { %2349 = vmatmul.mubr.bf16.vlgmr.msra.gmra.mxu1 %v1969_v59  ;;  %2432 = vmatprep.subr.bf16.mxu0 %v2601_v3  ;;  %v2637_v59 = vld [vmem:[%s3173_s3 + $0x30] sm:$0xff]  }
  0x4d   : > { %2373 = vmatpush3.bf16.msra.mxu1 %v2586_v56  ;;  %2388 = vmatprep.mubr.bf16.mxu1 %v656_v62  ;;  %v2633_v56 = vld [vmem:[%s3171_s1 + $0x1c8] sm:$0xff]  }
  0x4e   : > { %2374 = vmatprep.subr.bf16.mxu1 %v2588_v61  ;;  %2409 = vmatmul.mubr.bf16.vlgmr.msra.gmra.mxu0 %v2804_v43  ;;  %v1161_v43 = vrot.slane %v1159_v37, 3 }
  0x4f   : > { %2433 = vmatpush3.bf16.msra.mxu0 %v2601_v3  ;;  %2448 = vmatprep.mubr.bf16.mxu0 %v1027_v11  ;;  %v2642_v3 = vld [vmem:[%s3173_s3 + $0x8] sm:$0xff]  }
  0x50   : > { %2434 = vmatprep.subr.bf16.mxu0 %v2603_v7  ;;  %v1162_v47 = vor.u32 %v1161_v43, %v1158_v42 }
  0x51   : > { %2375 = vmatpush3.bf16.msra.mxu1 %v2588_v61  ;;  %v2639_v61 = vld [vmem:[%s3173_s3 + $0x20] sm:$0xff]  }
  0x52   : > { %2376 = vmatprep.subr.bf16.mxu1 %v2590_v2  ;;  %v1163_v51 = vsel %vm1146_vm5, %v1154_v46, %v1162_v47 }
  0x53   : > { %2435 = vmatpush3.bf16.msra.mxu0 %v2603_v7 }
  0x54   : > { %2436 = vmatprep.subr.bf16.mxu0 %v2605_v12 }
  0x55   : > { %2377 = vmatpush3.bf16.msra.mxu1 %v2590_v2  ;;  %v2641_v2 = vld [vmem:[%s3173_s3 + $0x10] sm:$0xff]  }
  0x56   : > { %2378 = vmatprep.subr.bf16.mxu1 %v2592_v6 }
  0x57   : > { %2437 = vmatpush3.bf16.msra.mxu0 %v2605_v12 }
  0x58   : > { %2438 = vmatprep.subr.bf16.mxu0 %v2607_v14 }
  0x59   : > { %2379 = vmatpush3.bf16.msra.mxu1 %v2592_v6  ;;  %v2643_v6 = vld [vmem:[%s3173_s3] sm:$0xff]  }
  0x5a   : > { %2380 = vmatprep.subr.bf16.mxu1 %v2594_v9 }
  0x5b   : > { %2439 = vmatpush3.bf16.msra.mxu0 %v2607_v14 }
  0x5c   : > { %2440 = vmatprep.subr.bf16.mxu0 %v2609_v16 }
  0x5d   : > { %2381 = vmatpush3.bf16.msra.mxu1 %v2594_v9 }
  0x5e   : > { %2382 = vmatprep.subr.bf16.mxu1 %v2596_v13 }
  0x5f   : > { %2441 = vmatpush3.bf16.msra.mxu0 %v2609_v16 }
  0x60   : > { %2442 = vmatprep.subr.bf16.mxu0 %v2611_v18 }
  0x61   : > { %2383 = vmatpush3.bf16.msra.mxu1 %v2596_v13 }
  0x62   : > { %2384 = vmatprep.subr.bf16.mxu1 %v2598_v15 }
  0x63   : > { %2443 = vmatpush3.bf16.msra.mxu0 %v2611_v18 }
  0x64   : > { %2444 = vmatprep.subr.bf16.mxu0 %v2613_v20 }
  0x65   : > { %2385 = vmatpush3.bf16.msra.mxu1 %v2598_v15 }
  0x66   : > { %2386 = vmatprep.subr.bf16.mxu1 %v2600_v17 }
  0x67   : > { %2445 = vmatpush3.bf16.msra.mxu0 %v2613_v20 }
  0x68   : > { %2446 = vmatprep.subr.bf16.mxu0 %v2615_v22 }
  0x69   : > { %2387 = vmatpush3.bf16.msra.mxu1 %v2600_v17 }
  0x6a   : > { %2412 = vmatprep.subr.bf16.mxu1 %v2602_v19 }
  0x6b   : > { %2447 = vmatpush3.bf16.msra.mxu0 %v2615_v22 }
  0x6c   : > { %2389 = vmatmul.mubr.bf16.vlgmr.msra.gmra.mxu1 %v655_v57  ;;  %2472 = vmatprep.subr.bf16.mxu0 %v2619_v24  ;;  %v2635_v57 = vld [vmem:[%s3171_s1 + $0x1c0] sm:$0xff]  }
  0x6d   : > { %2413 = vmatpush3.bf16.msra.mxu1 %v2602_v19  ;;  %2428 = vmatprep.mubr.bf16.mxu1 %v2859_v0 }
  0x6e   : > { %2414 = vmatprep.subr.bf16.mxu1 %v2604_v21  ;;  %2449 = vmatmul.mubr.bf16.vlgmr.msra.gmra.mxu0 %v1026_v5 }
  0x6f   : > { %2473 = vmatpush3.bf16.msra.mxu0 %v2619_v24  ;;  %2488 = vmatprep.mubr.bf16.mxu0 %v1284_v28 }
  0x70   : > { %2474 = vmatprep.subr.bf16.mxu0 %v2622_v27 }
  0x71   : > { %2415 = vmatpush3.bf16.msra.mxu1 %v2604_v21 }
  0x72   : > { %2416 = vmatprep.subr.bf16.mxu1 %v2606_v23 }
  0x73   : > { %2475 = vmatpush3.bf16.msra.mxu0 %v2622_v27 }
  0x74   : > { %2476 = vmatprep.subr.bf16.mxu0 %v2624_v30 }
  0x75   : > { %2417 = vmatpush3.bf16.msra.mxu1 %v2606_v23 }
  0x76   : > { %2418 = vmatprep.subr.bf16.mxu1 %v2608_v10 }
  0x77   : > { %2477 = vmatpush3.bf16.msra.mxu0 %v2624_v30 }
  0x78   : > { %2478 = vmatprep.subr.bf16.mxu0 %v2626_v32 }
  0x79   : > { %2419 = vmatpush3.bf16.msra.mxu1 %v2608_v10 }
  0x7a   : > { %2420 = vmatprep.subr.bf16.mxu1 %v2610_v29 }
  0x7b   : > { %2479 = vmatpush3.bf16.msra.mxu0 %v2626_v32 }
  0x7c   : > { %2480 = vmatprep.subr.bf16.mxu0 %v2628_v38 }
  0x7d   : > { %2421 = vmatpush3.bf16.msra.mxu1 %v2610_v29 }
  0x7e   : > { %2422 = vmatprep.subr.bf16.mxu1 %v2612_v31 }
  0x7f   : > { %2481 = vmatpush3.bf16.msra.mxu0 %v2628_v38 }
  0x80   : > { %2482 = vmatprep.subr.bf16.mxu0 %v2630_v44 }
  0x81   : > { %2423 = vmatpush3.bf16.msra.mxu1 %v2612_v31 }
  0x82   : > { %2424 = vmatprep.subr.bf16.mxu1 %v2614_v33 }
  0x83   : > { %2483 = vmatpush3.bf16.msra.mxu0 %v2630_v44 }
  0x84   : > { %2484 = vmatprep.subr.bf16.mxu0 %v2632_v48 }
  0x85   : > { %2425 = vmatpush3.bf16.msra.mxu1 %v2614_v33 }
  0x86   : > { %2426 = vmatprep.subr.bf16.mxu1 %v2616_v39 }
  0x87   : > { %2485 = vmatpush3.bf16.msra.mxu0 %v2632_v48 }
  0x88   : > { %2486 = vmatprep.subr.bf16.mxu0 %v2634_v52 }
  0x89   : > { %2427 = vmatpush3.bf16.msra.mxu1 %v2616_v39 }
  0x8a   : > { %2452 = vmatprep.subr.bf16.mxu1 %v2621_v45 }
  0x8b   : > { %2487 = vmatpush3.bf16.msra.mxu0 %v2634_v52 }
  0x8c   : > { %2429 = vmatmul.mubr.bf16.vlgmr.msra.gmra.mxu1 %v2067_v49 }
  0x8d   : > { %2453 = vmatpush3.bf16.msra.mxu1 %v2621_v45  ;;  %2468 = vmatprep.mubr.bf16.mxu1 %v1163_v51 }
  0x8e   : > { %2454 = vmatprep.subr.bf16.mxu1 %v2623_v50  ;;  %2489 = vmatmul.mubr.bf16.vlgmr.msra.gmra.mxu0 %v1283_v26 }
  0x91   : > { %2455 = vmatpush3.bf16.msra.mxu1 %v2623_v50 }
  0x92   : > { %2456 = vmatprep.subr.bf16.mxu1 %v2625_v8 }
  0x95   : > { %2457 = vmatpush3.bf16.msra.mxu1 %v2625_v8 }
  0x96   : > { %2458 = vmatprep.subr.bf16.mxu1 %v2627_v53 }
  0x99   : > { %2459 = vmatpush3.bf16.msra.mxu1 %v2627_v53 }
  0x9a   : > { %2460 = vmatprep.subr.bf16.mxu1 %v2629_v54 }
  0x9d   : > { %2461 = vmatpush3.bf16.msra.mxu1 %v2629_v54 }
  0x9e   : > { %2462 = vmatprep.subr.bf16.mxu1 %v2631_v55 }
  0xa1   : > { %2463 = vmatpush3.bf16.msra.mxu1 %v2631_v55 }
  0xa2   : > { %2464 = vmatprep.subr.bf16.mxu1 %v2633_v56 }
  0xa5   : > { %2465 = vmatpush3.bf16.msra.mxu1 %v2633_v56  ;;  %v2149_v56 = vld [vmem:[%s3172_s2] ss:$0 sm:$0xff] }
  0xa6   : > { %2466 = vmatprep.subr.bf16.mxu1 %v2635_v57 }
  0xa9   : > { %2467 = vmatpush3.bf16.msra.mxu1 %v2635_v57 }
  0xaa   : > { %2492 = vmatprep.subr.bf16.mxu1 %v2636_v58 }
  0xac   : > { %2469 = vmatmul.mubr.bf16.vlgmr.msra.gmra.mxu1 %v1162_v47 }
  0xad   : > { %2493 = vmatpush3.bf16.msra.mxu1 %v2636_v58 }
  0xae   : > { %2494 = vmatprep.subr.bf16.mxu1 %v2637_v59 }
  0xb1   : > { %2495 = vmatpush3.bf16.msra.mxu1 %v2637_v59 }
  0xb2   : > { %2496 = vmatprep.subr.bf16.mxu1 %v2638_v60 }
  0xb5   : > { %2497 = vmatpush3.bf16.msra.mxu1 %v2638_v60 }
  0xb6   : > { %2498 = vmatprep.subr.bf16.mxu1 %v2639_v61 }
  0xb9   : > { %2499 = vmatpush3.bf16.msra.mxu1 %v2639_v61 }
  0xba   : > { %2500 = vmatprep.subr.bf16.mxu1 %v2640_v63 }
  0xbd   : > { %2501 = vmatpush3.bf16.msra.mxu1 %v2640_v63 }
  0xbe   : > { %2502 = vmatprep.subr.bf16.mxu1 %v2641_v2 }
  0xc1   : > { %2503 = vmatpush3.bf16.msra.mxu1 %v2641_v2 }
  0xc2   : > { %2504 = vmatprep.subr.bf16.mxu1 %v2642_v3 }
  0xc5   : > { %2505 = vmatpush3.bf16.msra.mxu1 %v2642_v3 }
  0xc6   : > { %2506 = vmatprep.subr.bf16.mxu1 %v2643_v6 }
  0xc9   : > { %2507 = vmatpush3.bf16.msra.mxu1 %v2643_v6 }
  0xec   : > { %v2330_v62 = vpop.f32.mrf.mxu1 }
  0xee   : > { %v401_v0 = vpop.f32.mrf.mxu1  ;;  %v2370_v4 = vpop.f32.mrf.mxu0 }
  0xf0   : > { %v2331_v1 = vpop.f32.mrf.mxu1  ;;  %v619_v5 = vpop.f32.mrf.mxu0 }
  0xf2   : > { %v2371_v7 = vpop.f32.mrf.mxu0  ;;  %v404_v9 = vpop.f32.mrf.mxu1 }
  0xf3   : > { %v2644_v7 = vld [vmem:[%s3175_s5] sm:$0xff]  }
  0xf4   : > { %v622_v19 = vpop.f32.mrf.mxu0  ;;  %2516 = vmatprep.mubr.msk.bf16.mxu0 %vm1634_vm6, %v2644_v7 }
 0x10c   : > { %v2350_v11 = vpop.f32.mrf.mxu1 }
 0x10d   : > { %v509_v12 = vadd.f32 %v2350_v11, %v2330_v62 }
 0x10e   : > { %v500_v13 = vpop.f32.mrf.mxu1  ;;  %v2410_v21 = vpop.f32.mrf.mxu0 }
 0x10f   : > { %v501_v14 = vadd.f32 %v500_v13, %v401_v0  ;;  %v635_v15 = vadd.f32 %v2370_v4, %v509_v12 }
 0x110   : > { %v2351_v16 = vpop.f32.mrf.mxu1  ;;  %v867_v23 = vpop.f32.mrf.mxu0 }
 0x111   : > { %v633_v17 = vadd.f32 %v619_v5, %v501_v14 }
 0x112   : > { %v503_v18 = vpop.f32.mrf.mxu1  ;;  %v2411_v24 = vpop.f32.mrf.mxu0 }
 0x113   : > { %v504_v20 = vadd.f32 %v503_v18, %v404_v9  ;;  %v2646_v18 = vld [vmem:[%s3175_s5 + $0x10] sm:$0xff]   ;;  %v2652_v24 = vld [vmem:[%s3175_s5 + $0x40] sm:$0xff]  }
 0x114   : > { %v870_v31 = vpop.f32.mrf.mxu0 }
 0x115   : > { %v634_v22 = vadd.f32 %v622_v19, %v504_v20  ;;  %v2647_v19 = vld [vmem:[%s3175_s5 + $0x18] sm:$0xff]   ;;  %v2648_v20 = vld [vmem:[%s3175_s5 + $0x20] sm:$0xff]  }
 0x12c   : > { %v2390_v25 = vpop.f32.mrf.mxu1 }
 0x12d   : > { %v757_v26 = vadd.f32 %v2390_v25, %v635_v15  ;;  %v2653_v25 = vld [vmem:[%s3175_s5 + $0x48] sm:$0xff]  }
 0x12e   : > { %v741_v10 = vpop.f32.mrf.mxu1  ;;  %v2450_v32 = vpop.f32.mrf.mxu0 }
 0x12f   : > { %v755_v27 = vadd.f32 %v741_v10, %v633_v17  ;;  %v883_v28 = vadd.f32 %v2410_v21, %v757_v26  ;;  %v2645_v17 = vld [vmem:[%s3175_s5 + $0x8] sm:$0xff]   ;;  %v2654_v26 = vld [vmem:[%s3175_s5 + $0x50] sm:$0xff]   ;;  %v2655_v10 = vld [vmem:[%s3175_s5 + $0x58] sm:$0xff]  }
 0x130   : > { %v2391_v29 = vpop.f32.mrf.mxu1  ;;  %v1112_v33 = vpop.f32.mrf.mxu0  ;;  %v2649_v21 = vld [vmem:[%s3175_s5 + $0x28] sm:$0xff]  }
 0x131   : > { %v881_v30 = vadd.f32 %v867_v23, %v755_v27  ;;  %v2651_v23 = vld [vmem:[%s3175_s5 + $0x38] sm:$0xff]   ;;  %v2656_v27 = vld [vmem:[%s3175_s5 + $0x60] sm:$0xff]   ;;  %v2658_v29 = vld [vmem:[%s3175_s5 + $0x70] sm:$0xff]  }
 0x132   : > { %v2451_v34 = vpop.f32.mrf.mxu0  ;;  %v744_v35 = vpop.f32.mrf.mxu1 }
 0x133   : > { %v756_v43 = vadd.f32 %v744_v35, %v634_v22  ;;  %v2650_v22 = vld [vmem:[%s3175_s5 + $0x30] sm:$0xff]  }
 0x134   : > { %v1115_v39 = vpop.f32.mrf.mxu0 }
 0x135   : > { %v882_v47 = vadd.f32 %v870_v31, %v756_v43  ;;  %v3096_v31 = vld [vmem:[%s3174_s4] ss:$0 sm:$0xff] }
 0x14c   : > { %v2430_v36 = vpop.f32.mrf.mxu1 }
 0x14d   : > { %v1003_v44 = vadd.f32 %v2430_v36, %v883_v28  ;;  %v2657_v28 = vld [vmem:[%s3175_s5 + $0x68] sm:$0xff]  }
 0x14e   : > { %v987_v37 = vpop.f32.mrf.mxu1  ;;  %v2490_v40 = vpop.f32.mrf.mxu0 }
 0x14f   : > { %v1001_v45 = vadd.f32 %v987_v37, %v881_v30  ;;  %v1128_v48 = vadd.f32 %v2450_v32, %v1003_v44  ;;  %v2659_v30 = vld [vmem:[%s3175_s5 + $0x78] sm:$0xff]  }
 0x150   : > { %v2431_v38 = vpop.f32.mrf.mxu1  ;;  %v1369_v41 = vpop.f32.mrf.mxu0 }
 0x151   : > { %v1126_v52 = vadd.f32 %v1112_v33, %v1001_v45 }
 0x152   : > { %v2491_v42 = vpop.f32.mrf.mxu0  ;;  %v990_v46 = vpop.f32.mrf.mxu1 }
 0x153   : > { %v1002_v50 = vadd.f32 %v990_v46, %v882_v47 }
 0x154   : > { %v1372_v62 = vpop.f32.mrf.mxu0 }
 0x155   : > { %v1127_v58 = vadd.f32 %v1115_v39, %v1002_v50 }
 0x16c   : > { %v2470_v49 = vpop.f32.mrf.mxu1 }
 0x16d   : > { %v1264_v51 = vadd.f32 %v2470_v49, %v1128_v48 }
 0x16e   : > { %v1248_v8 = vpop.f32.mrf.mxu1 }
 0x16f   : > { %v1262_v53 = vadd.f32 %v1248_v8, %v1126_v52  ;;  %v1385_v54 = vadd.f32 %v2490_v40, %v1264_v51 }
 0x170   : > { %v2471_v55 = vpop.f32.mrf.mxu1 }
 0x171   : > { %v1383_v57 = vadd.f32 %v1369_v41, %v1262_v53  ;;  %v1395_v61 = vadd.f32 %v2149_v56, %v1385_v54 }
 0x172   : > { %v1251_v59 = vpop.f32.mrf.mxu1 }
 0x173   : > { %v1263_v60 = vadd.f32 %v1251_v59, %v1127_v58  ;;  %v1393_v63 = vadd.f32 %v2149_v56, %v1383_v57  ;;  %v1398_v2 = vmax.f32 %v1395_v61, 0.0 }
 0x175   : > { %v1384_v0 = vadd.f32 %v1372_v62, %v1263_v60  ;;  %v1396_v3 = vmax.f32 %v1393_v63, 0.0  ;;  %v1400_v6 = vpack.c.bf16 %v1398_v2, %v1398_v2 }
 0x177   : > { %v1394_v1 = vadd.f32 %v2149_v56, %v1384_v0 }
 0x179   : > { %v1397_v4 = vmax.f32 %v1394_v1, 0.0 }
 0x17b   : > { %v1399_v5 = vpack.c.bf16 %v1397_v4, %v1396_v3 }
 0x17d   : > { %2508 = vmatprep.mubr.bf16.mxu1 %v1399_v5 }
 0x17e   : > { %2509 = vmatmul.mubr.bf16.vlgmr.msra.gmra.mxu1 %v1400_v6 }
 0x23e   : > { %v2510_v9 = vpop.f32.mrf.mxu1 }
 0x23f   : > { %v1546_v11 = vpack.c.bf16 %v2510_v9, %v2510_v9 }
 0x240   : > { %v1499_v12 = vpop.f32.mrf.mxu1 }
 0x241   : > { %v1685_v13 = vsel %vm1683_vm7, %v1546_v11, 0  ;;  %2548 = vmatprep.subr.msk.bf16.mxu0 %vm1683_vm7, %v1546_v11 }
 0x242   : > { %v2511_v14 = vpop.f32.mrf.mxu1  ;;  %2513 = vmatpush3.bf16.msra.mxu0 %v1685_v13 }
 0x244   : > { %v1502_v15 = vpop.f32.mrf.mxu1 }
 0x245   : > { %v1545_v16 = vpack.c.bf16 %v1502_v15, %v1499_v12 }
 0x247   : > { %2514 = vmatprep.subr.bf16.mxu0 %v1545_v16 }
 0x248   : > { %2515 = vmatpush3.bf16.msra.mxu0 %v1545_v16 }
 0x24b   : > { %2517 = vmatmul.mubr.msk.bf16.vlgmr.msra.gmra.mxu0 %vm1634_vm6, %v2645_v17 }
 0x24c   : > { %2520 = vmatprep.mubr.msk.bf16.mxu0 %vm1634_vm6, %v2646_v18 }
 0x253   : > { %2521 = vmatmul.mubr.msk.bf16.gmra.mxu0 %vm1634_vm6, %v2647_v19 }
 0x254   : > { %2524 = vmatprep.mubr.msk.bf16.mxu0 %vm1634_vm6, %v2648_v20 }
 0x25b   : > { %2525 = vmatmul.mubr.msk.bf16.gmra.mxu0 %vm1634_vm6, %v2649_v21 }
 0x25c   : > { %2528 = vmatprep.mubr.msk.bf16.mxu0 %vm1634_vm6, %v2650_v22 }
 0x263   : > { %2529 = vmatmul.mubr.msk.bf16.gmra.mxu0 %vm1634_vm6, %v2651_v23 }
 0x264   : > { %2532 = vmatprep.mubr.msk.bf16.mxu0 %vm1634_vm6, %v2652_v24 }
 0x26b   : > { %2533 = vmatmul.mubr.msk.bf16.gmra.mxu0 %vm1634_vm6, %v2653_v25 }
 0x26c   : > { %2536 = vmatprep.mubr.msk.bf16.mxu0 %vm1634_vm6, %v2654_v26 }
 0x273   : > { %2537 = vmatmul.mubr.msk.bf16.gmra.mxu0 %vm1634_vm6, %v2655_v10 }
 0x274   : > { %2540 = vmatprep.mubr.msk.bf16.mxu0 %vm1634_vm6, %v2656_v27 }
 0x27b   : > { %2541 = vmatmul.mubr.msk.bf16.gmra.mxu0 %vm1634_vm6, %v2657_v28 }
 0x27c   : > { %2544 = vmatprep.mubr.msk.bf16.mxu0 %vm1634_vm6, %v2658_v29 }
 0x283   : > { %2545 = vmatmul.mubr.msk.bf16.gmra.mxu0 %vm1634_vm6, %v2659_v30 }
 0x30b   : > { %v2518_v32 = vpop.f32.mrf.mxu0 }
 0x30c   : > { %v1730_v33 = vadd.f32 %v2518_v32, %v3096_v31 }
 0x30d   : > { %v1721_v34 = vpop.f32.mrf.mxu0 }
 0x30e   : > { %1850 = vst [vmem:[%s3101_s30 + $0x10] sm:$0xff] %v1730_v33  ;;  %v1722_v35 = vadd.f32 %v3096_v31, %v1721_v34 }
 0x30f   : > { %v2519_v36 = vpop.f32.mrf.mxu0 }
 0x310   : > { %1848 = vst [vmem:[%s3101_s30] sm:$0xff] %v1722_v35  ;;  %v1733_v37 = vadd.f32 %v2519_v36, %v3096_v31 }
 0x311   : > { %v1724_v38 = vpop.f32.mrf.mxu0 }
 0x312   : > { %1851 = vst [vmem:[%s3101_s30 + $0x18] sm:$0xff] %v1733_v37  ;;  %v1725_v39 = vadd.f32 %v3096_v31, %v1724_v38 }
 0x313   : > { %v2522_v40 = vpop.f32.mrf.mxu0 }
 0x314   : > { %1849 = vst [vmem:[%s3101_s30 + $0x8] sm:$0xff] %v1725_v39  ;;  %v1746_v41 = vadd.f32 %v2522_v40, %v3096_v31 }
 0x315   : > { %v1737_v42 = vpop.f32.mrf.mxu0 }
 0x316   : > { %1854 = vst [vmem:[%s3101_s30 + $0x30] sm:$0xff] %v1746_v41  ;;  %v1738_v43 = vadd.f32 %v3096_v31, %v1737_v42 }
 0x317   : > { %v2523_v44 = vpop.f32.mrf.mxu0 }
 0x318   : > { %1852 = vst [vmem:[%s3101_s30 + $0x20] sm:$0xff] %v1738_v43  ;;  %v1749_v45 = vadd.f32 %v2523_v44, %v3096_v31 }
 0x319   : > { %v1740_v46 = vpop.f32.mrf.mxu0 }
 0x31a   : > { %1855 = vst [vmem:[%s3101_s30 + $0x38] sm:$0xff] %v1749_v45  ;;  %v1741_v47 = vadd.f32 %v3096_v31, %v1740_v46 }
 0x31b   : > { %v2526_v48 = vpop.f32.mrf.mxu0 }
 0x31c   : > { %1853 = vst [vmem:[%s3101_s30 + $0x28] sm:$0xff] %v1741_v47  ;;  %v1762_v49 = vadd.f32 %v2526_v48, %v3096_v31 }
 0x31d   : > { %v1753_v50 = vpop.f32.mrf.mxu0 }
 0x31e   : > { %1858 = vst [vmem:[%s3101_s30 + $0x50] sm:$0xff] %v1762_v49  ;;  %v1754_v51 = vadd.f32 %v3096_v31, %v1753_v50 }
 0x31f   : > { %v2527_v52 = vpop.f32.mrf.mxu0 }
 0x320   : > { %1856 = vst [vmem:[%s3101_s30 + $0x40] sm:$0xff] %v1754_v51  ;;  %v1765_v8 = vadd.f32 %v2527_v52, %v3096_v31 }
 0x321   : > { %v1756_v53 = vpop.f32.mrf.mxu0 }
 0x322   : > { %1859 = vst [vmem:[%s3101_s30 + $0x58] sm:$0xff] %v1765_v8  ;;  %v1757_v54 = vadd.f32 %v3096_v31, %v1756_v53 }
 0x323   : > { %v2530_v55 = vpop.f32.mrf.mxu0 }
 0x324   : > { %1857 = vst [vmem:[%s3101_s30 + $0x48] sm:$0xff] %v1757_v54  ;;  %v1778_v56 = vadd.f32 %v2530_v55, %v3096_v31 }
 0x325   : > { %v1769_v57 = vpop.f32.mrf.mxu0 }
 0x326   : > { %1862 = vst [vmem:[%s3101_s30 + $0x70] sm:$0xff] %v1778_v56  ;;  %v1770_v58 = vadd.f32 %v3096_v31, %v1769_v57 }
 0x327   : > { %v2531_v59 = vpop.f32.mrf.mxu0 }
 0x328   : > { %1860 = vst [vmem:[%s3101_s30 + $0x60] sm:$0xff] %v1770_v58  ;;  %v1781_v60 = vadd.f32 %v2531_v59, %v3096_v31 }
 0x329   : > { %v1772_v61 = vpop.f32.mrf.mxu0 }
 0x32a   : > { %1863 = vst [vmem:[%s3101_s30 + $0x78] sm:$0xff] %v1781_v60  ;;  %v1773_v62 = vadd.f32 %v3096_v31, %v1772_v61 }
 0x32b   : > { %v2534_v63 = vpop.f32.mrf.mxu0 }
 0x32c   : > { %1861 = vst [vmem:[%s3101_s30 + $0x68] sm:$0xff] %v1773_v62  ;;  %v1794_v0 = vadd.f32 %v2534_v63, %v3096_v31 }
 0x32d   : > { %v1785_v1 = vpop.f32.mrf.mxu0 }
 0x32e   : > { %1866 = vst [vmem:[%s3101_s30 + $0x90] sm:$0xff] %v1794_v0  ;;  %v1786_v2 = vadd.f32 %v3096_v31, %v1785_v1 }
 0x32f   : > { %v2535_v3 = vpop.f32.mrf.mxu0 }
 0x330   : > { %1864 = vst [vmem:[%s3101_s30 + $0x80] sm:$0xff] %v1786_v2  ;;  %v1797_v4 = vadd.f32 %v2535_v3, %v3096_v31 }
 0x331   : > { %v1788_v5 = vpop.f32.mrf.mxu0 }
 0x332   : > { %1867 = vst [vmem:[%s3101_s30 + $0x98] sm:$0xff] %v1797_v4  ;;  %v1789_v6 = vadd.f32 %v3096_v31, %v1788_v5 }
 0x333   : > { %v2538_v7 = vpop.f32.mrf.mxu0 }
 0x334   : > { %1865 = vst [vmem:[%s3101_s30 + $0x88] sm:$0xff] %v1789_v6  ;;  %v1810_v9 = vadd.f32 %v2538_v7, %v3096_v31 }
 0x335   : > { %v1801_v11 = vpop.f32.mrf.mxu0 }
 0x336   : > { %1870 = vst [vmem:[%s3101_s30 + $0xb0] sm:$0xff] %v1810_v9  ;;  %v1802_v12 = vadd.f32 %v3096_v31, %v1801_v11 }
 0x337   : > { %v2539_v13 = vpop.f32.mrf.mxu0 }
 0x338   : > { %1868 = vst [vmem:[%s3101_s30 + $0xa0] sm:$0xff] %v1802_v12  ;;  %v1813_v14 = vadd.f32 %v2539_v13, %v3096_v31 }
 0x339   : > { %v1804_v15 = vpop.f32.mrf.mxu0 }
 0x33a   : > { %1871 = vst [vmem:[%s3101_s30 + $0xb8] sm:$0xff] %v1813_v14  ;;  %v1805_v16 = vadd.f32 %v3096_v31, %v1804_v15 }
 0x33b   : > { %v2542_v17 = vpop.f32.mrf.mxu0 }
 0x33c   : > { %1869 = vst [vmem:[%s3101_s30 + $0xa8] sm:$0xff] %v1805_v16  ;;  %v1826_v18 = vadd.f32 %v2542_v17, %v3096_v31 }
 0x33d   : > { %v1817_v19 = vpop.f32.mrf.mxu0 }
 0x33e   : > { %1874 = vst [vmem:[%s3101_s30 + $0xd0] sm:$0xff] %v1826_v18  ;;  %v1818_v20 = vadd.f32 %v3096_v31, %v1817_v19 }
 0x33f   : > { %v2543_v21 = vpop.f32.mrf.mxu0 }
 0x340   : > { %1872 = vst [vmem:[%s3101_s30 + $0xc0] sm:$0xff] %v1818_v20  ;;  %v1829_v22 = vadd.f32 %v2543_v21, %v3096_v31 }
 0x341   : > { %v1820_v23 = vpop.f32.mrf.mxu0 }
 0x342   : > { %1875 = vst [vmem:[%s3101_s30 + $0xd8] sm:$0xff] %v1829_v22  ;;  %v1821_v24 = vadd.f32 %v3096_v31, %v1820_v23 }
 0x343   : > { %v2546_v25 = vpop.f32.mrf.mxu0 }
 0x344   : > { %1873 = vst [vmem:[%s3101_s30 + $0xc8] sm:$0xff] %v1821_v24  ;;  %v1842_v26 = vadd.f32 %v2546_v25, %v3096_v31 }
 0x345   : > { %v1833_v10 = vpop.f32.mrf.mxu0 }
 0x346   : > { %1878 = vst [vmem:[%s3101_s30 + $0xf0] sm:$0xff] %v1842_v26  ;;  %v1834_v27 = vadd.f32 %v3096_v31, %v1833_v10 }
 0x347   : > { %v2547_v28 = vpop.f32.mrf.mxu0 }
 0x348   : > { %1876 = vst [vmem:[%s3101_s30 + $0xe0] sm:$0xff] %v1834_v27  ;;  %v1845_v29 = vadd.f32 %v2547_v28, %v3096_v31 }
 0x349   : > { %v1836_v30 = vpop.f32.mrf.mxu0 }
 0x34a   : > { %1879 = vst [vmem:[%s3101_s30 + $0xf8] sm:$0xff] %v1845_v29  ;;  %v1837_v32 = vadd.f32 %v3096_v31, %v1836_v30 }
 0x34c   : > { %1877 = vst [vmem:[%s3101_s30 + $0xe8] sm:$0xff] %v1837_v32 }
 0x34d PF: > { %s16_s21 = sadd.s32 1, %s2666_s21  }
 0x34e   : > { %p13_p4 = scmp.ge.s32.totalorder %s16_s21, 4  }
 0x350   :  { %15 = sbr.rel (!%p13_p4) target bundleno = 1 (0x1), region = 82 }

</bundles_post_ra>
